<compile_context>
chip_gen: v7x
topology: tpu7x:2x2x1
jax: 0.10.0
libtpu: 0.0.40
codegen_flags: <defaults>
</compile_context>

<pallas_src>
import jax
import jax.numpy as jnp
from jax import lax
from jax.experimental import pallas as pl
from jax.experimental.pallas import tpu as pltpu


def _make_kernel(H, W, Cin, D, stride, conv_shortcut):
    Ho = (H - 1) // stride + 1
    Wo = (W - 1) // stride + 1

    def kernel(x_ref, bn1_s_ref, bn1_b_ref, w1_ref, alpha_ref, w2_ref,
               bn2_s_ref, bn2_b_ref, wsc_ref, bnsc_s_ref, bnsc_b_ref,
               out_ref, pad1_ref, slab1_ref, pad2_ref, slab2_ref):
        f32 = jnp.float32
        bf16 = jnp.bfloat16

        # ---- zero only the 1-pixel halo of the padded scratches ----
        # (interior is fully overwritten below every grid step)
        pad1_ref[0:1, :, :] = jnp.zeros((1, W + 2, Cin), f32)
        pad1_ref[H + 1:H + 2, :, :] = jnp.zeros((1, W + 2, Cin), f32)
        pad1_ref[:, 0:1, :] = jnp.zeros((H + 2, 1, Cin), f32)
        pad1_ref[:, W + 1:W + 2, :] = jnp.zeros((H + 2, 1, Cin), f32)
        pad2_ref[0:1, :, :] = jnp.zeros((1, W + 2, D), f32)
        pad2_ref[H + 1:H + 2, :, :] = jnp.zeros((1, W + 2, D), f32)
        pad2_ref[:, 0:1, :] = jnp.zeros((H + 2, 1, D), f32)
        pad2_ref[:, W + 1:W + 2, :] = jnp.zeros((H + 2, 1, D), f32)

        x = x_ref[0]                                           # (H, W, Cin) f32

        # ---------------- residual branch ----------------
        # BatchNorm2d(in_channel): folded per-channel affine (eval mode).
        pad1_ref[1:H + 1, 1:W + 1, :] = x * bn1_s_ref[...] + bn1_b_ref[...]

        # Conv2d(Cin -> D, 3x3, stride=1, pad=1) as ONE im2col MXU matmul.
        # im2col slab kept in bf16 (MXU-native, half the VMEM traffic).
        for t in range(9):
            ki, kj = t // 3, t % 3
            tap = pad1_ref[ki:ki + H, kj:kj + W, :]            # (H, W, Cin) f32
            slab1_ref[:, t * Cin:(t + 1) * Cin] = \
                tap.reshape(H * W, Cin).astype(bf16)
        acc1 = jnp.dot(slab1_ref[...], w1_ref[...],
                       preferred_element_type=f32)             # (H*W, D) f32

        # PReLU(depth): per-channel negative slope (f32).
        act = jnp.where(acc1 > 0, acc1, acc1 * alpha_ref[...])
        pad2_ref[1:H + 1, 1:W + 1, :] = act.reshape(H, W, D)

        # Conv2d(D -> D, 3x3, stride=s, pad=1) as ONE im2col MXU matmul.
        for t in range(9):
            ki, kj = t // 3, t % 3
            if stride == 1:
                tap = pad2_ref[ki:ki + Ho, kj:kj + Wo, :]
            else:
                # TODO(synk): a space-to-depth pad2 layout would replace these
                # strided sublane reads with contiguous parity slices.
                tap = pad2_ref[pl.ds(ki, Ho, stride=stride),
                               pl.ds(kj, Wo, stride=stride), :]
            slab2_ref[:, t * D:(t + 1) * D] = \
                tap.reshape(Ho * Wo, D).astype(bf16)
        res = jnp.dot(slab2_ref[...], w2_ref[...],
                      preferred_element_type=f32)              # (Ho*Wo, D) f32

        # BatchNorm2d(depth): folded affine (eval mode), f32.
        res = res * bn2_s_ref[...] + bn2_b_ref[...]

        # ---------------- shortcut branch ----------------
        if stride == 1:
            xs = x.reshape(Ho * Wo, Cin)                 # MaxPool2d(1,1) = id
        else:
            xs = x_ref[:, pl.ds(0, Ho, stride=stride),
                       pl.ds(0, Wo, stride=stride), :].reshape(Ho * Wo, Cin)
        if conv_shortcut:
            sc = jnp.dot(xs.astype(bf16), wsc_ref[...],
                         preferred_element_type=f32)
            sc = sc * bnsc_s_ref[...] + bnsc_b_ref[...]
        else:
            sc = xs                                      # Cin == D here (f32)

        out_ref[...] = (res + sc).reshape(1, Ho, Wo, D).astype(out_ref.dtype)

    return kernel, Ho, Wo


def bottleneck_ir(x_nchw, params, stride):
    """Forward pass of bottleneck_IR. Input/output are NCHW like PyTorch."""
    N, Cin, H, W = x_nchw.shape
    D = params["w1"].shape[-1]
    conv_shortcut = (Cin != D)
    kernel, Ho, Wo = _make_kernel(H, W, Cin, D, stride, conv_shortcut)

    x = jnp.transpose(x_nchw, (0, 2, 3, 1)).astype(jnp.float32)   # NHWC

    # Pre-flatten conv weights into im2col (9*C, D) layout and cast to bf16
    # (MXU-native); BN / PReLU parameters stay f32.
    w1f = params["w1"].reshape(9 * Cin, D).astype(jnp.bfloat16)
    w2f = params["w2"].reshape(9 * D, D).astype(jnp.bfloat16)
    wscb = params["wsc"].astype(jnp.bfloat16)

    def rep(shape):
        zeros = (0,) * len(shape)
        return pl.BlockSpec(shape, lambda n, z=zeros: z)

    grid_spec = pltpu.PrefetchScalarGridSpec(
        num_scalar_prefetch=0,
        grid=(N,),
        in_specs=[
            pl.BlockSpec((1, H, W, Cin), lambda n: (n, 0, 0, 0)),
            rep((1, Cin)), rep((1, Cin)),          # BN1 scale / bias (f32)
            rep((9 * Cin, D)),                     # conv1 weight, im2col, bf16
            rep((1, D)),                           # PReLU alpha (f32)
            rep((9 * D, D)),                       # conv2 weight, im2col, bf16
            rep((1, D)), rep((1, D)),              # BN2 scale / bias
            rep((Cin, D)),                         # shortcut 1x1 weight, bf16
            rep((1, D)), rep((1, D)),              # shortcut BN scale / bias
        ],
        out_specs=pl.BlockSpec((1, Ho, Wo, D), lambda n: (n, 0, 0, 0)),
        scratch_shapes=[
            pltpu.VMEM((H + 2, W + 2, Cin), jnp.float32),   # padded BN1(x)
            pltpu.VMEM((H * W, 9 * Cin), jnp.bfloat16),     # im2col slab conv1
            pltpu.VMEM((H + 2, W + 2, D), jnp.float32),     # padded PReLU out
            pltpu.VMEM((Ho * Wo, 9 * D), jnp.bfloat16),     # im2col slab conv2
        ])

    # Advisory cost hint for the XLA scheduler around the custom call.
    flops = N * (2 * H * W * 9 * Cin * D + 2 * Ho * Wo * 9 * D * D
                 + (2 * Ho * Wo * Cin * D if conv_shortcut else 0))
    bytes_accessed = (4 * (N * H * W * Cin + N * Ho * Wo * D)
                      + 2 * (w1f.size + w2f.size + wscb.size))
    cost = pl.CostEstimate(flops=flops, transcendentals=0,
                           bytes_accessed=bytes_accessed)

    out_nhwc = pl.pallas_call(
        kernel,
        out_shape=jax.ShapeDtypeStruct((N, Ho, Wo, D), jnp.float32),
        grid_spec=grid_spec,
        cost_estimate=cost,
        compiler_params=pltpu.CompilerParams(
            dimension_semantics=("parallel",),          # batch axis: megacore
            vmem_limit_bytes=48 * 1024 * 1024),
    )(x,
      params["bn1_s"], params["bn1_b"],
      w1f,
      params["alpha"],
      w2f,
      params["bn2_s"], params["bn2_b"],
      wscb, params["bnsc_s"], params["bnsc_b"])

    return jnp.transpose(out_nhwc, (0, 3, 1, 2))              # back to NCHW


# ----------------------- parameters & pure-JAX reference -----------------------

def init_params(key, in_channel, depth, eps=1e-5):
    ks = jax.random.split(key, 7)

    def fold_bn(k, c):
        kg, kb, km, kv = jax.random.split(k, 4)
        gamma = 1.0 + 0.1 * jax.random.normal(kg, (c,), jnp.float32)
        beta = 0.1 * jax.random.normal(kb, (c,), jnp.float32)
        mean = 0.1 * jax.random.normal(km, (c,), jnp.float32)
        var = 0.5 + jnp.abs(jax.random.normal(kv, (c,), jnp.float32))
        s = gamma * lax.rsqrt(var + eps)
        return s.reshape(1, c), (beta - mean * s).reshape(1, c)

    bn1_s, bn1_b = fold_bn(ks[0], in_channel)
    w1 = 0.2 * jax.random.normal(ks[1], (3, 3, in_channel, depth), jnp.float32)
    alpha = 0.25 + 0.05 * jax.random.normal(ks[2], (1, depth), jnp.float32)
    w2 = 0.2 * jax.random.normal(ks[3], (3, 3, depth, depth), jnp.float32)
    bn2_s, bn2_b = fold_bn(ks[4], depth)
    wsc = 0.2 * jax.random.normal(ks[5], (in_channel, depth), jnp.float32)
    bnsc_s, bnsc_b = fold_bn(ks[6], depth)
    return dict(bn1_s=bn1_s, bn1_b=bn1_b, w1=w1, alpha=alpha, w2=w2,
                bn2_s=bn2_s, bn2_b=bn2_b, wsc=wsc,
                bnsc_s=bnsc_s, bnsc_b=bnsc_b)


def reference(x_nchw, params, stride):
    """Pure-JAX reference with the SAME precision policy as the kernel:
    bf16 conv operands, f32 accumulation, f32 BN / PReLU math."""
    x = jnp.transpose(x_nchw, (0, 2, 3, 1)).astype(jnp.float32)
    Cin = x.shape[-1]
    D = params["w1"].shape[-1]
    dn = ('NHWC', 'HWIO', 'NHWC')
    bf16 = jnp.bfloat16

    y = x * params["bn1_s"][0] + params["bn1_b"][0]
    y = lax.conv_general_dilated(
        y.astype(bf16), params["w1"].astype(bf16), (1, 1), ((1, 1), (1, 1)),
        dimension_numbers=dn, preferred_element_type=jnp.float32)
    y = jnp.where(y > 0, y, y * params["alpha"][0])
    y = lax.conv_general_dilated(
        y.astype(bf16), params["w2"].astype(bf16), (stride, stride),
        ((1, 1), (1, 1)), dimension_numbers=dn,
        preferred_element_type=jnp.float32)
    res = y * params["bn2_s"][0] + params["bn2_b"][0]

    xs = x[:, ::stride, ::stride, :]
    if Cin != D:
        sc = lax.conv_general_dilated(
            xs.astype(bf16),
            params["wsc"].reshape(1, 1, Cin, D).astype(bf16),
            (1, 1), 'VALID', dimension_numbers=dn,
            preferred_element_type=jnp.float32)
        sc = sc * params["bnsc_s"][0] + params["bnsc_b"][0]
    else:
        sc = xs
    return jnp.transpose(res + sc, (0, 3, 1, 2))


if __name__ == "__main__":
    key = jax.random.PRNGKey(0)
    k_x, k_p1, k_p2 = jax.random.split(key, 3)

    # Case 1: in_channel != depth -> Conv1x1+BN shortcut, stride 2.
    N, Cin, H, W, D, stride = 2, 4, 16, 16, 8, 2
    x = jax.random.normal(k_x, (N, Cin, H, W), jnp.float32)
    params = init_params(k_p1, Cin, D)
    out = jax.block_until_ready(bottleneck_ir(x, params, stride))
    ref = reference(x, params, stride)
    assert out.shape == ref.shape == (N, D, H // stride, W // stride)
    assert jnp.allclose(out, ref, atol=2e-2, rtol=2e-2), \
        float(jnp.max(jnp.abs(out - ref)))

    # Case 2: in_channel == depth -> MaxPool2d(1, stride) shortcut, stride 1.
    x2 = jax.random.normal(k_x, (N, D, H, W), jnp.float32)
    params2 = init_params(k_p2, D, D)
    out2 = jax.block_until_ready(bottleneck_ir(x2, params2, 1))
    ref2 = reference(x2, params2, 1)
    assert out2.shape == ref2.shape == (N, D, H, W)
    assert jnp.allclose(out2, ref2, atol=2e-2, rtol=2e-2), \
        float(jnp.max(jnp.abs(out2 - ref2)))

    print("KERNEL_OK")
</pallas_src>

<mosaic_0001>
module attributes {stable_mosaic.version = 11 : i64} {
  func.func @kernel(%arg0: i32, %arg1: memref<1x16x16x4xf32, #tpu.memory_space<vmem>>, %arg2: memref<1x4xf32, #tpu.memory_space<vmem>>, %arg3: memref<1x4xf32, #tpu.memory_space<vmem>>, %arg4: memref<36x8xbf16, #tpu.memory_space<vmem>>, %arg5: memref<1x8xf32, #tpu.memory_space<vmem>>, %arg6: memref<72x8xbf16, #tpu.memory_space<vmem>>, %arg7: memref<1x8xf32, #tpu.memory_space<vmem>>, %arg8: memref<1x8xf32, #tpu.memory_space<vmem>>, %arg9: memref<4x8xbf16, #tpu.memory_space<vmem>>, %arg10: memref<1x8xf32, #tpu.memory_space<vmem>>, %arg11: memref<1x8xf32, #tpu.memory_space<vmem>>, %arg12: memref<1x8x8x8xf32, #tpu.memory_space<vmem>>, %arg13: memref<18x18x4xf32, #tpu.memory_space<vmem>>, %arg14: memref<256x36xbf16, #tpu.memory_space<vmem>>, %arg15: memref<18x18x8xf32, #tpu.memory_space<vmem>>, %arg16: memref<64x72xbf16, #tpu.memory_space<vmem>>) attributes {dimension_semantics = [#tpu.dimension_semantics<parallel>], iteration_bounds = array<i64: 2>, scalar_prefetch = 0 : i64, scratch_operands = 4 : i64, tpu.core_type = #tpu.core_type<tc>, window_params = [{transform_indices = @transform_0, window_bounds = array<i64: 1, 16, 16, 4>}, {pipeline_mode = #tpu.pipeline_mode<synchronous>, transform_indices = @transform_1, window_bounds = array<i64: 1, 4>}, {pipeline_mode = #tpu.pipeline_mode<synchronous>, transform_indices = @transform_2, window_bounds = array<i64: 1, 4>}, {pipeline_mode = #tpu.pipeline_mode<synchronous>, transform_indices = @transform_3, window_bounds = array<i64: 36, 8>}, {pipeline_mode = #tpu.pipeline_mode<synchronous>, transform_indices = @transform_4, window_bounds = array<i64: 1, 8>}, {pipeline_mode = #tpu.pipeline_mode<synchronous>, transform_indices = @transform_5, window_bounds = array<i64: 72, 8>}, {pipeline_mode = #tpu.pipeline_mode<synchronous>, transform_indices = @transform_6, window_bounds = array<i64: 1, 8>}, {pipeline_mode = #tpu.pipeline_mode<synchronous>, transform_indices = @transform_7, window_bounds = array<i64: 1, 8>}, {pipeline_mode = #tpu.pipeline_mode<synchronous>, transform_indices = @transform_8, window_bounds = array<i64: 4, 8>}, {pipeline_mode = #tpu.pipeline_mode<synchronous>, transform_indices = @transform_9, window_bounds = array<i64: 1, 8>}, {pipeline_mode = #tpu.pipeline_mode<synchronous>, transform_indices = @transform_10, window_bounds = array<i64: 1, 8>}, {transform_indices = @transform_11, window_bounds = array<i64: 1, 8, 8, 8>}]} {
    %cst = arith.constant 0.000000e+00 : f32
    %0 = vector.broadcast %cst : f32 to vector<1x18x4xf32>
    %c0 = arith.constant 0 : index
    %c0_0 = arith.constant 0 : index
    %c0_1 = arith.constant 0 : index
    %1 = vector.load %arg13[%c0, %c0_0, %c0_1] : memref<18x18x4xf32, #tpu.memory_space<vmem>>, vector<1x18x4xf32>
    tpu.vector_store %arg13[%c0, %c0_0, %c0_1], %0 {strides = array<i32>} : memref<18x18x4xf32, #tpu.memory_space<vmem>>, vector<1x18x4xf32>,
    %cst_2 = arith.constant 0.000000e+00 : f32
    %2 = vector.broadcast %cst_2 : f32 to vector<1x18x4xf32>
    %c17 = arith.constant 17 : index
    %c0_3 = arith.constant 0 : index
    %c0_4 = arith.constant 0 : index
    %3 = vector.load %arg13[%c17, %c0_3, %c0_4] : memref<18x18x4xf32, #tpu.memory_space<vmem>>, vector<1x18x4xf32>
    tpu.vector_store %arg13[%c17, %c0_3, %c0_4], %2 {strides = array<i32>} : memref<18x18x4xf32, #tpu.memory_space<vmem>>, vector<1x18x4xf32>,
    %cst_5 = arith.constant 0.000000e+00 : f32
    %4 = vector.broadcast %cst_5 : f32 to vector<18x1x4xf32>
    %c0_6 = arith.constant 0 : index
    %c0_7 = arith.constant 0 : index
    %c0_8 = arith.constant 0 : index
    %5 = vector.load %arg13[%c0_6, %c0_7, %c0_8] : memref<18x18x4xf32, #tpu.memory_space<vmem>>, vector<18x1x4xf32>
    tpu.vector_store %arg13[%c0_6, %c0_7, %c0_8], %4 {strides = array<i32>} : memref<18x18x4xf32, #tpu.memory_space<vmem>>, vector<18x1x4xf32>,
    %cst_9 = arith.constant 0.000000e+00 : f32
    %6 = vector.broadcast %cst_9 : f32 to vector<18x1x4xf32>
    %c0_10 = arith.constant 0 : index
    %c17_11 = arith.constant 17 : index
    %c0_12 = arith.constant 0 : index
    %7 = vector.load %arg13[%c0_10, %c17_11, %c0_12] : memref<18x18x4xf32, #tpu.memory_space<vmem>>, vector<18x1x4xf32>
    tpu.vector_store %arg13[%c0_10, %c17_11, %c0_12], %6 {strides = array<i32>} : memref<18x18x4xf32, #tpu.memory_space<vmem>>, vector<18x1x4xf32>,
    %cst_13 = arith.constant 0.000000e+00 : f32
    %8 = vector.broadcast %cst_13 : f32 to vector<1x18x8xf32>
    %c0_14 = arith.constant 0 : index
    %c0_15 = arith.constant 0 : index
    %c0_16 = arith.constant 0 : index
    %9 = vector.load %arg15[%c0_14, %c0_15, %c0_16] : memref<18x18x8xf32, #tpu.memory_space<vmem>>, vector<1x18x8xf32>
    tpu.vector_store %arg15[%c0_14, %c0_15, %c0_16], %8 {strides = array<i32>} : memref<18x18x8xf32, #tpu.memory_space<vmem>>, vector<1x18x8xf32>,
    %cst_17 = arith.constant 0.000000e+00 : f32
    %10 = vector.broadcast %cst_17 : f32 to vector<1x18x8xf32>
    %c17_18 = arith.constant 17 : index
    %c0_19 = arith.constant 0 : index
    %c0_20 = arith.constant 0 : index
    %11 = vector.load %arg15[%c17_18, %c0_19, %c0_20] : memref<18x18x8xf32, #tpu.memory_space<vmem>>, vector<1x18x8xf32>
    tpu.vector_store %arg15[%c17_18, %c0_19, %c0_20], %10 {strides = array<i32>} : memref<18x18x8xf32, #tpu.memory_space<vmem>>, vector<1x18x8xf32>,
    %cst_21 = arith.constant 0.000000e+00 : f32
    %12 = vector.broadcast %cst_21 : f32 to vector<18x1x8xf32>
    %c0_22 = arith.constant 0 : index
    %c0_23 = arith.constant 0 : index
    %c0_24 = arith.constant 0 : index
    %13 = vector.load %arg15[%c0_22, %c0_23, %c0_24] : memref<18x18x8xf32, #tpu.memory_space<vmem>>, vector<18x1x8xf32>
    tpu.vector_store %arg15[%c0_22, %c0_23, %c0_24], %12 {strides = array<i32>} : memref<18x18x8xf32, #tpu.memory_space<vmem>>, vector<18x1x8xf32>,
    %cst_25 = arith.constant 0.000000e+00 : f32
    %14 = vector.broadcast %cst_25 : f32 to vector<18x1x8xf32>
    %c0_26 = arith.constant 0 : index
    %c17_27 = arith.constant 17 : index
    %c0_28 = arith.constant 0 : index
    %15 = vector.load %arg15[%c0_26, %c17_27, %c0_28] : memref<18x18x8xf32, #tpu.memory_space<vmem>>, vector<18x1x8xf32>
    tpu.vector_store %arg15[%c0_26, %c17_27, %c0_28], %14 {strides = array<i32>} : memref<18x18x8xf32, #tpu.memory_space<vmem>>, vector<18x1x8xf32>,
    %c0_29 = arith.constant 0 : index
    %c0_30 = arith.constant 0 : index
    %c0_31 = arith.constant 0 : index
    %c0_32 = arith.constant 0 : index
    %16 = vector.load %arg1[%c0_29, %c0_30, %c0_31, %c0_32] : memref<1x16x16x4xf32, #tpu.memory_space<vmem>>, vector<1x16x16x4xf32>
    %17 = vector.shape_cast %16 : vector<1x16x16x4xf32> to vector<16x16x4xf32>
    %c0_33 = arith.constant 0 : index
    %c0_34 = arith.constant 0 : index
    %18 = vector.load %arg2[%c0_33, %c0_34] : memref<1x4xf32, #tpu.memory_space<vmem>>, vector<1x4xf32>
    %19 = vector.shape_cast %18 : vector<1x4xf32> to vector<1x1x4xf32>
    %20 = vector.broadcast %19 : vector<1x1x4xf32> to vector<16x16x4xf32>
    %21 = arith.mulf %17, %20 : vector<16x16x4xf32>
    %c0_35 = arith.constant 0 : index
    %c0_36 = arith.constant 0 : index
    %22 = vector.load %arg3[%c0_35, %c0_36] : memref<1x4xf32, #tpu.memory_space<vmem>>, vector<1x4xf32>
    %23 = vector.shape_cast %22 : vector<1x4xf32> to vector<1x1x4xf32>
    %24 = vector.broadcast %23 : vector<1x1x4xf32> to vector<16x16x4xf32>
    %25 = arith.addf %21, %24 : vector<16x16x4xf32>
    %c1 = arith.constant 1 : index
    %c1_37 = arith.constant 1 : index
    %c0_38 = arith.constant 0 : index
    %26 = vector.load %arg13[%c1, %c1_37, %c0_38] : memref<18x18x4xf32, #tpu.memory_space<vmem>>, vector<16x16x4xf32>
    tpu.vector_store %arg13[%c1, %c1_37, %c0_38], %25 {strides = array<i32>} : memref<18x18x4xf32, #tpu.memory_space<vmem>>, vector<16x16x4xf32>,
    %c0_39 = arith.constant 0 : index
    %c0_40 = arith.constant 0 : index
    %c0_41 = arith.constant 0 : index
    %27 = vector.load %arg13[%c0_39, %c0_40, %c0_41] : memref<18x18x4xf32, #tpu.memory_space<vmem>>, vector<16x16x4xf32>
    %28 = vector.shape_cast %27 : vector<16x16x4xf32> to vector<256x4xf32>
    %29 = arith.truncf %28 : vector<256x4xf32> to vector<256x4xbf16>
    %c0_42 = arith.constant 0 : index
    %c0_43 = arith.constant 0 : index
    %30 = vector.load %arg14[%c0_42, %c0_43] : memref<256x36xbf16, #tpu.memory_space<vmem>>, vector<256x4xbf16>
    tpu.vector_store %arg14[%c0_42, %c0_43], %29 {strides = array<i32>} : memref<256x36xbf16, #tpu.memory_space<vmem>>, vector<256x4xbf16>,
    %c0_44 = arith.constant 0 : index
    %c1_45 = arith.constant 1 : index
    %c0_46 = arith.constant 0 : index
    %31 = vector.load %arg13[%c0_44, %c1_45, %c0_46] : memref<18x18x4xf32, #tpu.memory_space<vmem>>, vector<16x16x4xf32>
    %32 = vector.shape_cast %31 : vector<16x16x4xf32> to vector<256x4xf32>
    %33 = arith.truncf %32 : vector<256x4xf32> to vector<256x4xbf16>
    %c0_47 = arith.constant 0 : index
    %c4 = arith.constant 4 : index
    %34 = vector.load %arg14[%c0_47, %c4] : memref<256x36xbf16, #tpu.memory_space<vmem>>, vector<256x4xbf16>
    tpu.vector_store %arg14[%c0_47, %c4], %33 {strides = array<i32>} : memref<256x36xbf16, #tpu.memory_space<vmem>>, vector<256x4xbf16>,
    %c0_48 = arith.constant 0 : index
    %c2 = arith.constant 2 : index
    %c0_49 = arith.constant 0 : index
    %35 = vector.load %arg13[%c0_48, %c2, %c0_49] : memref<18x18x4xf32, #tpu.memory_space<vmem>>, vector<16x16x4xf32>
    %36 = vector.shape_cast %35 : vector<16x16x4xf32> to vector<256x4xf32>
    %37 = arith.truncf %36 : vector<256x4xf32> to vector<256x4xbf16>
    %c0_50 = arith.constant 0 : index
    %c8 = arith.constant 8 : index
    %38 = vector.load %arg14[%c0_50, %c8] : memref<256x36xbf16, #tpu.memory_space<vmem>>, vector<256x4xbf16>
    tpu.vector_store %arg14[%c0_50, %c8], %37 {strides = array<i32>} : memref<256x36xbf16, #tpu.memory_space<vmem>>, vector<256x4xbf16>,
    %c1_51 = arith.constant 1 : index
    %c0_52 = arith.constant 0 : index
    %c0_53 = arith.constant 0 : index
    %39 = vector.load %arg13[%c1_51, %c0_52, %c0_53] : memref<18x18x4xf32, #tpu.memory_space<vmem>>, vector<16x16x4xf32>
    %40 = vector.shape_cast %39 : vector<16x16x4xf32> to vector<256x4xf32>
    %41 = arith.truncf %40 : vector<256x4xf32> to vector<256x4xbf16>
    %c0_54 = arith.constant 0 : index
    %c12 = arith.constant 12 : index
    %42 = vector.load %arg14[%c0_54, %c12] : memref<256x36xbf16, #tpu.memory_space<vmem>>, vector<256x4xbf16>
    tpu.vector_store %arg14[%c0_54, %c12], %41 {strides = array<i32>} : memref<256x36xbf16, #tpu.memory_space<vmem>>, vector<256x4xbf16>,
    %c1_55 = arith.constant 1 : index
    %c1_56 = arith.constant 1 : index
    %c0_57 = arith.constant 0 : index
    %43 = vector.load %arg13[%c1_55, %c1_56, %c0_57] : memref<18x18x4xf32, #tpu.memory_space<vmem>>, vector<16x16x4xf32>
    %44 = vector.shape_cast %43 : vector<16x16x4xf32> to vector<256x4xf32>
    %45 = arith.truncf %44 : vector<256x4xf32> to vector<256x4xbf16>
    %c0_58 = arith.constant 0 : index
    %c16 = arith.constant 16 : index
    %46 = vector.load %arg14[%c0_58, %c16] : memref<256x36xbf16, #tpu.memory_space<vmem>>, vector<256x4xbf16>
    tpu.vector_store %arg14[%c0_58, %c16], %45 {strides = array<i32>} : memref<256x36xbf16, #tpu.memory_space<vmem>>, vector<256x4xbf16>,
    %c1_59 = arith.constant 1 : index
    %c2_60 = arith.constant 2 : index
    %c0_61 = arith.constant 0 : index
    %47 = vector.load %arg13[%c1_59, %c2_60, %c0_61] : memref<18x18x4xf32, #tpu.memory_space<vmem>>, vector<16x16x4xf32>
    %48 = vector.shape_cast %47 : vector<16x16x4xf32> to vector<256x4xf32>
    %49 = arith.truncf %48 : vector<256x4xf32> to vector<256x4xbf16>
    %c0_62 = arith.constant 0 : index
    %c20 = arith.constant 20 : index
    %50 = vector.load %arg14[%c0_62, %c20] : memref<256x36xbf16, #tpu.memory_space<vmem>>, vector<256x4xbf16>
    tpu.vector_store %arg14[%c0_62, %c20], %49 {strides = array<i32>} : memref<256x36xbf16, #tpu.memory_space<vmem>>, vector<256x4xbf16>,
    %c2_63 = arith.constant 2 : index
    %c0_64 = arith.constant 0 : index
    %c0_65 = arith.constant 0 : index
    %51 = vector.load %arg13[%c2_63, %c0_64, %c0_65] : memref<18x18x4xf32, #tpu.memory_space<vmem>>, vector<16x16x4xf32>
    %52 = vector.shape_cast %51 : vector<16x16x4xf32> to vector<256x4xf32>
    %53 = arith.truncf %52 : vector<256x4xf32> to vector<256x4xbf16>
    %c0_66 = arith.constant 0 : index
    %c24 = arith.constant 24 : index
    %54 = vector.load %arg14[%c0_66, %c24] : memref<256x36xbf16, #tpu.memory_space<vmem>>, vector<256x4xbf16>
    tpu.vector_store %arg14[%c0_66, %c24], %53 {strides = array<i32>} : memref<256x36xbf16, #tpu.memory_space<vmem>>, vector<256x4xbf16>,
    %c2_67 = arith.constant 2 : index
    %c1_68 = arith.constant 1 : index
    %c0_69 = arith.constant 0 : index
    %55 = vector.load %arg13[%c2_67, %c1_68, %c0_69] : memref<18x18x4xf32, #tpu.memory_space<vmem>>, vector<16x16x4xf32>
    %56 = vector.shape_cast %55 : vector<16x16x4xf32> to vector<256x4xf32>
    %57 = arith.truncf %56 : vector<256x4xf32> to vector<256x4xbf16>
    %c0_70 = arith.constant 0 : index
    %c28 = arith.constant 28 : index
    %58 = vector.load %arg14[%c0_70, %c28] : memref<256x36xbf16, #tpu.memory_space<vmem>>, vector<256x4xbf16>
    tpu.vector_store %arg14[%c0_70, %c28], %57 {strides = array<i32>} : memref<256x36xbf16, #tpu.memory_space<vmem>>, vector<256x4xbf16>,
    %c2_71 = arith.constant 2 : index
    %c2_72 = arith.constant 2 : index
    %c0_73 = arith.constant 0 : index
    %59 = vector.load %arg13[%c2_71, %c2_72, %c0_73] : memref<18x18x4xf32, #tpu.memory_space<vmem>>, vector<16x16x4xf32>
    %60 = vector.shape_cast %59 : vector<16x16x4xf32> to vector<256x4xf32>
    %61 = arith.truncf %60 : vector<256x4xf32> to vector<256x4xbf16>
    %c0_74 = arith.constant 0 : index
    %c32 = arith.constant 32 : index
    %62 = vector.load %arg14[%c0_74, %c32] : memref<256x36xbf16, #tpu.memory_space<vmem>>, vector<256x4xbf16>
    tpu.vector_store %arg14[%c0_74, %c32], %61 {strides = array<i32>} : memref<256x36xbf16, #tpu.memory_space<vmem>>, vector<256x4xbf16>,
    %c0_75 = arith.constant 0 : index
    %c0_76 = arith.constant 0 : index
    %63 = vector.load %arg14[%c0_75, %c0_76] : memref<256x36xbf16, #tpu.memory_space<vmem>>, vector<256x36xbf16>
    %c0_77 = arith.constant 0 : index
    %c0_78 = arith.constant 0 : index
    %64 = vector.load %arg4[%c0_77, %c0_78] : memref<36x8xbf16, #tpu.memory_space<vmem>>, vector<36x8xbf16>
    %cst_79 = arith.constant dense<0.000000e+00> : vector<256x8xf32>
    %65 = tpu.matmul %63, %64, %cst_79 {dimension_numbers = #tpu.dot_dimension_numbers<[1], [0], [0], [1], [0, 0, 1, 1], [], []>} : vector<256x36xbf16>, vector<36x8xbf16>, vector<256x8xf32> -> vector<256x8xf32>
    %cst_80 = arith.constant 0.000000e+00 : f32
    %66 = vector.broadcast %cst_80 : f32 to vector<256x8xf32>
    %67 = arith.cmpf ogt, %65, %66 : vector<256x8xf32>
    %c0_81 = arith.constant 0 : index
    %c0_82 = arith.constant 0 : index
    %68 = vector.load %arg5[%c0_81, %c0_82] : memref<1x8xf32, #tpu.memory_space<vmem>>, vector<1x8xf32>
    %69 = vector.broadcast %68 : vector<1x8xf32> to vector<256x8xf32>
    %70 = arith.mulf %65, %69 : vector<256x8xf32>
    %71 = arith.select %67, %65, %70 : vector<256x8xi1>, vector<256x8xf32>
    %72 = vector.shape_cast %71 : vector<256x8xf32> to vector<16x16x8xf32>
    %c1_83 = arith.constant 1 : index
    %c1_84 = arith.constant 1 : index
    %c0_85 = arith.constant 0 : index
    %73 = vector.load %arg15[%c1_83, %c1_84, %c0_85] : memref<18x18x8xf32, #tpu.memory_space<vmem>>, vector<16x16x8xf32>
    tpu.vector_store %arg15[%c1_83, %c1_84, %c0_85], %72 {strides = array<i32>} : memref<18x18x8xf32, #tpu.memory_space<vmem>>, vector<16x16x8xf32>,
    %c0_86 = arith.constant 0 : index
    %c0_87 = arith.constant 0 : index
    %c0_88 = arith.constant 0 : index
    %74 = tpu.strided_load %arg15[%c0_86, %c0_87, %c0_88] {strides = array<i32: 2, 2, 1>} : memref<18x18x8xf32, #tpu.memory_space<vmem>>, vector<8x8x8xf32>
    %75 = vector.shape_cast %74 : vector<8x8x8xf32> to vector<64x8xf32>
    %76 = arith.truncf %75 : vector<64x8xf32> to vector<64x8xbf16>
    %c0_89 = arith.constant 0 : index
    %c0_90 = arith.constant 0 : index
    %77 = vector.load %arg16[%c0_89, %c0_90] : memref<64x72xbf16, #tpu.memory_space<vmem>>, vector<64x8xbf16>
    tpu.vector_store %arg16[%c0_89, %c0_90], %76 {strides = array<i32>} : memref<64x72xbf16, #tpu.memory_space<vmem>>, vector<64x8xbf16>,
    %c0_91 = arith.constant 0 : index
    %c1_92 = arith.constant 1 : index
    %c0_93 = arith.constant 0 : index
    %78 = tpu.strided_load %arg15[%c0_91, %c1_92, %c0_93] {strides = array<i32: 2, 2, 1>} : memref<18x18x8xf32, #tpu.memory_space<vmem>>, vector<8x8x8xf32>
    %79 = vector.shape_cast %78 : vector<8x8x8xf32> to vector<64x8xf32>
    %80 = arith.truncf %79 : vector<64x8xf32> to vector<64x8xbf16>
    %c0_94 = arith.constant 0 : index
    %c8_95 = arith.constant 8 : index
    %81 = vector.load %arg16[%c0_94, %c8_95] : memref<64x72xbf16, #tpu.memory_space<vmem>>, vector<64x8xbf16>
    tpu.vector_store %arg16[%c0_94, %c8_95], %80 {strides = array<i32>} : memref<64x72xbf16, #tpu.memory_space<vmem>>, vector<64x8xbf16>,
    %c0_96 = arith.constant 0 : index
    %c2_97 = arith.constant 2 : index
    %c0_98 = arith.constant 0 : index
    %82 = tpu.strided_load %arg15[%c0_96, %c2_97, %c0_98] {strides = array<i32: 2, 2, 1>} : memref<18x18x8xf32, #tpu.memory_space<vmem>>, vector<8x8x8xf32>
    %83 = vector.shape_cast %82 : vector<8x8x8xf32> to vector<64x8xf32>
    %84 = arith.truncf %83 : vector<64x8xf32> to vector<64x8xbf16>
    %c0_99 = arith.constant 0 : index
    %c16_100 = arith.constant 16 : index
    %85 = vector.load %arg16[%c0_99, %c16_100] : memref<64x72xbf16, #tpu.memory_space<vmem>>, vector<64x8xbf16>
    tpu.vector_store %arg16[%c0_99, %c16_100], %84 {strides = array<i32>} : memref<64x72xbf16, #tpu.memory_space<vmem>>, vector<64x8xbf16>,
    %c1_101 = arith.constant 1 : index
    %c0_102 = arith.constant 0 : index
    %c0_103 = arith.constant 0 : index
    %86 = tpu.strided_load %arg15[%c1_101, %c0_102, %c0_103] {strides = array<i32: 2, 2, 1>} : memref<18x18x8xf32, #tpu.memory_space<vmem>>, vector<8x8x8xf32>
    %87 = vector.shape_cast %86 : vector<8x8x8xf32> to vector<64x8xf32>
    %88 = arith.truncf %87 : vector<64x8xf32> to vector<64x8xbf16>
    %c0_104 = arith.constant 0 : index
    %c24_105 = arith.constant 24 : index
    %89 = vector.load %arg16[%c0_104, %c24_105] : memref<64x72xbf16, #tpu.memory_space<vmem>>, vector<64x8xbf16>
    tpu.vector_store %arg16[%c0_104, %c24_105], %88 {strides = array<i32>} : memref<64x72xbf16, #tpu.memory_space<vmem>>, vector<64x8xbf16>,
    %c1_106 = arith.constant 1 : index
    %c1_107 = arith.constant 1 : index
    %c0_108 = arith.constant 0 : index
    %90 = tpu.strided_load %arg15[%c1_106, %c1_107, %c0_108] {strides = array<i32: 2, 2, 1>} : memref<18x18x8xf32, #tpu.memory_space<vmem>>, vector<8x8x8xf32>
    %91 = vector.shape_cast %90 : vector<8x8x8xf32> to vector<64x8xf32>
    %92 = arith.truncf %91 : vector<64x8xf32> to vector<64x8xbf16>
    %c0_109 = arith.constant 0 : index
    %c32_110 = arith.constant 32 : index
    %93 = vector.load %arg16[%c0_109, %c32_110] : memref<64x72xbf16, #tpu.memory_space<vmem>>, vector<64x8xbf16>
    tpu.vector_store %arg16[%c0_109, %c32_110], %92 {strides = array<i32>} : memref<64x72xbf16, #tpu.memory_space<vmem>>, vector<64x8xbf16>,
    %c1_111 = arith.constant 1 : index
    %c2_112 = arith.constant 2 : index
    %c0_113 = arith.constant 0 : index
    %94 = tpu.strided_load %arg15[%c1_111, %c2_112, %c0_113] {strides = array<i32: 2, 2, 1>} : memref<18x18x8xf32, #tpu.memory_space<vmem>>, vector<8x8x8xf32>
    %95 = vector.shape_cast %94 : vector<8x8x8xf32> to vector<64x8xf32>
    %96 = arith.truncf %95 : vector<64x8xf32> to vector<64x8xbf16>
    %c0_114 = arith.constant 0 : index
    %c40 = arith.constant 40 : index
    %97 = vector.load %arg16[%c0_114, %c40] : memref<64x72xbf16, #tpu.memory_space<vmem>>, vector<64x8xbf16>
    tpu.vector_store %arg16[%c0_114, %c40], %96 {strides = array<i32>} : memref<64x72xbf16, #tpu.memory_space<vmem>>, vector<64x8xbf16>,
    %c2_115 = arith.constant 2 : index
    %c0_116 = arith.constant 0 : index
    %c0_117 = arith.constant 0 : index
    %98 = tpu.strided_load %arg15[%c2_115, %c0_116, %c0_117] {strides = array<i32: 2, 2, 1>} : memref<18x18x8xf32, #tpu.memory_space<vmem>>, vector<8x8x8xf32>
    %99 = vector.shape_cast %98 : vector<8x8x8xf32> to vector<64x8xf32>
    %100 = arith.truncf %99 : vector<64x8xf32> to vector<64x8xbf16>
    %c0_118 = arith.constant 0 : index
    %c48 = arith.constant 48 : index
    %101 = vector.load %arg16[%c0_118, %c48] : memref<64x72xbf16, #tpu.memory_space<vmem>>, vector<64x8xbf16>
    tpu.vector_store %arg16[%c0_118, %c48], %100 {strides = array<i32>} : memref<64x72xbf16, #tpu.memory_space<vmem>>, vector<64x8xbf16>,
    %c2_119 = arith.constant 2 : index
    %c1_120 = arith.constant 1 : index
    %c0_121 = arith.constant 0 : index
    %102 = tpu.strided_load %arg15[%c2_119, %c1_120, %c0_121] {strides = array<i32: 2, 2, 1>} : memref<18x18x8xf32, #tpu.memory_space<vmem>>, vector<8x8x8xf32>
    %103 = vector.shape_cast %102 : vector<8x8x8xf32> to vector<64x8xf32>
    %104 = arith.truncf %103 : vector<64x8xf32> to vector<64x8xbf16>
    %c0_122 = arith.constant 0 : index
    %c56 = arith.constant 56 : index
    %105 = vector.load %arg16[%c0_122, %c56] : memref<64x72xbf16, #tpu.memory_space<vmem>>, vector<64x8xbf16>
    tpu.vector_store %arg16[%c0_122, %c56], %104 {strides = array<i32>} : memref<64x72xbf16, #tpu.memory_space<vmem>>, vector<64x8xbf16>,
    %c2_123 = arith.constant 2 : index
    %c2_124 = arith.constant 2 : index
    %c0_125 = arith.constant 0 : index
    %106 = tpu.strided_load %arg15[%c2_123, %c2_124, %c0_125] {strides = array<i32: 2, 2, 1>} : memref<18x18x8xf32, #tpu.memory_space<vmem>>, vector<8x8x8xf32>
    %107 = vector.shape_cast %106 : vector<8x8x8xf32> to vector<64x8xf32>
    %108 = arith.truncf %107 : vector<64x8xf32> to vector<64x8xbf16>
    %c0_126 = arith.constant 0 : index
    %c64 = arith.constant 64 : index
    %109 = vector.load %arg16[%c0_126, %c64] : memref<64x72xbf16, #tpu.memory_space<vmem>>, vector<64x8xbf16>
    tpu.vector_store %arg16[%c0_126, %c64], %108 {strides = array<i32>} : memref<64x72xbf16, #tpu.memory_space<vmem>>, vector<64x8xbf16>,
    %c0_127 = arith.constant 0 : index
    %c0_128 = arith.constant 0 : index
    %110 = vector.load %arg16[%c0_127, %c0_128] : memref<64x72xbf16, #tpu.memory_space<vmem>>, vector<64x72xbf16>
    %c0_129 = arith.constant 0 : index
    %c0_130 = arith.constant 0 : index
    %111 = vector.load %arg6[%c0_129, %c0_130] : memref<72x8xbf16, #tpu.memory_space<vmem>>, vector<72x8xbf16>
    %cst_131 = arith.constant dense<0.000000e+00> : vector<64x8xf32>
    %112 = tpu.matmul %110, %111, %cst_131 {dimension_numbers = #tpu.dot_dimension_numbers<[1], [0], [0], [1], [0, 0, 1, 1], [], []>} : vector<64x72xbf16>, vector<72x8xbf16>, vector<64x8xf32> -> vector<64x8xf32>
    %c0_132 = arith.constant 0 : index
    %c0_133 = arith.constant 0 : index
    %113 = vector.load %arg7[%c0_132, %c0_133] : memref<1x8xf32, #tpu.memory_space<vmem>>, vector<1x8xf32>
    %114 = vector.broadcast %113 : vector<1x8xf32> to vector<64x8xf32>
    %115 = arith.mulf %112, %114 : vector<64x8xf32>
    %c0_134 = arith.constant 0 : index
    %c0_135 = arith.constant 0 : index
    %116 = vector.load %arg8[%c0_134, %c0_135] : memref<1x8xf32, #tpu.memory_space<vmem>>, vector<1x8xf32>
    %117 = vector.broadcast %116 : vector<1x8xf32> to vector<64x8xf32>
    %118 = arith.addf %115, %117 : vector<64x8xf32>
    %c0_136 = arith.constant 0 : index
    %c0_137 = arith.constant 0 : index
    %c0_138 = arith.constant 0 : index
    %c0_139 = arith.constant 0 : index
    %119 = tpu.strided_load %arg1[%c0_136, %c0_137, %c0_138, %c0_139] {strides = array<i32: 1, 2, 2, 1>} : memref<1x16x16x4xf32, #tpu.memory_space<vmem>>, vector<1x8x8x4xf32>
    %120 = vector.shape_cast %119 : vector<1x8x8x4xf32> to vector<64x4xf32>
    %121 = arith.truncf %120 : vector<64x4xf32> to vector<64x4xbf16>
    %c0_140 = arith.constant 0 : index
    %c0_141 = arith.constant 0 : index
    %122 = vector.load %arg9[%c0_140, %c0_141] : memref<4x8xbf16, #tpu.memory_space<vmem>>, vector<4x8xbf16>
    %cst_142 = arith.constant dense<0.000000e+00> : vector<64x8xf32>
    %123 = tpu.matmul %121, %122, %cst_142 {dimension_numbers = #tpu.dot_dimension_numbers<[1], [0], [0], [1], [0, 0, 1, 1], [], []>} : vector<64x4xbf16>, vector<4x8xbf16>, vector<64x8xf32> -> vector<64x8xf32>
    %c0_143 = arith.constant 0 : index
    %c0_144 = arith.constant 0 : index
    %124 = vector.load %arg10[%c0_143, %c0_144] : memref<1x8xf32, #tpu.memory_space<vmem>>, vector<1x8xf32>
    %125 = vector.broadcast %124 : vector<1x8xf32> to vector<64x8xf32>
    %126 = arith.mulf %123, %125 : vector<64x8xf32>
    %c0_145 = arith.constant 0 : index
    %c0_146 = arith.constant 0 : index
    %127 = vector.load %arg11[%c0_145, %c0_146] : memref<1x8xf32, #tpu.memory_space<vmem>>, vector<1x8xf32>
    %128 = vector.broadcast %127 : vector<1x8xf32> to vector<64x8xf32>
    %129 = arith.addf %126, %128 : vector<64x8xf32>
    %130 = arith.addf %118, %129 : vector<64x8xf32>
    %131 = vector.shape_cast %130 : vector<64x8xf32> to vector<1x8x8x8xf32>
    %c0_147 = arith.constant 0 : index
    %c0_148 = arith.constant 0 : index
    %c0_149 = arith.constant 0 : index
    %c0_150 = arith.constant 0 : index
    %132 = vector.load %arg12[%c0_147, %c0_148, %c0_149, %c0_150] : memref<1x8x8x8xf32, #tpu.memory_space<vmem>>, vector<1x8x8x8xf32>
    tpu.vector_store %arg12[%c0_147, %c0_148, %c0_149, %c0_150], %131 {strides = array<i32>} : memref<1x8x8x8xf32, #tpu.memory_space<vmem>>, vector<1x8x8x8xf32>,
    return
  }
  func.func @transform_0(%arg0: i32) -> (i32, i32, i32, i32) {
    %c0_i32 = arith.constant 0 : i32
    %c0_i32_0 = arith.constant 0 : i32
    %c0_i32_1 = arith.constant 0 : i32
    %c0_i32_2 = arith.constant 0 : i32
    return %arg0, %c0_i32, %c0_i32_0, %c0_i32_1 : i32, i32, i32, i32
  }
  func.func @transform_1(%arg0: i32) -> (i32, i32) {
    %c0_i32 = arith.constant 0 : i32
    %c0_i32_0 = arith.constant 0 : i32
    %c0_i32_1 = arith.constant 0 : i32
    return %c0_i32, %c0_i32_0 : i32, i32
  }
  func.func @transform_2(%arg0: i32) -> (i32, i32) {
    %c0_i32 = arith.constant 0 : i32
    %c0_i32_0 = arith.constant 0 : i32
    %c0_i32_1 = arith.constant 0 : i32
    return %c0_i32, %c0_i32_0 : i32, i32
  }
  func.func @transform_3(%arg0: i32) -> (i32, i32) {
    %c0_i32 = arith.constant 0 : i32
    %c0_i32_0 = arith.constant 0 : i32
    %c0_i32_1 = arith.constant 0 : i32
    return %c0_i32, %c0_i32_0 : i32, i32
  }
  func.func @transform_4(%arg0: i32) -> (i32, i32) {
    %c0_i32 = arith.constant 0 : i32
    %c0_i32_0 = arith.constant 0 : i32
    %c0_i32_1 = arith.constant 0 : i32
    return %c0_i32, %c0_i32_0 : i32, i32
  }
  func.func @transform_5(%arg0: i32) -> (i32, i32) {
    %c0_i32 = arith.constant 0 : i32
    %c0_i32_0 = arith.constant 0 : i32
    %c0_i32_1 = arith.constant 0 : i32
    return %c0_i32, %c0_i32_0 : i32, i32
  }
  func.func @transform_6(%arg0: i32) -> (i32, i32) {
    %c0_i32 = arith.constant 0 : i32
    %c0_i32_0 = arith.constant 0 : i32
    %c0_i32_1 = arith.constant 0 : i32
    return %c0_i32, %c0_i32_0 : i32, i32
  }
  func.func @transform_7(%arg0: i32) -> (i32, i32) {
    %c0_i32 = arith.constant 0 : i32
    %c0_i32_0 = arith.constant 0 : i32
    %c0_i32_1 = arith.constant 0 : i32
    return %c0_i32, %c0_i32_0 : i32, i32
  }
  func.func @transform_8(%arg0: i32) -> (i32, i32) {
    %c0_i32 = arith.constant 0 : i32
    %c0_i32_0 = arith.constant 0 : i32
    %c0_i32_1 = arith.constant 0 : i32
    return %c0_i32, %c0_i32_0 : i32, i32
  }
  func.func @transform_9(%arg0: i32) -> (i32, i32) {
    %c0_i32 = arith.constant 0 : i32
    %c0_i32_0 = arith.constant 0 : i32
    %c0_i32_1 = arith.constant 0 : i32
    return %c0_i32, %c0_i32_0 : i32, i32
  }
  func.func @transform_10(%arg0: i32) -> (i32, i32) {
    %c0_i32 = arith.constant 0 : i32
    %c0_i32_0 = arith.constant 0 : i32
    %c0_i32_1 = arith.constant 0 : i32
    return %c0_i32, %c0_i32_0 : i32, i32
  }
  func.func @transform_11(%arg0: i32) -> (i32, i32, i32, i32) {
    %c0_i32 = arith.constant 0 : i32
    %c0_i32_0 = arith.constant 0 : i32
    %c0_i32_1 = arith.constant 0 : i32
    %c0_i32_2 = arith.constant 0 : i32
    return %arg0, %c0_i32, %c0_i32_0, %c0_i32_1 : i32, i32, i32, i32
  }
}

</mosaic_0001>

<bundles_post_ra>
// kernel: tpu_custom_call.1
= control target key start
LH: loop header
LB: loop body
LE: loop exit
PB: predicated region body
PF: predicated region fallthrough
CT: control target
= control target key end

     0   :  { %s4183_s0 = inlined_call_operand.vmem [shape: f32[2,16,16,4], index: 0, kind: input, shape index: {}]   ;;  %s4184_s1 = inlined_call_operand.vmem [shape: f32[1,4], index: 1, kind: input, shape index: {}]   ;;  %s4185_s2 = inlined_call_operand.vmem [shape: f32[1,4], index: 2, kind: input, shape index: {}]   ;;  %s4186_s3 = inlined_call_operand.vmem [shape: bf16[36,8], index: 3, kind: input, shape index: {}]   ;;  %s4187_s4 = inlined_call_operand.vmem [shape: f32[1,8], index: 4, kind: input, shape index: {}]   ;;  %s4188_s5 = inlined_call_operand.vmem [shape: bf16[72,8], index: 5, kind: input, shape index: {}]   ;;  %s4189_s6 = inlined_call_operand.vmem [shape: f32[1,8], index: 6, kind: input, shape index: {}]   ;;  %s4190_s7 = inlined_call_operand.vmem [shape: f32[1,8], index: 7, kind: input, shape index: {}]   ;;  %s4191_s8 = inlined_call_operand.vmem [shape: bf16[4,8], index: 8, kind: input, shape index: {}]   ;;  %s4192_s9 = inlined_call_operand.vmem [shape: f32[1,8], index: 9, kind: input, shape index: {}]   ;;  %s4193_s10 = inlined_call_operand.vmem [shape: f32[1,8], index: 10, kind: input, shape index: {}]   ;;  %s4194_s11 = inlined_call_operand.hbm [shape: f32[2,8,8,8], index: 11, kind: output, shape index: {}]  }
   0x1   :  { %4203 = sst [smem:[#allocation9_spill]] %s4183_s0 }
   0x2   :  { %16 = vsyncpa [#allocation7], 0 }
   0x3   :  { %18 = vsyncpa [#allocation7 + $0x1], 0  ;;  %s3236_s17 = smov 0   ;;  %s3238_s18 = smov 0  }
   0x4   :  { %s3240_s19 = smov 0   ;;  %s3242_s20 = smov 0  }
   0x5 LB: > { %s3257_s21 = sadd.s32 4294967295, %s3159_s20   ;;  %s2874_s22 = sadd.s32 4294967294, %s3159_s20   ;;  %s3159_s20 = sphi %s3242_s20, %s4214_s20   ;;  %s3155_s19 = sphi %s3240_s19, %s4213_s19   ;;  %s3151_s18 = sphi %s3238_s18, %s4212_s18   ;;  %s3147_s17 = sphi %s3236_s17, %s4211_s17  }
   0x6   : > { %s3261_s23 = sadd.s32 1, %s3159_s20   ;;  %s267_s24 = sadd.s32 1, %s3155_s19 }
   0x7   : > { %s264_s25 = ssub.s32 %s3159_s20, %s3261_s23  ;;  %p277_p0 = scmp.ne.s32.totalorder %s3155_s19, %s3151_s18 }
   0x8   : > { %p265_p1 = scmp.eq.s32.totalorder %s264_s25, 0  ;;  %p278_p2 = scmp.eq.s32.totalorder %s3257_s21, 1 }
   0x9   : > { %p283_p3 = scmp.ne.s32.totalorder %s3151_s18, %s3147_s17  ;;  %p284_p4 = scmp.eq.s32.totalorder %s2874_s22, 1 }
   0xa   : > { %s3272_s26 = scalar_select %p265_p1, %s3155_s19, %s267_s24  }
   0xb   : > { %p3274_p5 = por %p278_p2, %p277_p0  ;;  %p3278_p6 = por %p284_p4, %p283_p3 }
   0xc   : > { %p2877_p7 = scmp.ge.s32.totalorder %s3159_s20, 1  ;;  %p340_p8 = scmp.lt.s32.totalorder %s3159_s20, 3 }
   0xe   : > { %p341_p9 = pnand %p2877_p7, %p340_p8 }
   0xf   : > { %vm386_vm0 = vcmask (!%p341_p9), 31744   ;;  %vm389_vm1 = vcmask (!%p341_p9), 25600   ;;  %vm395_vm2 = vcmask (!%p341_p9), 24576   ;;  %v3161_v0 = vmov (!%p341_p9), 0.0   ;;  %p380_p10 = scmp.lt.s32.totalorder (!%p341_p9), %s3257_s21, 1  ;;  %s4206_s0 = sld [smem:[#allocation9_spill]] (!%p341_p9) }
  0x10   : > { %344 = sbr.rel (%p341_p9) target bundleno = 1043 (0x413), region = 64  ;;  %387 = vst.msk [vmem:[#allocation2] sm:$0xff] (!%p341_p9), %vm386_vm0, %v3161_v0  ;;  %388 = vst.msk [vmem:[#allocation2 + $0x8] sm:$0xff] (!%p341_p9), %vm386_vm0, %v3161_v0  ;;  %v3371_v1 = vld [vmem:[%s4184_s1] ss:$0 sm:$0xff] (!%p341_p9)  ;;  %s3162_s25 = smov (!%p341_p9), 4  }
  0x11   : > { %390 = vst.msk [vmem:[#allocation2 + $0x10] sm:$0x3] (!%p341_p9), %vm389_vm1, %v3161_v0  ;;  %394 = vst.msk [vmem:[#allocation2 + $0x1a8] sm:$0x3] (!%p341_p9), %vm389_vm1, %v3161_v0  ;;  %v3376_v2 = vld [vmem:[%s4185_s2] ss:$0 sm:$0xff] (!%p341_p9) }
  0x12   : > { %392 = vst.msk [vmem:[#allocation2 + $0x198] sm:$0xff] (!%p341_p9), %vm386_vm0, %v3161_v0  ;;  %393 = vst.msk [vmem:[#allocation2 + $0x1a0] sm:$0xff] (!%p341_p9), %vm386_vm0, %v3161_v0  ;;  %s3164_s30 = smov (!%p341_p9), 12   ;;  %s4199_s12 = smov (!%p341_p9), 16   ;;  %vm1803_vm3 = vcmask (!%p341_p9), 1041408   ;;  %vm797_vm4 = vcmask (!%p341_p9), 64544  }
  0x13   : > { %397 = vst.msk [vmem:[#allocation2 + $0x18] sm:$0x1] (!%p341_p9), %vm395_vm2, %v3161_v0  ;;  %398 = vst.msk [vmem:[#allocation2 + $0x30] sm:$0x1] (!%p341_p9), %vm395_vm2, %v3161_v0  ;;  %s3167_s14 = smov (!%p341_p9), 24   ;;  %s3168_s15 = smov (!%p341_p9), 28  }
  0x14   : > { %399 = vst.msk [vmem:[#allocation2 + $0x48] sm:$0x1] (!%p341_p9), %vm395_vm2, %v3161_v0  ;;  %400 = vst.msk [vmem:[#allocation2 + $0x60] sm:$0x1] (!%p341_p9), %vm395_vm2, %v3161_v0  ;;  %s3169_s22 = smov (!%p341_p9), 32   ;;  %vm926_vm5 = vcmask (!%p341_p9), 97344  }
  0x15   : > { %401 = vst.msk [vmem:[#allocation2 + $0x78] sm:$0x1] (!%p341_p9), %vm395_vm2, %v3161_v0  ;;  %402 = vst.msk [vmem:[#allocation2 + $0x90] sm:$0x1] (!%p341_p9), %vm395_vm2, %v3161_v0  ;;  %vm1055_vm6 = vcmask (!%p341_p9), 130144   ;;  %vm1184_vm7 = vcmask (!%p341_p9), 162944  }
  0x16   : > { %403 = vst.msk [vmem:[#allocation2 + $0xa8] sm:$0x1] (!%p341_p9), %vm395_vm2, %v3161_v0  ;;  %404 = vst.msk [vmem:[#allocation2 + $0xc0] sm:$0x1] (!%p341_p9), %vm395_vm2, %v3161_v0  ;;  %vm1313_vm8 = vcmask (!%p341_p9), 195744   ;;  %vm1443_vm9 = vcmask (!%p341_p9), 228544  }
  0x17   : > { %405 = vst.msk [vmem:[#allocation2 + $0xd8] sm:$0x1] %vm395_vm2, %v3161_v0  ;;  %406 = vst.msk [vmem:[#allocation2 + $0xf0] sm:$0x1] %vm395_vm2, %v3161_v0  ;;  %s381_s29 = scalar_select %p380_p10, %s3257_s21, 1  ;;  %v685_v6 = vld [vmem:[#allocation2 + $0x1] sm:$0xff] }
  0x18   : > { %407 = vst.msk [vmem:[#allocation2 + $0x108] sm:$0x1] %vm395_vm2, %v3161_v0  ;;  %408 = vst.msk [vmem:[#allocation2 + $0x120] sm:$0x1] %vm395_vm2, %v3161_v0  ;;  %v686_v7 = vld [vmem:[#allocation2 + $0x9] sm:$0xff]  ;;  %vm1572_vm10 = vcmask 261344  }
  0x19   : > { %409 = vst.msk [vmem:[#allocation2 + $0x138] sm:$0x1] %vm395_vm2, %v3161_v0  ;;  %410 = vst.msk [vmem:[#allocation2 + $0x150] sm:$0x1] %vm395_vm2, %v3161_v0  ;;  %s2932_s13 = sshll.u32 %s381_s29, 8  ;;  %v814_v8 = vld [vmem:[#allocation2 + $0x2] sm:$0xff]  ;;  %v717_v12 = vpack.c.bf16 %v686_v7, %v685_v6 }
  0x1a   : > { %411 = vst.msk [vmem:[#allocation2 + $0x168] sm:$0x1] %vm395_vm2, %v3161_v0  ;;  %412 = vst.msk [vmem:[#allocation2 + $0x180] sm:$0x1] %vm395_vm2, %v3161_v0  ;;  %s3381_s24 = scalar_lea.vmem %s4206_s0, %s2932_s13  ;;  %s4197_s29 = smov 8   ;;  %v622_v43 = vld [vmem:[#allocation2 + $0x8] sm:$0xff] }
  0x1b   : > { %415 = vst.msk [vmem:[#allocation2 + $0x29] sm:$0x1] %vm395_vm2, %v3161_v0  ;;  %416 = vst.msk [vmem:[#allocation2 + $0x41] sm:$0x1] %vm395_vm2, %v3161_v0  ;;  %v478_v3 = vld [vmem:[%s3381_s24] sm:$0xff]  ;;  %v479_v4 = vld [vmem:[%s3381_s24 + $0x8] sm:$0xff]  ;;  %749 = vrot.lane.b32.xlu0 %v717_v12, %s3162_s25 }
  0x1c   : > { %417 = vst.msk [vmem:[#allocation2 + $0x59] sm:$0x1] %vm395_vm2, %v3161_v0  ;;  %418 = vst.msk [vmem:[#allocation2 + $0x71] sm:$0x1] %vm395_vm2, %v3161_v0  ;;  %v480_v5 = vld [vmem:[%s3381_s24 + $0x10] sm:$0xff]  ;;  %v517_v9 = vmul.f32 %v3371_v1, %v478_v3  ;;  %v518_v10 = vmul.f32 %v3371_v1, %v479_v4  ;;  %v481_v14 = vld [vmem:[%s3381_s24 + $0x18] sm:$0xff] }
  0x1d   : > { %419 = vst.msk [vmem:[#allocation2 + $0x89] sm:$0x1] %vm395_vm2, %v3161_v0  ;;  %420 = vst.msk [vmem:[#allocation2 + $0xa1] sm:$0x1] %vm395_vm2, %v3161_v0  ;;  %v519_v11 = vmul.f32 %v3371_v1, %v480_v5  ;;  %v482_v15 = vld [vmem:[%s3381_s24 + $0x20] sm:$0xff]  ;;  %v520_v19 = vmul.f32 %v3371_v1, %v481_v14  ;;  %v483_v20 = vld [vmem:[%s3381_s24 + $0x28] sm:$0xff] }
  0x1e   : > { %421 = vst.msk [vmem:[#allocation2 + $0xb9] sm:$0x1] %vm395_vm2, %v3161_v0  ;;  %422 = vst.msk [vmem:[#allocation2 + $0xd1] sm:$0x1] %vm395_vm2, %v3161_v0  ;;  %v556_v17 = vadd.f32 %v3376_v2, %v517_v9  ;;  %v557_v18 = vadd.f32 %v3376_v2, %v518_v10  ;;  %v484_v21 = vld [vmem:[%s3381_s24 + $0x30] sm:$0xff]  ;;  %v485_v22 = vld [vmem:[%s3381_s24 + $0x38] sm:$0xff]  ;;  %v521_v24 = vmul.f32 %v3371_v1, %v482_v15 }
  0x1f   : > { %423 = vst.msk [vmem:[#allocation2 + $0xe9] sm:$0x1] %vm395_vm2, %v3161_v0  ;;  %424 = vst.msk [vmem:[#allocation2 + $0x101] sm:$0x1] %vm395_vm2, %v3161_v0  ;;  %v558_v23 = vadd.f32 %v3376_v2, %v519_v11  ;;  %v522_v25 = vmul.f32 %v3371_v1, %v483_v20  ;;  %v523_v26 = vmul.f32 %v3371_v1, %v484_v21  ;;  %v486_v27 = vld [vmem:[%s3381_s24 + $0x40] sm:$0xff]  ;;  %v487_v28 = vld [vmem:[%s3381_s24 + $0x48] sm:$0xff] }
  0x20   : > { %425 = vst.msk [vmem:[#allocation2 + $0x119] sm:$0x1] %vm395_vm2, %v3161_v0  ;;  %426 = vst.msk [vmem:[#allocation2 + $0x131] sm:$0x1] %vm395_vm2, %v3161_v0  ;;  %v488_v29 = vld [vmem:[%s3381_s24 + $0x50] sm:$0xff]  ;;  %v559_v30 = vadd.f32 %v3376_v2, %v520_v19  ;;  %v524_v31 = vmul.f32 %v3371_v1, %v485_v22  ;;  %v525_v32 = vmul.f32 %v3371_v1, %v486_v27  ;;  %v489_v34 = vld [vmem:[%s3381_s24 + $0x58] sm:$0xff] }
  0x21   : > { %427 = vst.msk [vmem:[#allocation2 + $0x149] sm:$0x1] %vm395_vm2, %v3161_v0  ;;  %428 = vst.msk [vmem:[#allocation2 + $0x161] sm:$0x1] %vm395_vm2, %v3161_v0  ;;  %v526_v33 = vmul.f32 %v3371_v1, %v487_v28  ;;  %v490_v35 = vld [vmem:[%s3381_s24 + $0x60] sm:$0xff]  ;;  %v491_v36 = vld [vmem:[%s3381_s24 + $0x68] sm:$0xff]  ;;  %v560_v37 = vadd.f32 %v3376_v2, %v521_v24  ;;  %v561_v38 = vadd.f32 %v3376_v2, %v522_v25 }
  0x22   : > { %429 = vst.msk [vmem:[#allocation2 + $0x179] sm:$0x1] %vm395_vm2, %v3161_v0  ;;  %430 = vst.msk [vmem:[#allocation2 + $0x191] sm:$0x1] %vm395_vm2, %v3161_v0  ;;  %v562_v39 = vadd.f32 %v3376_v2, %v523_v26  ;;  %v527_v40 = vmul.f32 %v3371_v1, %v488_v29  ;;  %v492_v41 = vld [vmem:[%s3381_s24 + $0x70] sm:$0xff]  ;;  %v493_v42 = vld [vmem:[%s3381_s24 + $0x78] sm:$0xff]  ;;  %v563_v44 = vadd.f32 %v3376_v2, %v524_v31 }
  0x23   : > { %431 = vst.msk [vmem:[#allocation2 + $0x1a9] sm:$0x1] %vm395_vm2, %v3161_v0  ;;  %396 = vst.msk [vmem:[#allocation2] sm:$0x1] %vm395_vm2, %v3161_v0  ;;  %v564_v45 = vadd.f32 %v3376_v2, %v525_v32  ;;  %v565_v46 = vadd.f32 %v3376_v2, %v526_v33  ;;  %v528_v47 = vmul.f32 %v3371_v1, %v489_v34  ;;  %v494_v49 = vld [vmem:[%s3381_s24 + $0x80] sm:$0xff]  ;;  %v495_v50 = vld [vmem:[%s3381_s24 + $0x88] sm:$0xff] }
  0x24   : > { %414 = vst.msk [vmem:[#allocation2 + $0x11] sm:$0x1] %vm395_vm2, %v3161_v0  ;;  %413 = vst.msk [vmem:[#allocation2 + $0x198] sm:$0x1] %vm395_vm2, %v3161_v0  ;;  %v566_v51 = vadd.f32 %v3376_v2, %v527_v40  ;;  %v529_v52 = vmul.f32 %v3371_v1, %v490_v35  ;;  %v530_v53 = vmul.f32 %v3371_v1, %v491_v36  ;;  %v496_v55 = vld [vmem:[%s3381_s24 + $0x90] sm:$0xff]  ;;  %v497_v56 = vld [vmem:[%s3381_s24 + $0x98] sm:$0xff] }
  0x25   : > { %589 = vst.msk [vmem:[#allocation2 + $0x19] sm:$0xff] %vm386_vm0, %v556_v17  ;;  %590 = vst.msk [vmem:[#allocation2 + $0x21] sm:$0xff] %vm386_vm0, %v557_v18  ;;  %v531_v54 = vmul.f32 %v3371_v1, %v492_v41  ;;  %v567_v57 = vadd.f32 %v3376_v2, %v528_v47  ;;  %v532_v58 = vmul.f32 %v3371_v1, %v493_v42  ;;  %s4195_s13 = smov 20   ;;  %vm1701_vm11 = vcmask 294144   ;;  %s3171_s16 = smov 56  }
  0x26   : > { %591 = vst.msk [vmem:[#allocation2 + $0x31] sm:$0xff] %vm386_vm0, %v558_v23  ;;  %592 = vst.msk [vmem:[#allocation2 + $0x39] sm:$0xff] %vm386_vm0, %v559_v30  ;;  %v533_v60 = vmul.f32 %v3371_v1, %v494_v49  ;;  %v568_v61 = vadd.f32 %v3376_v2, %v529_v52  ;;  %v569_v62 = vadd.f32 %v3376_v2, %v530_v53  ;;  %v3089_v52 = vld [vmem:[%s4186_s3] sm:$0xff]   ;;  %vm1754_vm12 = vcmask 293888  }
  0x27   : > { %593 = vst.msk [vmem:[#allocation2 + $0x49] sm:$0xff] %vm386_vm0, %v560_v37  ;;  %594 = vst.msk [vmem:[#allocation2 + $0x51] sm:$0xff] %vm386_vm0, %v561_v38  ;;  %v570_v63 = vadd.f32 %v3376_v2, %v531_v54  ;;  %v534_v3 = vmul.f32 %v3371_v1, %v495_v50  ;;  %v571_v4 = vadd.f32 %v3376_v2, %v532_v58  ;;  %v3090_v54 = vld [vmem:[%s4186_s3 + $0x8] sm:$0xff]   ;;  %2967 = vmatprep.subr.bf16.mxu0 %v3089_v52  ;;  %vm432_vm13 = vcmask 64512  }
  0x28   : > { %595 = vst.msk [vmem:[#allocation2 + $0x61] sm:$0xff] %vm386_vm0, %v562_v39  ;;  %596 = vst.msk [vmem:[#allocation2 + $0x69] sm:$0xff] %vm386_vm0, %v563_v44  ;;  %v572_v5 = vadd.f32 %v3376_v2, %v533_v60  ;;  %v535_v10 = vmul.f32 %v3371_v1, %v496_v55  ;;  %v536_v11 = vmul.f32 %v3371_v1, %v497_v56  ;;  %v498_v55 = vld [vmem:[%s3381_s24 + $0xa0] sm:$0xff]  ;;  %v499_v56 = vld [vmem:[%s3381_s24 + $0xa8] sm:$0xff]  ;;  %2968 = vmatpush3.bf16.msra.mxu0 %v3089_v52  ;;  %vm435_vm14 = vcmask 58368  }
  0x29   : > { %597 = vst.msk [vmem:[#allocation2 + $0x79] sm:$0xff] %vm386_vm0, %v564_v45  ;;  %598 = vst.msk [vmem:[#allocation2 + $0x81] sm:$0xff] %vm386_vm0, %v565_v46  ;;  %v573_v9 = vadd.f32 %v3376_v2, %v534_v3  ;;  %v538_v58 = vmul.f32 %v3371_v1, %v499_v56  ;;  %2969 = vmatprep.subr.bf16.mxu0 %v3090_v54  ;;  %v3091_v60 = vld [vmem:[%s4186_s3 + $0x10] ss:$0 sps:$4 sm:$0x33]   ;;  %vm441_vm15 = vcmask 57344  }
  0x2a   : > { %v621_v48 = vld [vmem:[#allocation2] sm:$0xff]  ;;  %599 = vst.msk [vmem:[#allocation2 + $0x91] sm:$0xff] %vm386_vm0, %v566_v51  ;;  %600 = vst.msk [vmem:[#allocation2 + $0x99] sm:$0xff] %vm386_vm0, %v567_v57  ;;  %v574_v20 = vadd.f32 %v3376_v2, %v535_v10  ;;  %v575_v21 = vadd.f32 %v3376_v2, %v536_v11  ;;  %v537_v57 = vmul.f32 %v3371_v1, %v498_v55  ;;  %v500_v3 = vld [vmem:[%s3381_s24 + $0xb0] sm:$0xff] }
  0x2b   : > { %v815_v13 = vld [vmem:[#allocation2 + $0xa] sm:$0xff]  ;;  %v653_v59 = vpack.c.bf16 %v622_v43, %v621_v48  ;;  %601 = vst.msk [vmem:[#allocation2 + $0xa9] sm:$0xff] %vm386_vm0, %v568_v61  ;;  %602 = vst.msk [vmem:[#allocation2 + $0xb1] sm:$0xff] %vm386_vm0, %v569_v62 }
  0x2c   : > { %v846_v16 = vpack.c.bf16 %v815_v13, %v814_v8  ;;  %v687_v6 = vld [vmem:[#allocation2 + $0x19] sm:$0xff]  ;;  %v688_v7 = vld [vmem:[#allocation2 + $0x21] sm:$0xff]  ;;  %603 = vst.msk [vmem:[#allocation2 + $0xc1] sm:$0xff] %vm386_vm0, %v570_v63  ;;  %604 = vst.msk [vmem:[#allocation2 + $0xc9] sm:$0xff] %vm386_vm0, %v571_v4  ;;  %v577_v63 = vadd.f32 %v3376_v2, %v538_v58  ;;  %2970 = vmatpush3.bf16.msra.mxu0 %v3090_v54 }
  0x2d   : > { %669 = vst.msk [vmem:[#allocation3] sm:$0xff] %vm386_vm0, %v653_v59  ;;  %v816_v8 = vld [vmem:[#allocation2 + $0x1a] sm:$0xff]  ;;  %v718_v12 = vpack.c.bf16 %v688_v7, %v687_v6  ;;  %v817_v13 = vld [vmem:[#allocation2 + $0x22] sm:$0xff]  ;;  %605 = vst.msk [vmem:[#allocation2 + $0xd9] sm:$0xff] %vm386_vm0, %v572_v5  ;;  %v576_v59 = vadd.f32 %v3376_v2, %v537_v57  ;;  %v539_v5 = vmul.f32 %v3371_v1, %v500_v3  ;;  %3033 = vmatprep.subr.msk.bf16.mxu0 %vm1803_vm3, %v3091_v60 }
  0x2e   : > { %878 = vrot.lane.b32.xlu1 %v846_v16, %s4197_s29  ;;  %v943_v14 = vld [vmem:[#allocation2 + $0x18] sm:$0xff]  ;;  %v944_v15 = vld [vmem:[#allocation2 + $0x20] sm:$0xff]  ;;  %v847_v16 = vpack.c.bf16 %v817_v13, %v816_v8  ;;  %v945_v18 = vld [vmem:[#allocation2 + $0x30] sm:$0xff]  ;;  %606 = vst.msk [vmem:[#allocation2 + $0xe1] sm:$0xff] %vm386_vm0, %v573_v9  ;;  %v1805_v8 = vsel %vm1803_vm3, %v3091_v60, 0 }
  0x2f   : > { %v975_v17 = vpack.c.bf16 %v944_v15, %v943_v14  ;;  %v946_v19 = vld [vmem:[#allocation2 + $0x38] sm:$0xff]  ;;  %751 = vrot.lane.b32.xlu0 %v718_v12, %s3162_s25  ;;  %v1333_v23 = vld [vmem:[#allocation2 + $0x48] sm:$0xff]  ;;  %v1334_v24 = vld [vmem:[#allocation2 + $0x50] sm:$0xff]  ;;  %607 = vst.msk [vmem:[#allocation2 + $0xf1] sm:$0xff] %vm386_vm0, %v574_v20  ;;  %v578_v9 = vadd.f32 %v3376_v2, %v539_v5 }
  0x30   : > { %v976_v22 = vpack.c.bf16 %v946_v19, %v945_v18  ;;  %608 = vst.msk [vmem:[#allocation2 + $0xf9] sm:$0xff] %vm386_vm0, %v575_v21  ;;  %v1074_v25 = vld [vmem:[#allocation2 + $0x31] sm:$0xff]  ;;  %v1075_v26 = vld [vmem:[#allocation2 + $0x39] sm:$0xff]  ;;  %v3469_v27 = vpack.c.bf16 %v1334_v24, %v1333_v23  ;;  %v950_v29 = vld [vmem:[#allocation2 + $0x68] sm:$0xff]  ;;  %2972 = vmatpush3.bf16.msra.mxu0 %v1805_v8 }
  0x31   : > { %670 = vst.msk [vmem:[#allocation3 + $0x8] sm:$0xff] %vm386_vm0, %v975_v17  ;;  %v949_v28 = vld [vmem:[#allocation2 + $0x60] sm:$0xff]  ;;  %v3478_v31 = vpack.c.bf16 %v1075_v26, %v1074_v25  ;;  %v1337_v32 = vld [vmem:[#allocation2 + $0x78] sm:$0xff]  ;;  %v953_v37 = vld [vmem:[#allocation2 + $0x90] sm:$0xff] }
  0x32   : > { %880 = vrot.lane.b32.xlu1 %v847_v16, %s4197_s29  ;;  %671 = vst.msk [vmem:[#allocation3 + $0x10] sm:$0xff] %vm386_vm0, %v976_v22  ;;  %v3473_v30 = vpack.c.bf16 %v950_v29, %v949_v28  ;;  %672 = vst.msk [vmem:[#allocation3 + $0x18] sm:$0xff] %vm386_vm0, %v3469_v27  ;;  %v1338_v33 = vld [vmem:[#allocation2 + $0x80] sm:$0xff]  ;;  %v1203_v34 = vld [vmem:[#allocation2 + $0x32] sm:$0xff] }
  0x33   : > { %1007 = vrot.lane.b32.xlu0 %v975_v17, %s3164_s30  ;;  %v1204_v35 = vld [vmem:[#allocation2 + $0x3a] sm:$0xff]  ;;  %v3480_v36 = vpack.c.bf16 %v1338_v33, %v1337_v32  ;;  %v1341_v41 = vld [vmem:[#allocation2 + $0xa8] sm:$0xff]  ;;  %v1342_v42 = vld [vmem:[#allocation2 + $0xb0] sm:$0xff]  ;;  %609 = vst.msk [vmem:[#allocation2 + $0x109] sm:$0xff] %vm386_vm0, %v576_v59 }
  0x34   : > { %673 = vst.msk [vmem:[#allocation3 + $0x20] sm:$0xff] %vm386_vm0, %v3473_v30  ;;  %v954_v38 = vld [vmem:[#allocation2 + $0x98] sm:$0xff]  ;;  %v3491_v40 = vpack.c.bf16 %v1204_v35, %v1203_v34  ;;  %v3493_v43 = vpack.c.bf16 %v1342_v42, %v1341_v41  ;;  %v1462_v46 = vld [vmem:[#allocation2 + $0x49] sm:$0xff]  ;;  %610 = vst.msk [vmem:[#allocation2 + $0x111] sm:$0xff] %vm386_vm0, %v577_v63 }
  0x35   : > { %v3485_v39 = vpack.c.bf16 %v954_v38, %v953_v37  ;;  %674 = vst.msk [vmem:[#allocation3 + $0x28] sm:$0xff] %vm386_vm0, %v3480_v36  ;;  %v1345_v44 = vld [vmem:[#allocation2 + $0xd8] sm:$0xff]  ;;  %v1346_v45 = vld [vmem:[#allocation2 + $0xe0] sm:$0xff]  ;;  %v1591_v61 = vld [vmem:[#allocation2 + $0x4a] sm:$0xff] }
  0x36   : > { %1009 = vrot.lane.b32.xlu1 %v976_v22, %s3164_s30  ;;  %676 = vst.msk [vmem:[#allocation3 + $0x38] sm:$0xff] %vm386_vm0, %v3493_v43  ;;  %v1463_v47 = vld [vmem:[#allocation2 + $0x51] sm:$0xff]  ;;  %v3502_v48 = vpack.c.bf16 %v1346_v45, %v1345_v44  ;;  %611 = vst.msk [vmem:[#allocation2 + $0x121] sm:$0xff] %vm386_vm0, %v578_v9  ;;  %v1078_v14 = vld [vmem:[#allocation2 + $0x61] sm:$0xff] }
  0x37   : > { %1136 = vrot.lane.b32.xlu0 %v718_v12, %s4199_s12  ;;  %675 = vst.msk [vmem:[#allocation3 + $0x30] sm:$0xff] %vm386_vm0, %v3485_v39  ;;  %v961_v49 = vld [vmem:[#allocation2 + $0xf0] sm:$0xff]  ;;  %v962_v50 = vld [vmem:[#allocation2 + $0xf8] sm:$0xff]  ;;  %v3514_v53 = vpack.c.bf16 %v1463_v47, %v1462_v46  ;;  %v502_v18 = vld [vmem:[%s3381_s24 + $0xc0] sm:$0xff] }
  0x38   : > { %v3505_v51 = vpack.c.bf16 %v962_v50, %v961_v49  ;;  %678 = vst.msk [vmem:[#allocation3 + $0x48] sm:$0xff] %vm386_vm0, %v3502_v48  ;;  %v1592_v62 = vld [vmem:[#allocation2 + $0x52] sm:$0xff]  ;;  %v1079_v15 = vld [vmem:[#allocation2 + $0x69] sm:$0xff]  ;;  %v541_v21 = vmul.f32 %v3371_v1, %v502_v18  ;;  %v1595_v37 = vld [vmem:[#allocation2 + $0x7a] sm:$0xff] }
  0x39   : > { %v501_v4 = vld [vmem:[%s3381_s24 + $0xb8] sm:$0xff]  ;;  %v1622_v7 = vpack.c.bf16 %v1592_v62, %v1591_v61  ;;  %v503_v20 = vld [vmem:[%s3381_s24 + $0xc8] sm:$0xff]  ;;  %v1107_v23 = vpack.c.bf16 %v1079_v15, %v1078_v14  ;;  %433 = vst.msk [vmem:[#allocation4] sm:$0xff] %vm432_vm13, %v3161_v0  ;;  %434 = vst.msk [vmem:[#allocation4 + $0x8] sm:$0xff] %vm432_vm13, %v3161_v0 }
  0x3a   : > { %1138 = vrot.lane.b32.xlu1 %v3478_v31, %s4199_s12  ;;  %679 = vst.msk [vmem:[#allocation3 + $0x50] sm:$0xff] %vm386_vm0, %v3505_v51  ;;  %v540_v6 = vmul.f32 %v3371_v1, %v501_v4  ;;  %v1349_v11 = vld [vmem:[#allocation2 + $0x108] sm:$0xff]  ;;  %v580_v24 = vadd.f32 %v3376_v2, %v541_v21  ;;  %v1466_v29 = vld [vmem:[#allocation2 + $0x79] sm:$0xff]  ;;  %v1082_v47 = vld [vmem:[#allocation2 + $0x91] sm:$0xff] }
  0x3b   : > { %1265 = vrot.lane.b32.xlu0 %v847_v16, %s4195_s13  ;;  %v1350_v12 = vld [vmem:[#allocation2 + $0x110] sm:$0xff]  ;;  %v1207_v25 = vld [vmem:[#allocation2 + $0x62] sm:$0xff]  ;;  %v505_v41 = vld [vmem:[%s3381_s24 + $0xd8] sm:$0xff]  ;;  %436 = vst.msk [vmem:[#allocation4 + $0x10] sm:$0x3] %vm435_vm14, %v3161_v0 }
  0x3c   : > { %v579_v10 = vadd.f32 %v3376_v2, %v540_v6  ;;  %v3553_v13 = vpack.c.bf16 %v1350_v12, %v1349_v11  ;;  %v1208_v26 = vld [vmem:[#allocation2 + $0x6a] sm:$0xff]  ;;  %613 = vst.msk [vmem:[#allocation2 + $0x139] sm:$0xff] %vm386_vm0, %v580_v24  ;;  %v1596_v38 = vld [vmem:[#allocation2 + $0x82] sm:$0xff]  ;;  %v1083_v49 = vld [vmem:[#allocation2 + $0x99] sm:$0xff] }
  0x3d   : > { %v965_v16 = vld [vmem:[#allocation2 + $0x120] sm:$0xff]  ;;  %v1624_v44 = vpack.c.bf16 %v1596_v38, %v1595_v37  ;;  %v507_v55 = vld [vmem:[%s3381_s24 + $0xe8] sm:$0xff]  ;;  %v1109_v58 = vpack.c.bf16 %v1083_v49, %v1082_v47  ;;  %v1211_v60 = vld [vmem:[#allocation2 + $0x92] sm:$0xff]  ;;  %442 = vst.msk [vmem:[#allocation4] sm:$0x1] %vm441_vm15, %v3161_v0 }
  0x3e   : > { %1267 = vrot.lane.b32.xlu1 %v3491_v40, %s4195_s13  ;;  %612 = vst.msk [vmem:[#allocation2 + $0x129] sm:$0xff] %vm386_vm0, %v579_v10  ;;  %680 = vst.msk [vmem:[#allocation3 + $0x58] sm:$0xff] %vm386_vm0, %v3553_v13  ;;  %s4207_s13 = smov 20   ;;  %v546_v57 = vmul.f32 %v3371_v1, %v507_v55  ;;  %v1212_v61 = vld [vmem:[#allocation2 + $0x9a] sm:$0xff]  ;;  %v1470_v63 = vld [vmem:[#allocation2 + $0xa9] sm:$0xff] }
  0x3f   : > { %1395 = vrot.lane.b32.xlu0 %v976_v22, %s3167_s14  ;;  %v542_v22 = vmul.f32 %v3371_v1, %v503_v20  ;;  %v1471_v3 = vld [vmem:[#allocation2 + $0xb1] sm:$0xff]  ;;  %v958_v18 = vld [vmem:[#allocation2 + $0xc8] sm:$0xff]  ;;  %v1603_v37 = vld [vmem:[#allocation2 + $0xda] sm:$0xff]  ;;  %443 = vst.msk [vmem:[#allocation4 + $0x18] sm:$0x1] %vm441_vm15, %v3161_v0 }
  0x40   : > { %v585_v62 = vadd.f32 %v3376_v2, %v546_v57  ;;  %v1599_v8 = vld [vmem:[#allocation2 + $0xaa] sm:$0xff]  ;;  %v1600_v9 = vld [vmem:[#allocation2 + $0xb2] sm:$0xff]  ;;  %v1086_v20 = vld [vmem:[#allocation2 + $0xc1] sm:$0xff]  ;;  %444 = vst.msk [vmem:[#allocation4 + $0x30] sm:$0x1] %vm441_vm15, %v3161_v0 }
  0x41   : > { %v581_v28 = vadd.f32 %v3376_v2, %v542_v22  ;;  %v508_v10 = vld [vmem:[%s3381_s24 + $0xf0] sm:$0xff]  ;;  %v509_v11 = vld [vmem:[%s3381_s24 + $0xf8] sm:$0xff]  ;;  %v1626_v14 = vpack.c.bf16 %v1600_v9, %v1599_v8  ;;  %v1215_v22 = vld [vmem:[#allocation2 + $0xc2] sm:$0xff]  ;;  %445 = vst.msk [vmem:[#allocation4 + $0x48] sm:$0x1] %vm441_vm15, %v3161_v0 }
  0x42   : > { %1397 = vrot.lane.b32.xlu1 %v3469_v27, %s3167_s14  ;;  %618 = vst.msk [vmem:[#allocation2 + $0x171] sm:$0xff] %vm386_vm0, %v585_v62  ;;  %v547_v12 = vmul.f32 %v3371_v1, %v508_v10  ;;  %v1087_v21 = vld [vmem:[#allocation2 + $0xc9] sm:$0xff]  ;;  %v1090_v49 = vld [vmem:[#allocation2 + $0xf1] sm:$0xff]  ;;  %v1220_v57 = vld [vmem:[#allocation2 + $0xfa] sm:$0xff] }
  0x43   : > { %1524 = vrot.lane.b32.xlu0 %v3478_v31, %s3168_s15  ;;  %614 = vst.msk [vmem:[#allocation2 + $0x141] sm:$0xff] %vm386_vm0, %v581_v28  ;;  %v1353_v32 = vld [vmem:[#allocation2 + $0x138] sm:$0xff]  ;;  %v638_v28 = vld [vmem:[#allocation2 + $0xc8] sm:$0xff] }
  0x44   : > { %v586_v15 = vadd.f32 %v3376_v2, %v547_v12  ;;  %v1604_v38 = vld [vmem:[#allocation2 + $0xe2] sm:$0xff]  ;;  %v1607_v8 = vld [vmem:[#allocation2 + $0x10a] sm:$0xff]  ;;  %446 = vst.msk [vmem:[#allocation4 + $0x60] sm:$0x1] %vm441_vm15, %v3161_v0  ;;  %447 = vst.msk [vmem:[#allocation4 + $0x78] sm:$0x1] %vm441_vm15, %v3161_v0 }
  0x45   : > { %v966_v17 = vld [vmem:[#allocation2 + $0x128] sm:$0xff]  ;;  %448 = vst.msk [vmem:[#allocation4 + $0x90] sm:$0x1] %vm441_vm15, %v3161_v0  ;;  %449 = vst.msk [vmem:[#allocation4 + $0xa8] sm:$0x1] %vm441_vm15, %v3161_v0 }
  0x46   : > { %1526 = vrot.lane.b32.xlu1 %v3514_v53, %s3168_s15  ;;  %v3561_v19 = vpack.c.bf16 %v966_v17, %v965_v16  ;;  %619 = vst.msk [vmem:[#allocation2 + $0x181] sm:$0xff] %vm386_vm0, %v586_v15  ;;  %v957_v17 = vld [vmem:[#allocation2 + $0xc0] sm:$0xff]  ;;  %v1478_v62 = vld [vmem:[#allocation2 + $0x109] sm:$0xff] }
  0x47   : > { %1653 = vrot.lane.b32.xlu0 %v3491_v40, %s3169_s22  ;;  %450 = vst.msk [vmem:[#allocation4 + $0xc0] sm:$0x1] %vm441_vm15, %v3161_v0  ;;  %451 = vst.msk [vmem:[#allocation4 + $0xd8] sm:$0x1] %vm441_vm15, %v3161_v0 }
  0x48   : > { %681 = vst.msk [vmem:[#allocation3 + $0x60] sm:$0xff] %vm386_vm0, %v3561_v19 }
  0x49   : > { %452 = vst.msk [vmem:[#allocation4 + $0xf0] sm:$0x1] %vm441_vm15, %v3161_v0  ;;  %453 = vst.msk [vmem:[#allocation4 + $0x108] sm:$0x1] %vm441_vm15, %v3161_v0 }
  0x4a   : > { %753 = vrot.lane.b32.xlu1 %v3478_v31, %s3162_s25  ;;  %v1467_v31 = vld [vmem:[#allocation2 + $0x81] sm:$0xff]  ;;  %454 = vst.msk [vmem:[#allocation4 + $0x120] sm:$0x1] %vm441_vm15, %v3161_v0  ;;  %455 = vst.msk [vmem:[#allocation4 + $0x138] sm:$0x1] %vm441_vm15, %v3161_v0 }
  0x4b   : > { %1655 = vrot.lane.b32.xlu0 %v1622_v7, %s3169_s22  ;;  %v1354_v33 = vld [vmem:[#allocation2 + $0x140] sm:$0xff]  ;;  %v1495_v35 = vpack.c.bf16 %v1467_v31, %v1466_v29  ;;  %456 = vst.msk [vmem:[#allocation4 + $0x150] sm:$0x1] %vm441_vm15, %v3161_v0  ;;  %457 = vst.msk [vmem:[#allocation4 + $0x168] sm:$0x1] %vm441_vm15, %v3161_v0 }
  0x4c   : > { %v3583_v34 = vpack.c.bf16 %v1354_v33, %v1353_v32  ;;  %v1474_v29 = vld [vmem:[#allocation2 + $0xd9] sm:$0xff]  ;;  %v1475_v31 = vld [vmem:[#allocation2 + $0xe1] sm:$0xff]  ;;  %458 = vst.msk [vmem:[#allocation4 + $0x180] sm:$0x1] %vm441_vm15, %v3161_v0 }
  0x4d   : > { %v1499_v32 = vpack.c.bf16 %v1475_v31, %v1474_v29 }
  0x4e   : > { %755 = vrot.lane.b32.xlu1 %v3514_v53, %s3162_s25  ;;  %682 = vst.msk [vmem:[#allocation3 + $0x68] sm:$0xff] %vm386_vm0, %v3583_v34 }
  0x4f   : > { %882 = vrot.lane.b32.xlu0 %v3491_v40, %s4197_s29  ;;  %v504_v40 = vld [vmem:[%s3381_s24 + $0xd0] sm:$0xff] }
  0x50   : > { %v543_v42 = vmul.f32 %v3371_v1, %v504_v40 }
  0x52   : > { %884 = vrot.lane.b32.xlu1 %v1622_v7, %s4197_s29  ;;  %v582_v45 = vadd.f32 %v3376_v2, %v543_v42  ;;  %v1628_v42 = vpack.c.bf16 %v1604_v38, %v1603_v37  ;;  %v1611_v37 = vld [vmem:[#allocation2 + $0x13a] sm:$0xff]  ;;  %v1612_v38 = vld [vmem:[#allocation2 + $0x142] sm:$0xff] }
  0x53   : > { %1011 = vrot.lane.b32.xlu0 %v3469_v27, %s3164_s30  ;;  %v1236_v27 = vpack.c.bf16 %v1208_v26, %v1207_v25  ;;  %v637_v26 = vld [vmem:[#allocation2 + $0xc0] sm:$0xff] }
  0x54   : > { %615 = vst.msk [vmem:[#allocation2 + $0x151] sm:$0xff] %vm386_vm0, %v582_v45 }
  0x56   : > { %1013 = vrot.lane.b32.xlu1 %v3473_v30, %s3164_s30 }
  0x57   : > { %1140 = vrot.lane.b32.xlu0 %v3514_v53, %s4199_s12  ;;  %v506_v53 = vld [vmem:[%s3381_s24 + $0xe0] sm:$0xff] }
  0x58   : > { %v545_v56 = vmul.f32 %v3371_v1, %v506_v53 }
  0x5a   : > { %1142 = vrot.lane.b32.xlu1 %v1107_v23, %s4199_s12  ;;  %v584_v59 = vadd.f32 %v3376_v2, %v545_v56  ;;  %v1219_v56 = vld [vmem:[#allocation2 + $0xf2] sm:$0xff] }
  0x5b   : > { %1269 = vrot.lane.b32.xlu0 %v1622_v7, %s4207_s13  ;;  %v969_v50 = vld [vmem:[#allocation2 + $0x150] sm:$0xff]  ;;  %v1497_v7 = vpack.c.bf16 %v1471_v3, %v1470_v63 }
  0x5c   : > { %617 = vst.msk [vmem:[#allocation2 + $0x169] sm:$0xff] %vm386_vm0, %v584_v59  ;;  %v1242_v59 = vpack.c.bf16 %v1220_v57, %v1219_v56 }
  0x5e   : > { %1271 = vrot.lane.b32.xlu1 %v1236_v27, %s4207_s13 }
  0x5f   : > { %1399 = vrot.lane.b32.xlu0 %v3473_v30, %s3167_s14  ;;  %v544_v30 = vmul.f32 %v3371_v1, %v505_v41 }
  0x61   : > { %v583_v46 = vadd.f32 %v3376_v2, %v544_v30 }
  0x62   : > { %1401 = vrot.lane.b32.xlu1 %v3480_v36, %s3167_s14 }
  0x63   : > { %1528 = vrot.lane.b32.xlu0 %v1107_v23, %s3168_s15  ;;  %616 = vst.msk [vmem:[#allocation2 + $0x159] sm:$0xff] %vm386_vm0, %v583_v46  ;;  %v1357_v4 = vld [vmem:[#allocation2 + $0x168] sm:$0xff]  ;;  %v1358_v5 = vld [vmem:[#allocation2 + $0x170] sm:$0xff] }
  0x64   : > { %v3627_v6 = vpack.c.bf16 %v1358_v5, %v1357_v4 }
  0x66   : > { %1530 = vrot.lane.b32.xlu1 %v1495_v35, %s3168_s15  ;;  %684 = vst.msk [vmem:[#allocation3 + $0x78] sm:$0xff] %vm386_vm0, %v3627_v6 }
  0x67   : > { %1657 = vrot.lane.b32.xlu0 %v1236_v27, %s3169_s22 }
  0x6a   : > { %757 = vrot.lane.b32.xlu1 %v1107_v23, %s3162_s25  ;;  %v970_v52 = vld [vmem:[#allocation2 + $0x158] sm:$0xff]  ;;  %v1216_v23 = vld [vmem:[#allocation2 + $0xca] sm:$0xff] }
  0x6b   : > { %1659 = vrot.lane.b32.xlu0 %v1624_v44, %s3169_s22  ;;  %v3606_v54 = vpack.c.bf16 %v970_v52, %v969_v50  ;;  %v1091_v50 = vld [vmem:[#allocation2 + $0xf9] sm:$0xff] }
  0x6c   : > { %v1113_v53 = vpack.c.bf16 %v1091_v50, %v1090_v49  ;;  %v1098_v49 = vld [vmem:[#allocation2 + $0x151] sm:$0xff]  ;;  %v1099_v50 = vld [vmem:[#allocation2 + $0x159] sm:$0xff] }
  0x6d   : > { %683 = vst.msk [vmem:[#allocation3 + $0x70] sm:$0xff] %vm386_vm0, %v3606_v54  ;;  %v1227_v56 = vld [vmem:[#allocation2 + $0x152] sm:$0xff]  ;;  %v1228_v57 = vld [vmem:[#allocation2 + $0x15a] sm:$0xff] }
  0x6e   : > { %759 = vrot.lane.b32.xlu1 %v1495_v35, %s3162_s25 }
  0x6f   : > { %886 = vrot.lane.b32.xlu0 %v1236_v27, %s4197_s29  ;;  %v1240_v27 = vpack.c.bf16 %v1216_v23, %v1215_v22  ;;  %v1223_v22 = vld [vmem:[#allocation2 + $0x122] sm:$0xff]  ;;  %v1224_v23 = vld [vmem:[#allocation2 + $0x12a] sm:$0xff] }
  0x72   : > { %888 = vrot.lane.b32.xlu1 %v1624_v44, %s4197_s29 }
  0x73   : > { %1015 = vrot.lane.b32.xlu0 %v3480_v36, %s3164_s30  ;;  %v1238_v36 = vpack.c.bf16 %v1212_v61, %v1211_v60 }
  0x76   : > { %1017 = vrot.lane.b32.xlu1 %v3485_v39, %s3164_s30 }
  0x77   : > { %1144 = vrot.lane.b32.xlu0 %v1495_v35, %s4199_s12 }
  0x7a   : > { %1146 = vrot.lane.b32.xlu1 %v1109_v58, %s4199_s12 }
  0x7b   : > { %1273 = vrot.lane.b32.xlu0 %v1624_v44, %s4207_s13 }
  0x7e   : > { %1275 = vrot.lane.b32.xlu1 %v1238_v36, %s4207_s13 }
  0x7f   : > { %1403 = vrot.lane.b32.xlu0 %v3485_v39, %s3167_s14  ;;  %v548_v39 = vmul.f32 %v3371_v1, %v509_v11  ;;  %v982_v1 = vpack.c.bf16 %v958_v18, %v957_v17  ;;  %v1094_v18 = vld [vmem:[#allocation2 + $0x121] sm:$0xff] }
  0x81   : > { %v587_v16 = vadd.f32 %v3376_v2, %v548_v39  ;;  %v1111_v2 = vpack.c.bf16 %v1087_v21, %v1086_v20 }
  0x82   : > { %1405 = vrot.lane.b32.xlu1 %v3493_v43, %s3167_s14 }
  0x83   : > { %1532 = vrot.lane.b32.xlu0 %v1109_v58, %s3168_s15  ;;  %620 = vst.msk [vmem:[#allocation2 + $0x189] sm:$0xff] %vm386_vm0, %v587_v16 }
  0x86   : > { %1534 = vrot.lane.b32.xlu1 %v1497_v7, %s3168_s15 }
  0x87   : > { %1661 = vrot.lane.b32.xlu0 %v1238_v36, %s3169_s22 }
  0x8a   : > { %761 = vrot.lane.b32.xlu1 %v1109_v58, %s3162_s25 }
  0x8b   : > { %1663 = vrot.lane.b32.xlu0 %v1626_v14, %s3169_s22 }
  0x8d   : > { %v750_v24 = vpop.permute.xlu0 %749 }
  0x8e   : > { %763 = vrot.lane.b32.xlu1 %v1497_v7, %s3162_s25  ;;  %798 = vst.msk [vmem:[#allocation3] sm:$0xff] %vm797_vm4, %v750_v24 }
  0x8f   : > { %890 = vrot.lane.b32.xlu0 %v1238_v36, %s4197_s29  ;;  %v1479_v36 = vld [vmem:[#allocation2 + $0x111] sm:$0xff] }
  0x90   : > { %v1501_v3 = vpack.c.bf16 %v1479_v36, %v1478_v62  ;;  %v1487_v62 = vld [vmem:[#allocation2 + $0x171] sm:$0xff] }
  0x92   : > { %892 = vrot.lane.b32.xlu1 %v1626_v14, %s4197_s29 }
  0x93   : > { %1019 = vrot.lane.b32.xlu0 %v3493_v43, %s3164_s30  ;;  %v661_v43 = vpack.c.bf16 %v638_v28, %v637_v26 }
  0x95   : > { %677 = vst.msk [vmem:[#allocation3 + $0x40] sm:$0xff] %vm386_vm0, %v661_v43  ;;  %v1483_v43 = vld [vmem:[#allocation2 + $0x141] sm:$0xff] }
  0x96   : > { %1021 = vrot.lane.b32.xlu1 %v982_v1, %s3164_s30 }
  0x97   : > { %1148 = vrot.lane.b32.xlu0 %v1497_v7, %s4199_s12 }
  0x9a   : > { %1150 = vrot.lane.b32.xlu1 %v1111_v2, %s4199_s12 }
  0x9b   : > { %1277 = vrot.lane.b32.xlu0 %v1626_v14, %s4207_s13 }
  0x9e   : > { %1279 = vrot.lane.b32.xlu1 %v1240_v27, %s4207_s13 }
  0x9f   : > { %1407 = vrot.lane.b32.xlu0 %v982_v1, %s3167_s14  ;;  %v1095_v1 = vld [vmem:[#allocation2 + $0x129] sm:$0xff] }
  0xa0   : > { %v879_v25 = vpop.permute.xlu1 %878  ;;  %v1115_v21 = vpack.c.bf16 %v1095_v1, %v1094_v18  ;;  %v1102_v1 = vld [vmem:[#allocation2 + $0x181] sm:$0xff] }
  0xa1   : > { %927 = vst.msk [vmem:[#allocation3] sm:$0xff] %vm926_vm5, %v879_v25  ;;  %v752_v33 = vpop.permute.xlu0 %751  ;;  %v1244_v25 = vpack.c.bf16 %v1224_v23, %v1223_v22  ;;  %v1231_v23 = vld [vmem:[#allocation2 + $0x182] sm:$0xff] }
  0xa2   : > { %1409 = vrot.lane.b32.xlu1 %v3502_v48, %s3167_s14  ;;  %799 = vst.msk [vmem:[#allocation3 + $0x8] sm:$0xff] %vm797_vm4, %v752_v33 }
  0xa3   : > { %1536 = vrot.lane.b32.xlu0 %v1111_v2, %s3168_s15 }
  0xa4   : > { %v881_v35 = vpop.permute.xlu1 %880 }
  0xa5   : > { %928 = vst.msk [vmem:[#allocation3 + $0x8] sm:$0xff] %vm926_vm5, %v881_v35  ;;  %v1008_v40 = vpop.permute.xlu0 %1007 }
  0xa6   : > { %1538 = vrot.lane.b32.xlu1 %v1499_v32, %s3168_s15  ;;  %1056 = vst.msk [vmem:[#allocation3] sm:$0xff] %vm1055_vm6, %v1008_v40 }
  0xa7   : > { %1665 = vrot.lane.b32.xlu0 %v1240_v27, %s3169_s22 }
  0xa8   : > { %v1010_v41 = vpop.permute.xlu1 %1009 }
  0xa9   : > { %1057 = vst.msk [vmem:[#allocation3 + $0x8] sm:$0xff] %vm1055_vm6, %v1010_v41  ;;  %v1137_v30 = vpop.permute.xlu0 %1136 }
  0xaa   : > { %765 = vrot.lane.b32.xlu1 %v1111_v2, %s3162_s25  ;;  %1185 = vst.msk [vmem:[#allocation3] sm:$0xff] %vm1184_vm7, %v1137_v30 }
  0xab   : > { %1667 = vrot.lane.b32.xlu0 %v1628_v42, %s3169_s22 }
  0xac   : > { %v1139_v44 = vpop.permute.xlu1 %1138 }
  0xad   : > { %1186 = vst.msk [vmem:[#allocation3 + $0x8] sm:$0xff] %vm1184_vm7, %v1139_v44  ;;  %v1266_v45 = vpop.permute.xlu0 %1265 }
  0xae   : > { %767 = vrot.lane.b32.xlu1 %v1499_v32, %s3162_s25  ;;  %1314 = vst.msk [vmem:[#allocation3] sm:$0xff] %vm1313_vm8, %v1266_v45 }
  0xaf   : > { %894 = vrot.lane.b32.xlu0 %v1240_v27, %s4197_s29  ;;  %v1482_v27 = vld [vmem:[#allocation2 + $0x139] sm:$0xff] }
  0xb0   : > { %v1268_v46 = vpop.permute.xlu1 %1267  ;;  %v1503_v31 = vpack.c.bf16 %v1483_v43, %v1482_v27  ;;  %v1362_v27 = vld [vmem:[#allocation2 + $0x1a0] sm:$0xff] }
  0xb1   : > { %1315 = vst.msk [vmem:[#allocation3 + $0x8] sm:$0xff] %vm1313_vm8, %v1268_v46  ;;  %v1396_v47 = vpop.permute.xlu0 %1395 }
  0xb2   : > { %896 = vrot.lane.b32.xlu1 %v1628_v42, %s4197_s29  ;;  %1444 = vst.msk [vmem:[#allocation3] sm:$0xff] %vm1443_vm9, %v1396_v47 }
  0xb3   : > { %1023 = vrot.lane.b32.xlu0 %v3502_v48, %s3164_s30 }
  0xb4   : > { %v1398_v52 = vpop.permute.xlu1 %1397 }
  0xb5   : > { %1445 = vst.msk [vmem:[#allocation3 + $0x8] sm:$0xff] %vm1443_vm9, %v1398_v52  ;;  %v1525_v55 = vpop.permute.xlu0 %1524 }
  0xb6   : > { %1025 = vrot.lane.b32.xlu1 %v3505_v51, %s3164_s30  ;;  %1573 = vst.msk [vmem:[#allocation3] sm:$0xff] %vm1572_vm10, %v1525_v55 }
  0xb7   : > { %1152 = vrot.lane.b32.xlu0 %v1499_v32, %s4199_s12 }
  0xb8   : > { %v1527_v58 = vpop.permute.xlu1 %1526 }
  0xb9   : > { %1574 = vst.msk [vmem:[#allocation3 + $0x8] sm:$0xff] %vm1572_vm10, %v1527_v58  ;;  %v1654_v48 = vpop.permute.xlu0 %1653 }
  0xba   : > { %1154 = vrot.lane.b32.xlu1 %v1113_v53, %s4199_s12  ;;  %1702 = vst.msk [vmem:[#allocation3] sm:$0xff] %vm1701_vm11, %v1654_v48 }
  0xbb   : > { %1281 = vrot.lane.b32.xlu0 %v1628_v42, %s4207_s13  ;;  %v1632_v42 = vpack.c.bf16 %v1612_v38, %v1611_v37 }
  0xbc   : > { %v754_v60 = vpop.permute.xlu1 %753 }
  0xbd   : > { %800 = vst.msk [vmem:[#allocation3 + $0x10] sm:$0xff] %vm797_vm4, %v754_v60  ;;  %v1656_v61 = vpop.permute.xlu0 %1655 }
  0xbe   : > { %1283 = vrot.lane.b32.xlu1 %v1242_v59, %s4207_s13  ;;  %1703 = vst.msk [vmem:[#allocation3 + $0x8] sm:$0xff] %vm1701_vm11, %v1656_v61  ;;  %v1486_v61 = vld [vmem:[#allocation2 + $0x169] sm:$0xff] }
  0xbf   : > { %1411 = vrot.lane.b32.xlu0 %v3505_v51, %s3167_s14  ;;  %v1608_v51 = vld [vmem:[#allocation2 + $0x112] sm:$0xff] }
  0xc0   : > { %v756_v63 = vpop.permute.xlu1 %755  ;;  %v1630_v12 = vpack.c.bf16 %v1608_v51, %v1607_v8  ;;  %v1616_v8 = vld [vmem:[#allocation2 + $0x172] sm:$0xff] }
  0xc1   : > { %801 = vst.msk [vmem:[#allocation3 + $0x18] sm:$0xff] %vm797_vm4, %v756_v63  ;;  %v883_v4 = vpop.permute.xlu0 %882  ;;  %v1718_v5 = vld [vmem:[#allocation3] sm:$0xff]  ;;  %v1505_v63 = vpack.c.bf16 %v1487_v62, %v1486_v61 }
  0xc2   : > { %1413 = vrot.lane.b32.xlu1 %v3553_v13, %s3167_s14  ;;  %929 = vst.msk [vmem:[#allocation3 + $0x10] sm:$0xff] %vm926_vm5, %v883_v4  ;;  %2973 = vmatprep.mubr.msk.bf16.mxu0 %vm1754_vm12, %v1718_v5 }
  0xc3   : > { %1540 = vrot.lane.b32.xlu0 %v1113_v53, %s3168_s15 }
  0xc4   : > { %v885_v7 = vpop.permute.xlu1 %884 }
  0xc5   : > { %930 = vst.msk [vmem:[#allocation3 + $0x18] sm:$0xff] %vm926_vm5, %v885_v7  ;;  %v1012_v9 = vpop.permute.xlu0 %1011  ;;  %v1719_v10 = vld [vmem:[#allocation3 + $0x8] sm:$0xff]  ;;  %v1615_v7 = vld [vmem:[#allocation2 + $0x16a] sm:$0xff] }
  0xc6   : > { %1542 = vrot.lane.b32.xlu1 %v1501_v3, %s3168_s15  ;;  %1058 = vst.msk [vmem:[#allocation3 + $0x10] sm:$0xff] %vm1055_vm6, %v1012_v9  ;;  %2974 = vmatmul.mubr.msk.bf16.vlgmr.msra.gmra.mrb[0].mxu0 %vm1754_vm12, %v1719_v10  ;;  %v1634_v10 = vpack.c.bf16 %v1616_v8, %v1615_v7 }
  0xc7   : > { %1669 = vrot.lane.b32.xlu0 %v1242_v59, %s3169_s22 }
  0xc8   : > { %v1014_v11 = vpop.permute.xlu1 %1013 }
  0xc9   : > { %1059 = vst.msk [vmem:[#allocation3 + $0x18] sm:$0xff] %vm1055_vm6, %v1014_v11  ;;  %v1141_v39 = vpop.permute.xlu0 %1140 }
  0xca   : > { %769 = vrot.lane.b32.xlu1 %v1113_v53, %s3162_s25  ;;  %1187 = vst.msk [vmem:[#allocation3 + $0x10] sm:$0xff] %vm1184_vm7, %v1141_v39  ;;  %v1117_v53 = vpack.c.bf16 %v1099_v50, %v1098_v49 }
  0xcb   : > { %1671 = vrot.lane.b32.xlu0 %v1630_v12, %s3169_s22 }
  0xcc   : > { %v1143_v14 = vpop.permute.xlu1 %1142 }
  0xcd   : > { %1188 = vst.msk [vmem:[#allocation3 + $0x18] sm:$0xff] %vm1184_vm7, %v1143_v14  ;;  %v1270_v15 = vpop.permute.xlu0 %1269  ;;  %v973_v14 = vld [vmem:[#allocation2 + $0x180] sm:$0xff] }
  0xce   : > { %771 = vrot.lane.b32.xlu1 %v1501_v3, %s3162_s25  ;;  %1316 = vst.msk [vmem:[#allocation3 + $0x10] sm:$0xff] %vm1313_vm8, %v1270_v15  ;;  %v974_v15 = vld [vmem:[#allocation2 + $0x188] sm:$0xff] }
  0xcf   : > { %898 = vrot.lane.b32.xlu0 %v1242_v59, %s4197_s29  ;;  %v1246_v59 = vpack.c.bf16 %v1228_v57, %v1227_v56 }
  0xd0   : > { %v1272_v16 = vpop.permute.xlu1 %1271 }
  0xd1   : > { %1317 = vst.msk [vmem:[#allocation3 + $0x18] sm:$0xff] %vm1313_vm8, %v1272_v16  ;;  %v1400_v17 = vpop.permute.xlu0 %1399 }
  0xd2   : > { %900 = vrot.lane.b32.xlu1 %v1630_v12, %s4197_s29  ;;  %1446 = vst.msk [vmem:[#allocation3 + $0x10] sm:$0xff] %vm1443_vm9, %v1400_v17  ;;  %v990_v17 = vpack.c.bf16 %v974_v15, %v973_v14 }
  0xd3   : > { %1027 = vrot.lane.b32.xlu0 %v3553_v13, %s3164_s30 }
  0xd4   : > { %v1402_v20 = vpop.permute.xlu1 %1401 }
  0xd5   : > { %1447 = vst.msk [vmem:[#allocation3 + $0x18] sm:$0xff] %vm1443_vm9, %v1402_v20  ;;  %v1529_v2 = vpop.permute.xlu0 %1528  ;;  %v1103_v20 = vld [vmem:[#allocation2 + $0x189] sm:$0xff] }
  0xd6   : > { %1029 = vrot.lane.b32.xlu1 %v3561_v19, %s3164_s30  ;;  %1575 = vst.msk [vmem:[#allocation3 + $0x10] sm:$0xff] %vm1572_vm10, %v1529_v2  ;;  %v1119_v2 = vpack.c.bf16 %v1103_v20, %v1102_v1 }
  0xd7   : > { %1156 = vrot.lane.b32.xlu0 %v1501_v3, %s4199_s12 }
  0xd8   : > { %v1531_v24 = vpop.permute.xlu1 %1530 }
  0xd9   : > { %1576 = vst.msk [vmem:[#allocation3 + $0x18] sm:$0xff] %vm1572_vm10, %v1531_v24  ;;  %v1658_v26 = vpop.permute.xlu0 %1657  ;;  %v1232_v24 = vld [vmem:[#allocation2 + $0x18a] sm:$0xff] }
  0xda   : > { %1158 = vrot.lane.b32.xlu1 %v1115_v21, %s4199_s12  ;;  %1704 = vst.msk [vmem:[#allocation3 + $0x10] sm:$0xff] %vm1701_vm11, %v1658_v26  ;;  %v1248_v26 = vpack.c.bf16 %v1232_v24, %v1231_v23 }
  0xdb   : > { %1285 = vrot.lane.b32.xlu0 %v1630_v12, %s4207_s13 }
  0xdc   : > { %v758_v13 = vpop.permute.xlu1 %757 }
  0xdd   : > { %802 = vst.msk [vmem:[#allocation3 + $0x20] sm:$0xff] %vm797_vm4, %v758_v13  ;;  %v1660_v28 = vpop.permute.xlu0 %1659 }
  0xde   : > { %1287 = vrot.lane.b32.xlu1 %v1244_v25, %s4207_s13  ;;  %1705 = vst.msk [vmem:[#allocation3 + $0x18] sm:$0xff] %vm1701_vm11, %v1660_v28  ;;  %v1361_v28 = vld [vmem:[#allocation2 + $0x198] sm:$0xff] }
  0xdf   : > { %1415 = vrot.lane.b32.xlu0 %v3561_v19, %s3167_s14  ;;  %v1378_v43 = vpack.c.bf16 %v1362_v27, %v1361_v28 }
  0xe0   : > { %v760_v29 = vpop.permute.xlu1 %759 }
  0xe1   : > { %803 = vst.msk [vmem:[#allocation3 + $0x28] sm:$0xff] %vm797_vm4, %v760_v29  ;;  %v887_v32 = vpop.permute.xlu0 %886  ;;  %v1720_v33 = vld [vmem:[#allocation3 + $0x10] sm:$0xff] }
  0xe2   : > { %1417 = vrot.lane.b32.xlu1 %v3583_v34, %s3167_s14  ;;  %931 = vst.msk [vmem:[#allocation3 + $0x20] sm:$0xff] %vm926_vm5, %v887_v32  ;;  %2977 = vmatprep.mubr.msk.bf16.mxu0 %vm1754_vm12, %v1720_v33  ;;  %v1491_v32 = vld [vmem:[#allocation2 + $0x1a1] sm:$0xff] }
  0xe3   : > { %1544 = vrot.lane.b32.xlu0 %v1115_v21, %s3168_s15 }
  0xe4   : > { %v889_v35 = vpop.permute.xlu1 %888 }
  0xe5   : > { %932 = vst.msk [vmem:[#allocation3 + $0x28] sm:$0xff] %vm926_vm5, %v889_v35  ;;  %v1016_v19 = vpop.permute.xlu0 %1015  ;;  %v1721_v40 = vld [vmem:[#allocation3 + $0x18] sm:$0xff] }
  0xe6   : > { %1546 = vrot.lane.b32.xlu1 %v1503_v31, %s3168_s15  ;;  %1060 = vst.msk [vmem:[#allocation3 + $0x20] sm:$0xff] %vm1055_vm6, %v1016_v19  ;;  %2978 = vmatmul.mubr.msk.bf16.gmra.mrb[4].mxu0 %vm1754_vm12, %v1721_v40  ;;  %v1619_v19 = vld [vmem:[#allocation2 + $0x19a] sm:$0xff]  ;;  %v1620_v40 = vld [vmem:[#allocation2 + $0x1a2] sm:$0xff] }
  0xe7   : > { %1673 = vrot.lane.b32.xlu0 %v1244_v25, %s3169_s22 }
  0xe8   : > { %v1018_v41 = vpop.permute.xlu1 %1017 }
  0xe9   : > { %1061 = vst.msk [vmem:[#allocation3 + $0x28] sm:$0xff] %vm1055_vm6, %v1018_v41  ;;  %v1145_v30 = vpop.permute.xlu0 %1144 }
  0xea   : > { %773 = vrot.lane.b32.xlu1 %v1115_v21, %s3162_s25  ;;  %1189 = vst.msk [vmem:[#allocation3 + $0x20] sm:$0xff] %vm1184_vm7, %v1145_v30 }
  0xeb   : > { %1675 = vrot.lane.b32.xlu0 %v1632_v42, %s3169_s22 }
  0xec   : > { %v1147_v44 = vpop.permute.xlu1 %1146 }
  0xed   : > { %1190 = vst.msk [vmem:[#allocation3 + $0x28] sm:$0xff] %vm1184_vm7, %v1147_v44  ;;  %v1274_v45 = vpop.permute.xlu0 %1273 }
  0xee   : > { %775 = vrot.lane.b32.xlu1 %v1503_v31, %s3162_s25  ;;  %1318 = vst.msk [vmem:[#allocation3 + $0x20] sm:$0xff] %vm1313_vm8, %v1274_v45 }
  0xef   : > { %902 = vrot.lane.b32.xlu0 %v1244_v25, %s4197_s29 }
  0xf0   : > { %v1276_v46 = vpop.permute.xlu1 %1275 }
  0xf1   : > { %1319 = vst.msk [vmem:[#allocation3 + $0x28] sm:$0xff] %vm1313_vm8, %v1276_v46  ;;  %v1404_v47 = vpop.permute.xlu0 %1403 }
  0xf2   : > { %904 = vrot.lane.b32.xlu1 %v1632_v42, %s4197_s29  ;;  %1448 = vst.msk [vmem:[#allocation3 + $0x20] sm:$0xff] %vm1443_vm9, %v1404_v47 }
  0xf3   : > { %1031 = vrot.lane.b32.xlu0 %v3583_v34, %s3164_s30 }
  0xf4   : > { %v1406_v52 = vpop.permute.xlu1 %1405 }
  0xf5   : > { %1449 = vst.msk [vmem:[#allocation3 + $0x28] sm:$0xff] %vm1443_vm9, %v1406_v52  ;;  %v1533_v55 = vpop.permute.xlu0 %1532 }
  0xf6   : > { %1033 = vrot.lane.b32.xlu1 %v3606_v54, %s3164_s30  ;;  %1577 = vst.msk [vmem:[#allocation3 + $0x20] sm:$0xff] %vm1572_vm10, %v1533_v55 }
  0xf7   : > { %1160 = vrot.lane.b32.xlu0 %v1503_v31, %s4199_s12  ;;  %v1490_v31 = vld [vmem:[#allocation2 + $0x199] sm:$0xff] }
  0xf8   : > { %v1535_v58 = vpop.permute.xlu1 %1534  ;;  %v1507_v35 = vpack.c.bf16 %v1491_v32, %v1490_v31 }
  0xf9   : > { %1578 = vst.msk [vmem:[#allocation3 + $0x28] sm:$0xff] %vm1572_vm10, %v1535_v58  ;;  %v1662_v48 = vpop.permute.xlu0 %1661 }
  0xfa   : > { %1162 = vrot.lane.b32.xlu1 %v1117_v53, %s4199_s12  ;;  %1706 = vst.msk [vmem:[#allocation3 + $0x20] sm:$0xff] %vm1701_vm11, %v1662_v48 }
  0xfb   : > { %1289 = vrot.lane.b32.xlu0 %v1632_v42, %s4207_s13  ;;  %v1636_v42 = vpack.c.bf16 %v1620_v40, %v1619_v19 }
  0xfc   : > { %v762_v34 = vpop.permute.xlu1 %761 }
  0xfd   : > { %804 = vst.msk [vmem:[#allocation3 + $0x30] sm:$0xff] %vm797_vm4, %v762_v34  ;;  %v1664_v60 = vpop.permute.xlu0 %1663 }
  0xfe   : > { %1291 = vrot.lane.b32.xlu1 %v1246_v59, %s4207_s13  ;;  %1707 = vst.msk [vmem:[#allocation3 + $0x28] sm:$0xff] %vm1701_vm11, %v1664_v60 }
  0xff   : > { %1419 = vrot.lane.b32.xlu0 %v3606_v54, %s3167_s14 }
 0x100   : > { %v764_v36 = vpop.permute.xlu1 %763 }
 0x101   : > { %805 = vst.msk [vmem:[#allocation3 + $0x38] sm:$0xff] %vm797_vm4, %v764_v36  ;;  %v891_v3 = vpop.permute.xlu0 %890  ;;  %v1722_v4 = vld [vmem:[#allocation3 + $0x20] sm:$0xff] }
 0x102   : > { %1421 = vrot.lane.b32.xlu1 %v3627_v6, %s3167_s14  ;;  %933 = vst.msk [vmem:[#allocation3 + $0x30] sm:$0xff] %vm926_vm5, %v891_v3  ;;  %2981 = vmatprep.mubr.msk.bf16.mxu0 %vm1754_vm12, %v1722_v4 }
 0x103   : > { %1548 = vrot.lane.b32.xlu0 %v1117_v53, %s3168_s15 }
 0x104   : > { %v893_v5 = vpop.permute.xlu1 %892 }
 0x105   : > { %934 = vst.msk [vmem:[#allocation3 + $0x38] sm:$0xff] %vm926_vm5, %v893_v5  ;;  %v1020_v54 = vpop.permute.xlu0 %1019  ;;  %v1723_v51 = vld [vmem:[#allocation3 + $0x28] sm:$0xff] }
 0x106   : > { %1550 = vrot.lane.b32.xlu1 %v1505_v63, %s3168_s15  ;;  %1062 = vst.msk [vmem:[#allocation3 + $0x30] sm:$0xff] %vm1055_vm6, %v1020_v54  ;;  %2982 = vmatmul.mubr.msk.bf16.gmra.mrb[8].mxu0 %vm1754_vm12, %v1723_v51 }
 0x107   : > { %1677 = vrot.lane.b32.xlu0 %v1246_v59, %s3169_s22 }
 0x108   : > { %v1022_v9 = vpop.permute.xlu1 %1021 }
 0x109   : > { %1063 = vst.msk [vmem:[#allocation3 + $0x38] sm:$0xff] %vm1055_vm6, %v1022_v9  ;;  %v1149_v11 = vpop.permute.xlu0 %1148 }
 0x10a   : > { %777 = vrot.lane.b32.xlu1 %v1117_v53, %s3162_s25  ;;  %1191 = vst.msk [vmem:[#allocation3 + $0x30] sm:$0xff] %vm1184_vm7, %v1149_v11 }
 0x10b   : > { %1679 = vrot.lane.b32.xlu0 %v1634_v10, %s3169_s22 }
 0x10c   : > { %v1151_v12 = vpop.permute.xlu1 %1150 }
 0x10d   : > { %1192 = vst.msk [vmem:[#allocation3 + $0x38] sm:$0xff] %vm1184_vm7, %v1151_v12  ;;  %v1278_v39 = vpop.permute.xlu0 %1277 }
 0x10e   : > { %779 = vrot.lane.b32.xlu1 %v1505_v63, %s3162_s25  ;;  %1320 = vst.msk [vmem:[#allocation3 + $0x30] sm:$0xff] %vm1313_vm8, %v1278_v39  ;;  %s4201_s25 = smov 40  }
 0x10f   : > { %906 = vrot.lane.b32.xlu0 %v1246_v59, %s4197_s29 }
 0x110   : > { %v1280_v16 = vpop.permute.xlu1 %1279 }
 0x111   : > { %1321 = vst.msk [vmem:[#allocation3 + $0x38] sm:$0xff] %vm1313_vm8, %v1280_v16  ;;  %v1408_v18 = vpop.permute.xlu0 %1407 }
 0x112   : > { %908 = vrot.lane.b32.xlu1 %v1634_v10, %s4197_s29  ;;  %1450 = vst.msk [vmem:[#allocation3 + $0x30] sm:$0xff] %vm1443_vm9, %v1408_v18 }
 0x113   : > { %1035 = vrot.lane.b32.xlu0 %v3627_v6, %s3164_s30 }
 0x114   : > { %v1410_v21 = vpop.permute.xlu1 %1409 }
 0x115   : > { %1451 = vst.msk [vmem:[#allocation3 + $0x38] sm:$0xff] %vm1443_vm9, %v1410_v21  ;;  %v1537_v22 = vpop.permute.xlu0 %1536 }
 0x116   : > { %1037 = vrot.lane.b32.xlu1 %v990_v17, %s3164_s30  ;;  %1579 = vst.msk [vmem:[#allocation3 + $0x30] sm:$0xff] %vm1572_vm10, %v1537_v22 }
 0x117   : > { %1164 = vrot.lane.b32.xlu0 %v1505_v63, %s4199_s12 }
 0x118   : > { %v1539_v25 = vpop.permute.xlu1 %1538 }
 0x119   : > { %1580 = vst.msk [vmem:[#allocation3 + $0x38] sm:$0xff] %vm1572_vm10, %v1539_v25  ;;  %v1666_v13 = vpop.permute.xlu0 %1665 }
 0x11a   : > { %1166 = vrot.lane.b32.xlu1 %v1119_v2, %s4199_s12  ;;  %1708 = vst.msk [vmem:[#allocation3 + $0x30] sm:$0xff] %vm1701_vm11, %v1666_v13 }
 0x11b   : > { %1293 = vrot.lane.b32.xlu0 %v1634_v10, %s4207_s13 }
 0x11c   : > { %v766_v6 = vpop.permute.xlu1 %765 }
 0x11d   : > { %806 = vst.msk [vmem:[#allocation3 + $0x40] sm:$0xff] %vm797_vm4, %v766_v6  ;;  %v1668_v29 = vpop.permute.xlu0 %1667 }
 0x11e   : > { %1295 = vrot.lane.b32.xlu1 %v1248_v26, %s4207_s13  ;;  %1709 = vst.msk [vmem:[#allocation3 + $0x38] sm:$0xff] %vm1701_vm11, %v1668_v29  ;;  %s3172_s13 = smov 64  }
 0x11f   : > { %1423 = vrot.lane.b32.xlu0 %v990_v17, %s3167_s14 }
 0x120   : > { %v768_v33 = vpop.permute.xlu1 %767 }
 0x121   : > { %807 = vst.msk [vmem:[#allocation3 + $0x48] sm:$0xff] %vm797_vm4, %v768_v33  ;;  %v895_v37 = vpop.permute.xlu0 %894  ;;  %v1724_v38 = vld [vmem:[#allocation3 + $0x30] sm:$0xff] }
 0x122   : > { %1425 = vrot.lane.b32.xlu1 %v1378_v43, %s3167_s14  ;;  %935 = vst.msk [vmem:[#allocation3 + $0x40] sm:$0xff] %vm926_vm5, %v895_v37  ;;  %2985 = vmatprep.mubr.msk.bf16.mxu0 %vm1754_vm12, %v1724_v38 }
 0x123   : > { %1552 = vrot.lane.b32.xlu0 %v1119_v2, %s3168_s15 }
 0x124   : > { %v897_v41 = vpop.permute.xlu1 %896 }
 0x125   : > { %936 = vst.msk [vmem:[#allocation3 + $0x48] sm:$0xff] %vm926_vm5, %v897_v41  ;;  %v1024_v0 = vpop.permute.xlu0 %1023  ;;  %v1725_v30 = vld [vmem:[#allocation3 + $0x38] sm:$0xff] }
 0x126   : > { %1554 = vrot.lane.b32.xlu1 %v1507_v35, %s3168_s15  ;;  %1064 = vst.msk [vmem:[#allocation3 + $0x40] sm:$0xff] %vm1055_vm6, %v1024_v0  ;;  %2986 = vmatmul.mubr.msk.bf16.gmra.mrb[12].mxu0 %vm1754_vm12, %v1725_v30  ;;  %v3923_v30 = vld [vmem:[%s4187_s4] ss:$0 sm:$0xff]  ;;  %s3170_s15 = smov 48  }
 0x127   : > { %1681 = vrot.lane.b32.xlu0 %v1248_v26, %s3169_s22 }
 0x128   : > { %v1026_v44 = vpop.permute.xlu1 %1025 }
 0x129   : > { %1065 = vst.msk [vmem:[#allocation3 + $0x48] sm:$0xff] %vm1055_vm6, %v1026_v44  ;;  %v1153_v45 = vpop.permute.xlu0 %1152 }
 0x12a   : > { %1683 = vrot.lane.b32.xlu1 %v1636_v42, %s3169_s22  ;;  %1193 = vst.msk [vmem:[#allocation3 + $0x40] sm:$0xff] %vm1184_vm7, %v1153_v45 }
 0x12c   : > { %v1155_v46 = vpop.permute.xlu1 %1154 }
 0x12d   : > { %1194 = vst.msk [vmem:[#allocation3 + $0x48] sm:$0xff] %vm1184_vm7, %v1155_v46  ;;  %v1282_v47 = vpop.permute.xlu0 %1281 }
 0x12e   : > { %1322 = vst.msk [vmem:[#allocation3 + $0x40] sm:$0xff] %vm1313_vm8, %v1282_v47 }
 0x130   : > { %v1284_v49 = vpop.permute.xlu1 %1283 }
 0x131   : > { %1323 = vst.msk [vmem:[#allocation3 + $0x48] sm:$0xff] %vm1313_vm8, %v1284_v49  ;;  %v1412_v50 = vpop.permute.xlu0 %1411 }
 0x132   : > { %1452 = vst.msk [vmem:[#allocation3 + $0x40] sm:$0xff] %vm1443_vm9, %v1412_v50 }
 0x134   : > { %v1414_v52 = vpop.permute.xlu1 %1413 }
 0x135   : > { %1453 = vst.msk [vmem:[#allocation3 + $0x48] sm:$0xff] %vm1443_vm9, %v1414_v52  ;;  %v1541_v53 = vpop.permute.xlu0 %1540 }
 0x136   : > { %1581 = vst.msk [vmem:[#allocation3 + $0x40] sm:$0xff] %vm1572_vm10, %v1541_v53 }
 0x138   : > { %v1543_v55 = vpop.permute.xlu1 %1542 }
 0x139   : > { %1582 = vst.msk [vmem:[#allocation3 + $0x48] sm:$0xff] %vm1572_vm10, %v1543_v55  ;;  %v1670_v56 = vpop.permute.xlu0 %1669 }
 0x13a   : > { %1710 = vst.msk [vmem:[#allocation3 + $0x40] sm:$0xff] %vm1701_vm11, %v1670_v56 }
 0x13c   : > { %v770_v57 = vpop.permute.xlu1 %769 }
 0x13d   : > { %808 = vst.msk [vmem:[#allocation3 + $0x50] sm:$0xff] %vm797_vm4, %v770_v57  ;;  %v1672_v58 = vpop.permute.xlu0 %1671 }
 0x13e   : > { %1711 = vst.msk [vmem:[#allocation3 + $0x48] sm:$0xff] %vm1701_vm11, %v1672_v58 }
 0x140   : > { %v772_v59 = vpop.permute.xlu1 %771 }
 0x141   : > { %809 = vst.msk [vmem:[#allocation3 + $0x58] sm:$0xff] %vm797_vm4, %v772_v59  ;;  %v899_v48 = vpop.permute.xlu0 %898  ;;  %v1726_v34 = vld [vmem:[#allocation3 + $0x40] sm:$0xff] }
 0x142   : > { %937 = vst.msk [vmem:[#allocation3 + $0x50] sm:$0xff] %vm926_vm5, %v899_v48  ;;  %2989 = vmatprep.mubr.msk.bf16.mxu0 %vm1754_vm12, %v1726_v34 }
 0x144   : > { %v901_v60 = vpop.permute.xlu1 %900 }
 0x145   : > { %938 = vst.msk [vmem:[#allocation3 + $0x58] sm:$0xff] %vm926_vm5, %v901_v60  ;;  %v1028_v61 = vpop.permute.xlu0 %1027  ;;  %v1727_v62 = vld [vmem:[#allocation3 + $0x48] sm:$0xff] }
 0x146   : > { %1066 = vst.msk [vmem:[#allocation3 + $0x50] sm:$0xff] %vm1055_vm6, %v1028_v61  ;;  %2990 = vmatmul.mubr.msk.bf16.gmra.mrb[16].mxu0 %vm1754_vm12, %v1727_v62  ;;  %v2128_v61 = vld [vmem:[#allocation4 + $0x1] ss:$2 sm:$0xff] }
 0x148   : > { %v1030_v36 = vpop.permute.xlu1 %1029 }
 0x149   : > { %1067 = vst.msk [vmem:[#allocation3 + $0x58] sm:$0xff] %vm1055_vm6, %v1030_v36  ;;  %v1157_v63 = vpop.permute.xlu0 %1156  ;;  %v2104_v36 = vld [vmem:[#allocation4] ss:$2 sm:$0xff] }
 0x14a   : > { %1195 = vst.msk [vmem:[#allocation3 + $0x50] sm:$0xff] %vm1184_vm7, %v1157_v63 }
 0x14c   : > { %v1159_v3 = vpop.permute.xlu1 %1158 }
 0x14d   : > { %1196 = vst.msk [vmem:[#allocation3 + $0x58] sm:$0xff] %vm1184_vm7, %v1159_v3  ;;  %v1286_v4 = vpop.permute.xlu0 %1285  ;;  %v2169_v3 = vld [vmem:[#allocation4 + $0x2] ss:$2 sm:$0xff] }
 0x14e   : > { %1324 = vst.msk [vmem:[#allocation3 + $0x50] sm:$0xff] %vm1313_vm8, %v1286_v4 }
 0x150   : > { %v1288_v5 = vpop.permute.xlu1 %1287 }
 0x151   : > { %1325 = vst.msk [vmem:[#allocation3 + $0x58] sm:$0xff] %vm1313_vm8, %v1288_v5  ;;  %v1416_v7 = vpop.permute.xlu0 %1415 }
 0x152   : > { %1454 = vst.msk [vmem:[#allocation3 + $0x50] sm:$0xff] %vm1443_vm9, %v1416_v7 }
 0x154   : > { %v1418_v8 = vpop.permute.xlu1 %1417 }
 0x155   : > { %1455 = vst.msk [vmem:[#allocation3 + $0x58] sm:$0xff] %vm1443_vm9, %v1418_v8  ;;  %v1545_v54 = vpop.permute.xlu0 %1544 }
 0x156   : > { %1583 = vst.msk [vmem:[#allocation3 + $0x50] sm:$0xff] %vm1572_vm10, %v1545_v54 }
 0x158   : > { %v1547_v51 = vpop.permute.xlu1 %1546 }
 0x159   : > { %1584 = vst.msk [vmem:[#allocation3 + $0x58] sm:$0xff] %vm1572_vm10, %v1547_v51  ;;  %v1674_v9 = vpop.permute.xlu0 %1673 }
 0x15a   : > { %1712 = vst.msk [vmem:[#allocation3 + $0x50] sm:$0xff] %vm1701_vm11, %v1674_v9 }
 0x15c   : > { %v774_v10 = vpop.permute.xlu1 %773 }
 0x15d   : > { %810 = vst.msk [vmem:[#allocation3 + $0x60] sm:$0xff] %vm797_vm4, %v774_v10  ;;  %v1676_v11 = vpop.permute.xlu0 %1675 }
 0x15e   : > { %1713 = vst.msk [vmem:[#allocation3 + $0x58] sm:$0xff] %vm1701_vm11, %v1676_v11 }
 0x160   : > { %v776_v12 = vpop.permute.xlu1 %775 }
 0x161   : > { %811 = vst.msk [vmem:[#allocation3 + $0x68] sm:$0xff] %vm797_vm4, %v776_v12  ;;  %v903_v39 = vpop.permute.xlu0 %902  ;;  %v1728_v14 = vld [vmem:[#allocation3 + $0x50] sm:$0xff] }
 0x162   : > { %939 = vst.msk [vmem:[#allocation3 + $0x60] sm:$0xff] %vm926_vm5, %v903_v39  ;;  %2993 = vmatprep.mubr.msk.bf16.mxu0 %vm1754_vm12, %v1728_v14 }
 0x164   : > { %v905_v15 = vpop.permute.xlu1 %904 }
 0x165   : > { %940 = vst.msk [vmem:[#allocation3 + $0x68] sm:$0xff] %vm926_vm5, %v905_v15  ;;  %v1032_v16 = vpop.permute.xlu0 %1031  ;;  %v1729_v17 = vld [vmem:[#allocation3 + $0x58] sm:$0xff] }
 0x166   : > { %1068 = vst.msk [vmem:[#allocation3 + $0x60] sm:$0xff] %vm1055_vm6, %v1032_v16  ;;  %2994 = vmatmul.mubr.msk.bf16.gmra.mrb[20].mxu0 %vm1754_vm12, %v1729_v17 }
 0x168   : > { %v1034_v18 = vpop.permute.xlu1 %1033 }
 0x169   : > { %1069 = vst.msk [vmem:[#allocation3 + $0x68] sm:$0xff] %vm1055_vm6, %v1034_v18  ;;  %v1161_v1 = vpop.permute.xlu0 %1160 }
 0x16a   : > { %1197 = vst.msk [vmem:[#allocation3 + $0x60] sm:$0xff] %vm1184_vm7, %v1161_v1 }
 0x16c   : > { %v1163_v20 = vpop.permute.xlu1 %1162 }
 0x16d   : > { %1198 = vst.msk [vmem:[#allocation3 + $0x68] sm:$0xff] %vm1184_vm7, %v1163_v20  ;;  %v1290_v21 = vpop.permute.xlu0 %1289 }
 0x16e   : > { %1326 = vst.msk [vmem:[#allocation3 + $0x60] sm:$0xff] %vm1313_vm8, %v1290_v21 }
 0x170   : > { %v1292_v2 = vpop.permute.xlu1 %1291 }
 0x171   : > { %1327 = vst.msk [vmem:[#allocation3 + $0x68] sm:$0xff] %vm1313_vm8, %v1292_v2  ;;  %v1420_v22 = vpop.permute.xlu0 %1419 }
 0x172   : > { %1456 = vst.msk [vmem:[#allocation3 + $0x60] sm:$0xff] %vm1443_vm9, %v1420_v22 }
 0x174   : > { %v1422_v23 = vpop.permute.xlu1 %1421 }
 0x175   : > { %1457 = vst.msk [vmem:[#allocation3 + $0x68] sm:$0xff] %vm1443_vm9, %v1422_v23  ;;  %v1549_v24 = vpop.permute.xlu0 %1548 }
 0x176   : > { %1585 = vst.msk [vmem:[#allocation3 + $0x60] sm:$0xff] %vm1572_vm10, %v1549_v24 }
 0x178   : > { %v1551_v25 = vpop.permute.xlu1 %1550 }
 0x179   : > { %1586 = vst.msk [vmem:[#allocation3 + $0x68] sm:$0xff] %vm1572_vm10, %v1551_v25  ;;  %v1678_v26 = vpop.permute.xlu0 %1677 }
 0x17a   : > { %1714 = vst.msk [vmem:[#allocation3 + $0x60] sm:$0xff] %vm1701_vm11, %v1678_v26 }
 0x17c   : > { %v778_v13 = vpop.permute.xlu1 %777 }
 0x17d   : > { %812 = vst.msk [vmem:[#allocation3 + $0x70] sm:$0xff] %vm797_vm4, %v778_v13  ;;  %v1680_v28 = vpop.permute.xlu0 %1679 }
 0x17e   : > { %1715 = vst.msk [vmem:[#allocation3 + $0x68] sm:$0xff] %vm1701_vm11, %v1680_v28 }
 0x180   : > { %v780_v27 = vpop.permute.xlu1 %779 }
 0x181   : > { %813 = vst.msk [vmem:[#allocation3 + $0x78] sm:$0xff] %vm797_vm4, %v780_v27  ;;  %v907_v6 = vpop.permute.xlu0 %906  ;;  %v1730_v43 = vld [vmem:[#allocation3 + $0x60] sm:$0xff] }
 0x182   : > { %941 = vst.msk [vmem:[#allocation3 + $0x70] sm:$0xff] %vm926_vm5, %v907_v6  ;;  %2997 = vmatprep.mubr.msk.bf16.mxu0 %vm1754_vm12, %v1730_v43 }
 0x184   : > { %v909_v29 = vpop.permute.xlu1 %908 }
 0x185   : > { %942 = vst.msk [vmem:[#allocation3 + $0x78] sm:$0xff] %vm926_vm5, %v909_v29  ;;  %v1036_v31 = vpop.permute.xlu0 %1035  ;;  %v1731_v32 = vld [vmem:[#allocation3 + $0x68] sm:$0xff] }
 0x186   : > { %1070 = vst.msk [vmem:[#allocation3 + $0x70] sm:$0xff] %vm1055_vm6, %v1036_v31  ;;  %2998 = vmatmul.mubr.msk.bf16.gmra.mrb[24].mxu0 %vm1754_vm12, %v1731_v32 }
 0x188   : > { %v1038_v33 = vpop.permute.xlu1 %1037 }
 0x189   : > { %1071 = vst.msk [vmem:[#allocation3 + $0x78] sm:$0xff] %vm1055_vm6, %v1038_v33  ;;  %v1165_v35 = vpop.permute.xlu0 %1164 }
 0x18a   : > { %1199 = vst.msk [vmem:[#allocation3 + $0x70] sm:$0xff] %vm1184_vm7, %v1165_v35 }
 0x18c   : > { %v1167_v37 = vpop.permute.xlu1 %1166 }
 0x18d   : > { %1200 = vst.msk [vmem:[#allocation3 + $0x78] sm:$0xff] %vm1184_vm7, %v1167_v37  ;;  %v1294_v38 = vpop.permute.xlu0 %1293 }
 0x18e   : > { %1328 = vst.msk [vmem:[#allocation3 + $0x70] sm:$0xff] %vm1313_vm8, %v1294_v38 }
 0x190   : > { %v1296_v19 = vpop.permute.xlu1 %1295 }
 0x191   : > { %1329 = vst.msk [vmem:[#allocation3 + $0x78] sm:$0xff] %vm1313_vm8, %v1296_v19  ;;  %v1424_v40 = vpop.permute.xlu0 %1423 }
 0x192   : > { %1458 = vst.msk [vmem:[#allocation3 + $0x70] sm:$0xff] %vm1443_vm9, %v1424_v40 }
 0x194   : > { %v1426_v41 = vpop.permute.xlu1 %1425 }
 0x195   : > { %1459 = vst.msk [vmem:[#allocation3 + $0x78] sm:$0xff] %vm1443_vm9, %v1426_v41  ;;  %v1553_v42 = vpop.permute.xlu0 %1552 }
 0x196   : > { %1587 = vst.msk [vmem:[#allocation3 + $0x70] sm:$0xff] %vm1572_vm10, %v1553_v42 }
 0x198   : > { %v1555_v0 = vpop.permute.xlu1 %1554 }
 0x199   : > { %1588 = vst.msk [vmem:[#allocation3 + $0x78] sm:$0xff] %vm1572_vm10, %v1555_v0  ;;  %v1682_v44 = vpop.permute.xlu0 %1681  ;;  %v2975_v45 = vpop.f32.mrb[0].mxu0 }
 0x19a   : > { %1716 = vst.msk [vmem:[#allocation3 + $0x70] sm:$0xff] %vm1701_vm11, %v1682_v44  ;;  %vm1970_vm1 = vcmp.gt.f32.partialorder %v2975_v45, 0.0  ;;  %v2009_v46 = vmul.f32 %v2975_v45, %v3923_v30  ;;  %v1841_v49 = vpop.f32.mrb[1].mxu0 }
 0x19b   : > { %vm1968_vm2 = vcmp.gt.f32.partialorder %v1841_v49, 0.0  ;;  %v2007_v50 = vmul.f32 %v3923_v30, %v1841_v49  ;;  %v2976_v52 = vpop.f32.mrb[2].mxu0 }
 0x19c   : > { %v1684_v47 = vpop.permute.xlu1 %1683  ;;  %v2041_v53 = vsel %vm1970_vm1, %v2975_v45, %v2009_v46  ;;  %vm1971_vm4 = vcmp.gt.f32.partialorder %v2976_v52, 0.0  ;;  %v2010_v55 = vmul.f32 %v2976_v52, %v3923_v30  ;;  %v1844_v56 = vpop.f32.mrb[3].mxu0 }
 0x19d   : > { %1717 = vst.msk [vmem:[#allocation3 + $0x78] sm:$0xff] %vm1701_vm11, %v1684_v47  ;;  %v2039_v57 = vsel %vm1968_vm2, %v1841_v49, %v2007_v50  ;;  %vm1969_vm5 = vcmp.gt.f32.partialorder %v1844_v56, 0.0  ;;  %v2008_v58 = vmul.f32 %v3923_v30, %v1844_v56 }
 0x19e   : > { %2074 = vst.msk [vmem:[#allocation4 + $0x31] sm:$0xff] %vm432_vm13, %v2041_v53  ;;  %2072 = vst.msk [vmem:[#allocation4 + $0x19] sm:$0xff] %vm432_vm13, %v2039_v57  ;;  %v2042_v59 = vsel %vm1971_vm4, %v2976_v52, %v2010_v55 }
 0x19f   : > { %2075 = vst.msk [vmem:[#allocation4 + $0x39] sm:$0xff] %vm432_vm13, %v2042_v59  ;;  %v2040_v48 = vsel %vm1969_vm5, %v1844_v56, %v2008_v58  ;;  %vm2507_vm5 = vcmask 1043456  }
 0x1a0   : > { %2073 = vst.msk [vmem:[#allocation4 + $0x21] sm:$0xff] %vm432_vm13, %v2040_v48 }
 0x1a1   : > { %v1732_v34 = vld [vmem:[#allocation3 + $0x70] sm:$0xff] }
 0x1a2   : > { %3001 = vmatprep.mubr.msk.bf16.mxu0 %vm1754_vm12, %v1732_v34 }
 0x1a4   : > { %v1733_v60 = vld [vmem:[#allocation3 + $0x78] sm:$0xff] }
 0x1a5   : > { %3002 = vmatmul.mubr.msk.bf16.gmra.mrb[28].mxu0 %vm1754_vm12, %v1733_v60 }
 0x1a6   : > { %v2130_v62 = vld [vmem:[#allocation4 + $0x31] ss:$2 sm:$0xff]  ;;  %v2171_v4 = vld [vmem:[#allocation4 + $0x32] ss:$2 sm:$0xff] }
 0x1a7   : > { %v2143_v63 = vpack.c.bf16 %v2130_v62, %v2128_v61  ;;  %v2106_v5 = vld [vmem:[#allocation4 + $0x30] ss:$2 sm:$0xff]  ;;  %v2184_v8 = vpack.c.bf16 %v2171_v4, %v2169_v3  ;;  %v2373_v22 = vld [vmem:[#allocation4 + $0x31] ss:$2 sm:$0xff] }
 0x1a8   : > { %v2119_v7 = vpack.c.bf16 %v2106_v5, %v2104_v36  ;;  %v2332_v1 = vld [vmem:[#allocation4 + $0x30] ss:$2 sm:$0xff]  ;;  %v2250_v43 = vld [vmem:[#allocation4 + $0x19] ss:$2 sm:$0xff] }
 0x1a9   : > { %2151 = vrot.lane.b32.xlu0 %v2143_v63, %s4197_s29  ;;  %v2414_v25 = vld [vmem:[#allocation4 + $0x32] ss:$2 sm:$0xff] }
 0x1aa   : > { %2123 = vst.msk [vmem:[#allocation5] sm:$0xff] %vm432_vm13, %v2119_v7  ;;  %v2209_v28 = vld [vmem:[#allocation4 + $0x18] ss:$2 sm:$0xff] }
 0x1ab   : > { %v2291_v37 = vld [vmem:[#allocation4 + $0x1a] ss:$2 sm:$0xff] }
 0x1ad   : > { %2192 = vrot.lane.b32.xlu0 %v2184_v8, %s4199_s12 }
 0x1b9   : > { %v2979_v54 = vpop.f32.mrb[4].mxu0 }
 0x1ba   : > { %vm1974_vm6 = vcmp.gt.f32.partialorder %v2979_v54, 0.0  ;;  %v2013_v51 = vmul.f32 %v2979_v54, %v3923_v30  ;;  %v1857_v9 = vpop.f32.mrb[5].mxu0 }
 0x1bb   : > { %vm1972_vm7 = vcmp.gt.f32.partialorder %v1857_v9, 0.0  ;;  %v2011_v10 = vmul.f32 %v3923_v30, %v1857_v9  ;;  %v2980_v11 = vpop.f32.mrb[6].mxu0 }
 0x1bc   : > { %v2045_v12 = vsel %vm1974_vm6, %v2979_v54, %v2013_v51  ;;  %vm1975_vm8 = vcmp.gt.f32.partialorder %v2980_v11, 0.0  ;;  %v2014_v39 = vmul.f32 %v2980_v11, %v3923_v30  ;;  %v1860_v14 = vpop.f32.mrb[7].mxu0  ;;  %v3092_v54 = vld [vmem:[%s4188_s5] sm:$0xff]   ;;  %vm2163_vm6 = vcmask 130112  }
 0x1bd   : > { %2078 = vst.msk [vmem:[#allocation4 + $0x61] sm:$0xff] %vm432_vm13, %v2045_v12  ;;  %v2043_v15 = vsel %vm1972_vm7, %v1857_v9, %v2011_v10  ;;  %vm1973_vm9 = vcmp.gt.f32.partialorder %v1860_v14, 0.0  ;;  %v2012_v16 = vmul.f32 %v3923_v30, %v1860_v14  ;;  %3005 = vmatprep.subr.bf16.mxu1 %v3092_v54 }
 0x1be   : > { %2076 = vst.msk [vmem:[#allocation4 + $0x49] sm:$0xff] %vm432_vm13, %v2043_v15  ;;  %v2046_v17 = vsel %vm1975_vm8, %v2980_v11, %v2014_v39  ;;  %3006 = vmatpush3.bf16.msra.mxu1 %v3092_v54  ;;  %v3093_v15 = vld [vmem:[%s4188_s5 + $0x8] sm:$0xff]  }
 0x1bf   : > { %2079 = vst.msk [vmem:[#allocation4 + $0x69] sm:$0xff] %vm432_vm13, %v2046_v17  ;;  %v2044_v18 = vsel %vm1973_vm9, %v1860_v14, %v2012_v16  ;;  %3007 = vmatprep.subr.bf16.mxu1 %v3093_v15  ;;  %v3094_v17 = vld [vmem:[%s4188_s5 + $0x10] sm:$0xff]  }
 0x1c0   : > { %2077 = vst.msk [vmem:[#allocation4 + $0x51] sm:$0xff] %vm432_vm13, %v2044_v18 }
 0x1c2   : > { %3008 = vmatpush3.bf16.msra.mxu1 %v3093_v15 }
 0x1c3   : > { %3009 = vmatprep.subr.bf16.mxu1 %v3094_v17 }
 0x1c6   : > { %v2334_v20 = vld [vmem:[#allocation4 + $0x60] ss:$2 sm:$0xff]  ;;  %v2375_v2 = vld [vmem:[#allocation4 + $0x61] ss:$2 sm:$0xff]  ;;  %3010 = vmatpush3.bf16.msra.mxu1 %v3094_v17 }
 0x1c7   : > { %v2347_v21 = vpack.c.bf16 %v2334_v20, %v2332_v1  ;;  %v2388_v23 = vpack.c.bf16 %v2375_v2, %v2373_v22  ;;  %v2416_v24 = vld [vmem:[#allocation4 + $0x62] ss:$2 sm:$0xff]  ;;  %v2252_v6 = vld [vmem:[#allocation4 + $0x49] ss:$2 sm:$0xff] }
 0x1c8   : > { %v2429_v26 = vpack.c.bf16 %v2416_v24, %v2414_v25  ;;  %v2211_v13 = vld [vmem:[#allocation4 + $0x48] ss:$2 sm:$0xff]  ;;  %v2265_v29 = vpack.c.bf16 %v2252_v6, %v2250_v43  ;;  %v2132_v49 = vld [vmem:[#allocation4 + $0x61] ss:$2 sm:$0xff] }
 0x1c9   : > { %2355 = vrot.lane.b32.xlu0 %v2347_v21, %s3170_s15  ;;  %v2224_v27 = vpack.c.bf16 %v2211_v13, %v2209_v28  ;;  %v2293_v31 = vld [vmem:[#allocation4 + $0x4a] ss:$2 sm:$0xff] }
 0x1ca   : > { %v2306_v40 = vpack.c.bf16 %v2293_v31, %v2291_v37  ;;  %v2108_v55 = vld [vmem:[#allocation4 + $0x60] ss:$2 sm:$0xff]  ;;  %v3096_v24 = vld [vmem:[%s4188_s5 + $0x20] ss:$0 sps:$4 sm:$0xff]  }
 0x1cb   : > { %v2173_v58 = vld [vmem:[#allocation4 + $0x62] ss:$2 sm:$0xff]  ;;  %v2509_v13 = vsel %vm2507_vm5, %v3096_v24, 0 }
 0x1cc   : > { %v3095_v2 = vld [vmem:[%s4188_s5 + $0x18] sm:$0xff]  }
 0x1cd   : > { %2396 = vrot.lane.b32.xlu0 %v2388_v23, %s3171_s16  ;;  %3011 = vmatprep.subr.bf16.mxu1 %v3095_v2 }
 0x1ce   : > { %3012 = vmatpush3.bf16.msra.mxu1 %v3095_v2 }
 0x1cf   : > { %3034 = vmatprep.subr.msk.bf16.mxu1 %vm2507_vm5, %v3096_v24  ;;  %vm2326_vm5 = vcmask 392512  }
 0x1d1   : > { %2437 = vrot.lane.b32.xlu0 %v2429_v26, %s3172_s13 }
 0x1d2   : > { %3014 = vmatpush3.bf16.msra.mxu1 %v2509_v13 }
 0x1d5   : > { %2232 = vrot.lane.b32.xlu0 %v2224_v27, %s3167_s14 }
 0x1d9   : > { %2273 = vrot.lane.b32.xlu0 %v2265_v29, %s3169_s22  ;;  %v2983_v32 = vpop.f32.mrb[8].mxu0 }
 0x1da   : > { %vm1978_vm10 = vcmp.gt.f32.partialorder %v2983_v32, 0.0  ;;  %v2017_v33 = vmul.f32 %v2983_v32, %v3923_v30  ;;  %v1873_v35 = vpop.f32.mrb[9].mxu0 }
 0x1db   : > { %vm1976_vm11 = vcmp.gt.f32.partialorder %v1873_v35, 0.0  ;;  %v2015_v38 = vmul.f32 %v3923_v30, %v1873_v35  ;;  %v2984_v19 = vpop.f32.mrb[10].mxu0 }
 0x1dc   : > { %v2049_v41 = vsel %vm1978_vm10, %v2983_v32, %v2017_v33  ;;  %vm1979_vm12 = vcmp.gt.f32.partialorder %v2984_v19, 0.0  ;;  %v2018_v42 = vmul.f32 %v2984_v19, %v3923_v30  ;;  %v1876_v0 = vpop.f32.mrb[11].mxu0 }
 0x1dd   : > { %2082 = vst.msk [vmem:[#allocation4 + $0x91] sm:$0xff] %vm432_vm13, %v2049_v41  ;;  %v2047_v44 = vsel %vm1976_vm11, %v1873_v35, %v2015_v38  ;;  %vm1977_vm14 = vcmp.gt.f32.partialorder %v1876_v0, 0.0  ;;  %v2016_v45 = vmul.f32 %v3923_v30, %v1876_v0  ;;  %2314 = vrot.lane.b32.xlu0 %v2306_v40, %s4201_s25  ;;  %vm2204_vm11 = vcmask 195712   ;;  %s4209_s25 = smov 16  }
 0x1de   : > { %2080 = vst.msk [vmem:[#allocation4 + $0x79] sm:$0xff] %vm432_vm13, %v2047_v44  ;;  %v2050_v46 = vsel %vm1979_vm12, %v2984_v19, %v2018_v42 }
 0x1df   : > { %2083 = vst.msk [vmem:[#allocation4 + $0x99] sm:$0xff] %vm432_vm13, %v2050_v46  ;;  %v2048_v47 = vsel %vm1977_vm14, %v1876_v0, %v2016_v45 }
 0x1e0   : > { %2081 = vst.msk [vmem:[#allocation4 + $0x81] sm:$0xff] %vm432_vm13, %v2048_v47 }
 0x1e6   : > { %v2134_v50 = vld [vmem:[#allocation4 + $0x91] ss:$2 sm:$0xff]  ;;  %v2175_v53 = vld [vmem:[#allocation4 + $0x92] ss:$2 sm:$0xff] }
 0x1e7   : > { %v2144_v52 = vpack.c.bf16 %v2134_v50, %v2132_v49  ;;  %v2110_v56 = vld [vmem:[#allocation4 + $0x90] ss:$2 sm:$0xff]  ;;  %v2185_v59 = vpack.c.bf16 %v2175_v53, %v2173_v58  ;;  %v2377_v16 = vld [vmem:[#allocation4 + $0x91] ss:$2 sm:$0xff] }
 0x1e8   : > { %v2120_v57 = vpack.c.bf16 %v2110_v56, %v2108_v55  ;;  %v2418_v51 = vld [vmem:[#allocation4 + $0x92] ss:$2 sm:$0xff]  ;;  %v2254_v23 = vld [vmem:[#allocation4 + $0x79] ss:$2 sm:$0xff] }
 0x1e9   : > { %2153 = vrot.lane.b32.xlu1 %v2144_v52, %s4197_s29  ;;  %v2336_v10 = vld [vmem:[#allocation4 + $0x90] ss:$2 sm:$0xff]  ;;  %s4210_s29 = smov 8  }
 0x1ea   : > { %2124 = vst.msk [vmem:[#allocation5 + $0x8] sm:$0xff] %vm432_vm13, %v2120_v57  ;;  %v2213_v20 = vld [vmem:[#allocation4 + $0x78] ss:$2 sm:$0xff] }
 0x1eb   : > { %v2295_v28 = vld [vmem:[#allocation4 + $0x7a] ss:$2 sm:$0xff] }
 0x1ed   : > { %2194 = vrot.lane.b32.xlu1 %v2185_v59, %s4199_s12  ;;  %s4208_s12 = smov 40  }
 0x1f9   : > { %v2987_v48 = vpop.f32.mrb[12].mxu0 }
 0x1fa   : > { %vm1982_vm15 = vcmp.gt.f32.partialorder %v2987_v48, 0.0  ;;  %v2021_v34 = vmul.f32 %v2987_v48, %v3923_v30  ;;  %v1889_v60 = vpop.f32.mrb[13].mxu0 }
 0x1fb   : > { %vm1980_vm1 = vcmp.gt.f32.partialorder %v1889_v60, 0.0  ;;  %v2019_v61 = vmul.f32 %v3923_v30, %v1889_v60  ;;  %v2988_v62 = vpop.f32.mrb[14].mxu0 }
 0x1fc   : > { %v2053_v36 = vsel %vm1982_vm15, %v2987_v48, %v2021_v34  ;;  %vm1983_vm2 = vcmp.gt.f32.partialorder %v2988_v62, 0.0  ;;  %v2022_v63 = vmul.f32 %v2988_v62, %v3923_v30  ;;  %v1892_v3 = vpop.f32.mrb[15].mxu0 }
 0x1fd   : > { %2086 = vst.msk [vmem:[#allocation4 + $0xc1] sm:$0xff] %vm432_vm13, %v2053_v36  ;;  %v2051_v4 = vsel %vm1980_vm1, %v1889_v60, %v2019_v61  ;;  %vm1981_vm4 = vcmp.gt.f32.partialorder %v1892_v3, 0.0  ;;  %v2020_v5 = vmul.f32 %v3923_v30, %v1892_v3 }
 0x1fe   : > { %2084 = vst.msk [vmem:[#allocation4 + $0xa9] sm:$0xff] %vm432_vm13, %v2051_v4  ;;  %v2054_v7 = vsel %vm1983_vm2, %v2988_v62, %v2022_v63  ;;  %vm2244_vm2 = vcmask 261312  }
 0x1ff   : > { %2087 = vst.msk [vmem:[#allocation4 + $0xc9] sm:$0xff] %vm432_vm13, %v2054_v7  ;;  %v2052_v8 = vsel %vm1981_vm4, %v1892_v3, %v2020_v5  ;;  %vm2285_vm4 = vcmask 326912  }
 0x200   : > { %2085 = vst.msk [vmem:[#allocation4 + $0xb1] sm:$0xff] %vm432_vm13, %v2052_v8 }
 0x206   : > { %v2420_v9 = vld [vmem:[#allocation4 + $0xc2] ss:$2 sm:$0xff]  ;;  %v2379_v14 = vld [vmem:[#allocation4 + $0xc1] ss:$2 sm:$0xff] }
 0x207   : > { %v2338_v11 = vld [vmem:[#allocation4 + $0xc0] ss:$2 sm:$0xff]  ;;  %v2430_v12 = vpack.c.bf16 %v2420_v9, %v2418_v51  ;;  %v2389_v18 = vpack.c.bf16 %v2379_v14, %v2377_v16  ;;  %v2256_v22 = vld [vmem:[#allocation4 + $0xa9] ss:$2 sm:$0xff] }
 0x208   : > { %v2348_v39 = vpack.c.bf16 %v2338_v11, %v2336_v10  ;;  %v2215_v1 = vld [vmem:[#allocation4 + $0xa8] ss:$2 sm:$0xff]  ;;  %v2266_v25 = vpack.c.bf16 %v2256_v22, %v2254_v23  ;;  %v2136_v46 = vld [vmem:[#allocation4 + $0xc1] ss:$2 sm:$0xff] }
 0x209   : > { %2439 = vrot.lane.b32.xlu0 %v2430_v12, %s3172_s13  ;;  %v2225_v21 = vpack.c.bf16 %v2215_v1, %v2213_v20  ;;  %v2297_v26 = vld [vmem:[#allocation4 + $0xaa] ss:$2 sm:$0xff] }
 0x20a   : > { %2357 = vrot.lane.b32.xlu1 %v2348_v39, %s3170_s15  ;;  %v2307_v27 = vpack.c.bf16 %v2297_v26, %v2295_v28  ;;  %v2177_v44 = vld [vmem:[#allocation4 + $0xc2] ss:$2 sm:$0xff] }
 0x20b   : > { %v2112_v52 = vld [vmem:[#allocation4 + $0xc0] ss:$2 sm:$0xff] }
 0x20e   : > { %2398 = vrot.lane.b32.xlu1 %v2389_v18, %s3171_s16 }
 0x212   : > { %2234 = vrot.lane.b32.xlu1 %v2225_v21, %s3167_s14 }
 0x216   : > { %2275 = vrot.lane.b32.xlu1 %v2266_v25, %s3169_s22 }
 0x219   : > { %v2991_v6 = vpop.f32.mrb[16].mxu0 }
 0x21a   : > { %2316 = vrot.lane.b32.xlu1 %v2307_v27, %s4208_s12  ;;  %vm1986_vm7 = vcmp.gt.f32.partialorder %v2991_v6, 0.0  ;;  %v2025_v43 = vmul.f32 %v2991_v6, %v3923_v30  ;;  %v1905_v29 = vpop.f32.mrb[17].mxu0 }
 0x21b   : > { %vm1984_vm8 = vcmp.gt.f32.partialorder %v1905_v29, 0.0  ;;  %v2023_v31 = vmul.f32 %v3923_v30, %v1905_v29  ;;  %v2152_v32 = vpop.permute.xlu0 %2151  ;;  %v2992_v33 = vpop.f32.mrb[18].mxu0 }
 0x21c   : > { %v2057_v35 = vsel %vm1986_vm7, %v2991_v6, %v2025_v43  ;;  %2164 = vst.msk [vmem:[#allocation5] sm:$0xff] %vm2163_vm6, %v2152_v32  ;;  %vm1987_vm9 = vcmp.gt.f32.partialorder %v2992_v33, 0.0  ;;  %v2026_v37 = vmul.f32 %v2992_v33, %v3923_v30  ;;  %v1908_v38 = vpop.f32.mrb[19].mxu0  ;;  %vm2367_vm7 = vcmask 458112  }
 0x21d   : > { %2090 = vst.msk [vmem:[#allocation4 + $0xf1] sm:$0xff] %vm432_vm13, %v2057_v35  ;;  %v2055_v19 = vsel %vm1984_vm8, %v1905_v29, %v2023_v31  ;;  %vm1985_vm10 = vcmp.gt.f32.partialorder %v1908_v38, 0.0  ;;  %v2024_v40 = vmul.f32 %v3923_v30, %v1908_v38  ;;  %vm2408_vm8 = vcmask 523712  }
 0x21e   : > { %2088 = vst.msk [vmem:[#allocation4 + $0xd9] sm:$0xff] %vm432_vm13, %v2055_v19  ;;  %v2058_v41 = vsel %vm1987_vm9, %v2992_v33, %v2026_v37  ;;  %vm2449_vm9 = vcmask 589312  }
 0x21f   : > { %2091 = vst.msk [vmem:[#allocation4 + $0xf9] sm:$0xff] %vm432_vm13, %v2058_v41  ;;  %v2056_v42 = vsel %vm1985_vm10, %v1908_v38, %v2024_v40  ;;  %v2193_v0 = vpop.permute.xlu0 %2192  ;;  %vm2494_vm10 = vcmask 588800  }
 0x220   : > { %2089 = vst.msk [vmem:[#allocation4 + $0xe1] sm:$0xff] %vm432_vm13, %v2056_v42 }
 0x221   : > { %2205 = vst.msk [vmem:[#allocation5] sm:$0xff] %vm2204_vm11, %v2193_v0 }
 0x226   : > { %v2179_v45 = vld [vmem:[#allocation4 + $0xf2] ss:$2 sm:$0xff]  ;;  %v2138_v47 = vld [vmem:[#allocation4 + $0xf1] ss:$2 sm:$0xff] }
 0x227   : > { %v2186_v49 = vpack.c.bf16 %v2179_v45, %v2177_v44  ;;  %v2145_v50 = vpack.c.bf16 %v2138_v47, %v2136_v46  ;;  %v2114_v53 = vld [vmem:[#allocation4 + $0xf0] ss:$2 sm:$0xff]  ;;  %v2381_v11 = vld [vmem:[#allocation4 + $0xf1] ss:$2 sm:$0xff] }
 0x228   : > { %v2121_v55 = vpack.c.bf16 %v2114_v53, %v2112_v52  ;;  %v2340_v8 = vld [vmem:[#allocation4 + $0xf0] ss:$2 sm:$0xff]  ;;  %v2258_v1 = vld [vmem:[#allocation4 + $0xd9] ss:$2 sm:$0xff] }
 0x229   : > { %2196 = vrot.lane.b32.xlu0 %v2186_v49, %s4209_s25  ;;  %2155 = vrot.lane.b32.xlu1 %v2145_v50, %s4210_s29  ;;  %v2217_v15 = vld [vmem:[#allocation4 + $0xd8] ss:$2 sm:$0xff] }
 0x22a   : > { %2125 = vst.msk [vmem:[#allocation5 + $0x10] sm:$0xff] %vm432_vm13, %v2121_v55  ;;  %v2299_v2 = vld [vmem:[#allocation4 + $0xda] ss:$2 sm:$0xff] }
 0x22b   : > { %v2422_v28 = vld [vmem:[#allocation4 + $0xf2] ss:$2 sm:$0xff] }
 0x239   : > { %v2995_v56 = vpop.f32.mrb[20].mxu0 }
 0x23a   : > { %vm1990_vm12 = vcmp.gt.f32.partialorder %v2995_v56, 0.0  ;;  %v2029_v57 = vmul.f32 %v2995_v56, %v3923_v30  ;;  %v1921_v58 = vpop.f32.mrb[21].mxu0 }
 0x23b   : > { %vm1988_vm14 = vcmp.gt.f32.partialorder %v1921_v58, 0.0  ;;  %v2027_v59 = vmul.f32 %v3923_v30, %v1921_v58  ;;  %v2356_v48 = vpop.permute.xlu0 %2355  ;;  %v2996_v34 = vpop.f32.mrb[22].mxu0 }
 0x23c   : > { %v2061_v60 = vsel %vm1990_vm12, %v2995_v56, %v2029_v57  ;;  %vm1991_vm15 = vcmp.gt.f32.partialorder %v2996_v34, 0.0  ;;  %v2030_v61 = vmul.f32 %v2996_v34, %v3923_v30  ;;  %v1924_v62 = vpop.f32.mrb[23].mxu0 }
 0x23d   : > { %2094 = vst.msk [vmem:[#allocation4 + $0x121] sm:$0xff] %vm432_vm13, %v2061_v60  ;;  %v2059_v36 = vsel %vm1988_vm14, %v1921_v58, %v2027_v59  ;;  %vm1989_vm1 = vcmp.gt.f32.partialorder %v1924_v62, 0.0  ;;  %v2028_v63 = vmul.f32 %v3923_v30, %v1924_v62 }
 0x23e   : > { %2092 = vst.msk [vmem:[#allocation4 + $0x109] sm:$0xff] %vm432_vm13, %v2059_v36  ;;  %v2062_v3 = vsel %vm1991_vm15, %v2996_v34, %v2030_v61 }
 0x23f   : > { %2095 = vst.msk [vmem:[#allocation4 + $0x129] sm:$0xff] %vm432_vm13, %v2062_v3  ;;  %v2060_v4 = vsel %vm1989_vm1, %v1924_v62, %v2028_v63  ;;  %v2397_v5 = vpop.permute.xlu0 %2396 }
 0x240   : > { %2093 = vst.msk [vmem:[#allocation4 + $0x111] sm:$0xff] %vm432_vm13, %v2060_v4 }
 0x243   : > { %v2438_v7 = vpop.permute.xlu0 %2437 }
 0x246   : > { %v2342_v54 = vld [vmem:[#allocation4 + $0x120] ss:$2 sm:$0xff]  ;;  %v2383_v10 = vld [vmem:[#allocation4 + $0x121] ss:$2 sm:$0xff] }
 0x247   : > { %v2233_v51 = vpop.permute.xlu0 %2232  ;;  %v2349_v9 = vpack.c.bf16 %v2342_v54, %v2340_v8  ;;  %v2390_v39 = vpack.c.bf16 %v2383_v10, %v2381_v11  ;;  %v2219_v14 = vld [vmem:[#allocation4 + $0x108] ss:$2 sm:$0xff]  ;;  %v2260_v18 = vld [vmem:[#allocation4 + $0x109] ss:$2 sm:$0xff] }
 0x248   : > { %2245 = vst.msk [vmem:[#allocation5] sm:$0xff] %vm2244_vm2, %v2233_v51  ;;  %v2226_v17 = vpack.c.bf16 %v2219_v14, %v2217_v15  ;;  %v2267_v20 = vpack.c.bf16 %v2260_v18, %v2258_v1  ;;  %v2301_v21 = vld [vmem:[#allocation4 + $0x10a] ss:$2 sm:$0xff]  ;;  %v2140_v41 = vld [vmem:[#allocation4 + $0x121] ss:$2 sm:$0xff] }
 0x249   : > { %2359 = vrot.lane.b32.xlu0 %v2349_v9, %s3170_s15  ;;  %v2308_v22 = vpack.c.bf16 %v2301_v21, %v2299_v2  ;;  %v2424_v23 = vld [vmem:[#allocation4 + $0x122] ss:$2 sm:$0xff] }
 0x24a   : > { %v2431_v29 = vpack.c.bf16 %v2424_v23, %v2422_v28  ;;  %v2116_v45 = vld [vmem:[#allocation4 + $0x120] ss:$2 sm:$0xff] }
 0x24b   : > { %v2274_v12 = vpop.permute.xlu0 %2273  ;;  %v2181_v49 = vld [vmem:[#allocation4 + $0x122] ss:$2 sm:$0xff] }
 0x24c   : > { %2286 = vst.msk [vmem:[#allocation5] sm:$0xff] %vm2285_vm4, %v2274_v12  ;;  %v2625_v12 = vld [vmem:[%s4191_s8] sm:$0x3] }
 0x24d   : > { %2400 = vrot.lane.b32.xlu0 %v2390_v39, %s3171_s16  ;;  %3035 = vmatprep.subr.msk.bf16.mxu1 %vm1803_vm3, %v2625_v12  ;;  %v2639_v2 = vsel %vm1803_vm3, %v2625_v12, 0 }
 0x24f   : > { %v2315_v16 = vpop.permute.xlu0 %2314 }
 0x250   : > { %2327 = vst.msk [vmem:[#allocation5] sm:$0xff] %vm2326_vm5, %v2315_v16 }
 0x251   : > { %2368 = vst.msk [vmem:[#allocation5] sm:$0xff] %vm2367_vm7, %v2356_v48  ;;  %2236 = vrot.lane.b32.xlu0 %v2226_v17, %s3167_s14 }
 0x252   : > { %2409 = vst.msk [vmem:[#allocation5] sm:$0xff] %vm2408_vm8, %v2397_v5 }
 0x253   : > { %2450 = vst.msk [vmem:[#allocation5] sm:$0xff] %vm2449_vm9, %v2438_v7 }
 0x255   : > { %2277 = vrot.lane.b32.xlu0 %v2267_v20, %s3169_s22 }
 0x259   : > { %2318 = vrot.lane.b32.xlu0 %v2308_v22, %s4208_s12  ;;  %v2999_v24 = vpop.f32.mrb[24].mxu0 }
 0x25a   : > { %vm1994_vm12 = vcmp.gt.f32.partialorder %v2999_v24, 0.0  ;;  %v2033_v25 = vmul.f32 %v2999_v24, %v3923_v30  ;;  %v1937_v26 = vpop.f32.mrb[25].mxu0  ;;  %v2454_v13 = vld [vmem:[#allocation5] sm:$0xff] }
 0x25b   : > { %vm1992_vm14 = vcmp.gt.f32.partialorder %v1937_v26, 0.0  ;;  %v2031_v27 = vmul.f32 %v3923_v30, %v1937_v26  ;;  %3015 = vmatprep.mubr.msk.bf16.mxu1 %vm2494_vm10, %v2454_v13  ;;  %v2154_v6 = vpop.permute.xlu1 %2153  ;;  %v3000_v43 = vpop.f32.mrb[26].mxu0 }
 0x25c   : > { %v2065_v31 = vsel %vm1994_vm12, %v2999_v24, %v2033_v25  ;;  %2165 = vst.msk [vmem:[#allocation5 + $0x8] sm:$0xff] %vm2163_vm6, %v2154_v6  ;;  %vm1995_vm15 = vcmp.gt.f32.partialorder %v3000_v43, 0.0  ;;  %v2034_v32 = vmul.f32 %v3000_v43, %v3923_v30  ;;  %v1940_v33 = vpop.f32.mrb[27].mxu0 }
 0x25d   : > { %2098 = vst.msk [vmem:[#allocation4 + $0x151] sm:$0xff] %vm432_vm13, %v2065_v31  ;;  %v2063_v35 = vsel %vm1992_vm14, %v1937_v26, %v2031_v27  ;;  %vm1993_vm1 = vcmp.gt.f32.partialorder %v1940_v33, 0.0  ;;  %v2032_v37 = vmul.f32 %v3923_v30, %v1940_v33  ;;  %2441 = vrot.lane.b32.xlu0 %v2431_v29, %s3172_s13 }
 0x25e   : > { %2096 = vst.msk [vmem:[#allocation4 + $0x139] sm:$0xff] %vm432_vm13, %v2063_v35  ;;  %v2066_v38 = vsel %vm1995_vm15, %v3000_v43, %v2034_v32 }
 0x25f   : > { %2099 = vst.msk [vmem:[#allocation4 + $0x159] sm:$0xff] %vm432_vm13, %v2066_v38  ;;  %v2064_v19 = vsel %vm1993_vm1, %v1940_v33, %v2032_v37  ;;  %v2195_v40 = vpop.permute.xlu1 %2194 }
 0x260   : > { %2097 = vst.msk [vmem:[#allocation4 + $0x141] sm:$0xff] %vm432_vm13, %v2064_v19 }
 0x261   : > { %2206 = vst.msk [vmem:[#allocation5 + $0x8] sm:$0xff] %vm2204_vm11, %v2195_v40 }
 0x266   : > { %v2142_v42 = vld [vmem:[#allocation4 + $0x151] ss:$2 sm:$0xff]  ;;  %v2183_v44 = vld [vmem:[#allocation4 + $0x152] ss:$2 sm:$0xff] }
 0x267   : > { %v2146_v0 = vpack.c.bf16 %v2142_v42, %v2140_v41  ;;  %v2118_v46 = vld [vmem:[#allocation4 + $0x150] ss:$2 sm:$0xff]  ;;  %v2187_v50 = vpack.c.bf16 %v2183_v44, %v2181_v49  ;;  %v2385_v54 = vld [vmem:[#allocation4 + $0x151] ss:$2 sm:$0xff] }
 0x268   : > { %v2122_v47 = vpack.c.bf16 %v2118_v46, %v2116_v45  ;;  %v2344_v4 = vld [vmem:[#allocation4 + $0x150] ss:$2 sm:$0xff]  ;;  %v2262_v16 = vld [vmem:[#allocation4 + $0x139] ss:$2 sm:$0xff] }
 0x269   : > { %2157 = vrot.lane.b32.xlu1 %v2146_v0, %s4210_s29  ;;  %v2221_v11 = vld [vmem:[#allocation4 + $0x138] ss:$2 sm:$0xff] }
 0x26a   : > { %2126 = vst.msk [vmem:[#allocation5 + $0x18] sm:$0xff] %vm432_vm13, %v2122_v47  ;;  %v2303_v1 = vld [vmem:[#allocation4 + $0x13a] ss:$2 sm:$0xff] }
 0x26b   : > { %v2426_v23 = vld [vmem:[#allocation4 + $0x152] ss:$2 sm:$0xff] }
 0x26c   : > { %v2606_v42 = vld [vmem:[%s3381_s24] ss:$2 sm:$0xff] }
 0x26d   : > { %2198 = vrot.lane.b32.xlu1 %v2187_v50, %s4209_s25  ;;  %v2914_v0 = vld [vmem:[%s3381_s24 + $0x20] ss:$2 sm:$0xff] }
 0x26e   : > { %v2621_v44 = vpack.c.bf16 %v2914_v0, %v2606_v42  ;;  %v2915_v46 = vld [vmem:[%s3381_s24 + $0x40] ss:$2 sm:$0xff] }
 0x26f   : > { %v2916_v47 = vld [vmem:[%s3381_s24 + $0x60] ss:$2 sm:$0xff] }
 0x270   : > { %v2917_v49 = vld [vmem:[%s3381_s24 + $0x80] ss:$2 sm:$0xff] }
 0x271   : > { %v2918_v50 = vld [vmem:[%s3381_s24 + $0xa0] ss:$2 sm:$0xff] }
 0x278   : > { %v3003_v52 = vpop.f32.mrb[28].mxu0 }
 0x279   : > { %vm1998_vm12 = vcmp.gt.f32.partialorder %v3003_v52, 0.0  ;;  %v2037_v53 = vmul.f32 %v3003_v52, %v3923_v30  ;;  %v1953_v55 = vpop.f32.mrb[29].mxu0 }
 0x27a   : > { %vm1996_vm14 = vcmp.gt.f32.partialorder %v1953_v55, 0.0  ;;  %v2035_v56 = vmul.f32 %v3923_v30, %v1953_v55  ;;  %v3004_v57 = vpop.f32.mrb[30].mxu0 }
 0x27b   : > { %v2069_v58 = vsel %vm1998_vm12, %v3003_v52, %v2037_v53  ;;  %vm1999_vm15 = vcmp.gt.f32.partialorder %v3004_v57, 0.0  ;;  %v2038_v59 = vmul.f32 %v3004_v57, %v3923_v30  ;;  %v1956_v48 = vpop.f32.mrb[31].mxu0  ;;  %v2440_v15 = vpop.permute.xlu0 %2439  ;;  %v2622_v52 = vpack.c.bf16 %v2916_v47, %v2915_v46 }
 0x27c   : > { %2102 = vst.msk [vmem:[#allocation4 + $0x181] sm:$0xff] %vm432_vm13, %v2069_v58  ;;  %v2067_v34 = vsel %vm1996_vm14, %v1953_v55, %v2035_v56  ;;  %vm1997_vm1 = vcmp.gt.f32.partialorder %v1956_v48, 0.0  ;;  %v2036_v60 = vmul.f32 %v3923_v30, %v1956_v48  ;;  %v2358_v62 = vpop.permute.xlu1 %2357  ;;  %v2623_v53 = vpack.c.bf16 %v2918_v50, %v2917_v49  ;;  %v2919_v55 = vld [vmem:[%s3381_s24 + $0xc0] ss:$2 sm:$0xff] }
 0x27d   : > { %2100 = vst.msk [vmem:[#allocation4 + $0x169] sm:$0xff] %vm432_vm13, %v2067_v34  ;;  %v2070_v61 = vsel %vm1999_vm15, %v3004_v57, %v2038_v59  ;;  %v2920_v56 = vld [vmem:[%s3381_s24 + $0xe0] ss:$2 sm:$0xff] }
 0x27e   : > { %2103 = vst.msk [vmem:[#allocation4 + $0x189] sm:$0xff] %vm432_vm13, %v2070_v61  ;;  %v2068_v36 = vsel %vm1997_vm1, %v1956_v48, %v2036_v60  ;;  %v2624_v57 = vpack.c.bf16 %v2920_v56, %v2919_v55 }
 0x27f   : > { %2101 = vst.msk [vmem:[#allocation4 + $0x171] sm:$0xff] %vm432_vm13, %v2068_v36 }
 0x280   : > { %v2399_v63 = vpop.permute.xlu1 %2398 }
 0x284   : > { %v2235_v3 = vpop.permute.xlu1 %2234 }
 0x285   : > { %v2346_v5 = vld [vmem:[#allocation4 + $0x180] ss:$2 sm:$0xff]  ;;  %2246 = vst.msk [vmem:[#allocation5 + $0x8] sm:$0xff] %vm2244_vm2, %v2235_v3  ;;  %v2387_v8 = vld [vmem:[#allocation4 + $0x181] ss:$2 sm:$0xff] }
 0x286   : > { %v2350_v7 = vpack.c.bf16 %v2346_v5, %v2344_v4  ;;  %v2391_v51 = vpack.c.bf16 %v2387_v8, %v2385_v54  ;;  %v2223_v9 = vld [vmem:[#allocation4 + $0x168] ss:$2 sm:$0xff]  ;;  %v2264_v14 = vld [vmem:[#allocation4 + $0x169] ss:$2 sm:$0xff] }
 0x287   : > { %v2227_v39 = vpack.c.bf16 %v2223_v9, %v2221_v11  ;;  %v2268_v17 = vpack.c.bf16 %v2264_v14, %v2262_v16  ;;  %v2305_v18 = vld [vmem:[#allocation4 + $0x16a] ss:$2 sm:$0xff] }
 0x288   : > { %2361 = vrot.lane.b32.xlu1 %v2350_v7, %s3170_s15  ;;  %v2276_v30 = vpop.permute.xlu1 %2275  ;;  %v2309_v20 = vpack.c.bf16 %v2305_v18, %v2303_v1  ;;  %v2428_v21 = vld [vmem:[#allocation4 + $0x182] ss:$2 sm:$0xff]  ;;  %s377_s15 = sand.u32 1, %s3151_s18  }
 0x289   : > { %2287 = vst.msk [vmem:[#allocation5 + $0x8] sm:$0xff] %vm2285_vm4, %v2276_v30  ;;  %v2432_v24 = vpack.c.bf16 %v2428_v21, %v2426_v23  ;;  %v2925_v3 = vld [vmem:[%s4192_s9] ss:$0 sm:$0xff] }
 0x28a   : > { %v2913_v5 = vld [vmem:[%s4190_s7] ss:$0 sm:$0xff] }
 0x28b   : > { %v2926_v30 = vld [vmem:[%s4193_s10] ss:$0 sm:$0xff] }
 0x28c   : > { %2402 = vrot.lane.b32.xlu1 %v2391_v51, %s3171_s16  ;;  %v2317_v10 = vpop.permute.xlu1 %2316  ;;  %s2933_s16 = sshll.u32 %s3257_s21, 10  ;;  %s4141_s21 = scalar_lea.sflag [#allocation7], %s377_s15 }
 0x28d   : > { %2328 = vst.msk [vmem:[#allocation5 + $0x8] sm:$0xff] %vm2326_vm5, %v2317_v10  ;;  %s4129_s30 = scalar_lea.hbm %s4194_s11, %s2933_s16 }
 0x28e   : > { %2369 = vst.msk [vmem:[#allocation5 + $0x8] sm:$0xff] %vm2367_vm7, %v2358_v62 }
 0x28f   : > { %2410 = vst.msk [vmem:[#allocation5 + $0x8] sm:$0xff] %vm2408_vm8, %v2399_v63  ;;  %v2912_v63 = vld [vmem:[%s4189_s6] ss:$0 sm:$0xff] }
 0x290   : > { %2238 = vrot.lane.b32.xlu1 %v2227_v39, %s3167_s14  ;;  %2451 = vst.msk [vmem:[#allocation5 + $0x8] sm:$0xff] %vm2449_vm9, %v2440_v15  ;;  %s2878_s14 = sshll.u32 %s377_s15, 6 }
 0x294   : > { %2279 = vrot.lane.b32.xlu1 %v2268_v17, %s3169_s22  ;;  %s4112_s22 = scalar_lea.vmem [#allocation6], %s2878_s14  ;;  %s3174_s14 = smov [#allocation6]  }
 0x295   : > { %s3101_s16 = sshll.u32 %s3174_s14, 4  ;;  %s3102_s16 = int_to_ptr.vmem [resolvable:$false] %s3101_s16 }
 0x296   : > { %s3103_s24 = scalar_lea.vmem %s3102_s16, 2048 }
 0x297   : > { %v2455_v22 = vld [vmem:[#allocation5 + $0x8] sm:$0xff] }
 0x298   : > { %2320 = vrot.lane.b32.xlu1 %v2309_v20, %s4208_s12  ;;  %3016 = vmatmul.mubr.msk.bf16.vlgmr.msra.gmra.mrb[0].mxu1 %vm2494_vm10, %v2455_v22 }
 0x299   : > { %3024 = vmatpush3.bf16.msra.mxu1 %v2639_v2 }
 0x29b   : > { %v2197_v25 = vpop.permute.xlu0 %2196  ;;  %v2156_v26 = vpop.permute.xlu1 %2155 }
 0x29c   : > { %2443 = vrot.lane.b32.xlu1 %v2432_v24, %s3172_s13  ;;  %2166 = vst.msk [vmem:[#allocation5 + $0x10] sm:$0xff] %vm2163_vm6, %v2156_v26  ;;  %s2766_s13 = sshll.u32 %s4112_s22, 4  ;;  %s4133_s13 = int_to_ptr.vmem [resolvable:$true] %s2766_s13 }
 0x29d   : > { %2207 = vst.msk [vmem:[#allocation5 + $0x10] sm:$0xff] %vm2204_vm11, %v2197_v25  ;;  %s3097_s25 = scalar_lea.vmem %s4133_s13, 1024  ;;  %p3104_p0 = scmp.lt.s32.totalorder %s4133_s13, %s3102_s16 }
 0x29e   : > { %p3098_p11 = scmp.ne.s32.totalorder %s4133_s13, %s3097_s25  ;;  %p3105_p1 = scmp.lt.s32.totalorder %s3103_s24, %s3097_s25 }
 0x2a0   : > { %p3099_p12 = pnand %p3098_p11, %p3274_p5  ;;  %p3106_p2 = por %p3105_p1, %p3104_p0 }
 0x2a2   : > { %p3100_p13 = pneg %p3099_p12 }
 0x2a4   : > { %p3107_p3 = pnand %p3106_p2, %p3100_p13 }
 0x2bb   : > { %v2360_v13 = vpop.permute.xlu0 %2359 }
 0x2bf   : > { %v2401_v28 = vpop.permute.xlu0 %2400 }
 0x2c3   : > { %v2237_v27 = vpop.permute.xlu0 %2236 }
 0x2c4   : > { %2247 = vst.msk [vmem:[#allocation5 + $0x10] sm:$0xff] %vm2244_vm2, %v2237_v27 }
 0x2c7   : > { %v2278_v6 = vpop.permute.xlu0 %2277 }
 0x2c8   : > { %2288 = vst.msk [vmem:[#allocation5 + $0x10] sm:$0xff] %vm2285_vm4, %v2278_v6 }
 0x2cb   : > { %v2319_v43 = vpop.permute.xlu0 %2318 }
 0x2cc   : > { %2329 = vst.msk [vmem:[#allocation5 + $0x10] sm:$0xff] %vm2326_vm5, %v2319_v43 }
 0x2cd   : > { %2370 = vst.msk [vmem:[#allocation5 + $0x10] sm:$0xff] %vm2367_vm7, %v2360_v13 }
 0x2ce   : > { %2411 = vst.msk [vmem:[#allocation5 + $0x10] sm:$0xff] %vm2408_vm8, %v2401_v28 }
 0x2cf   : > { %v2442_v29 = vpop.permute.xlu0 %2441 }
 0x2d0   : > { %2452 = vst.msk [vmem:[#allocation5 + $0x10] sm:$0xff] %vm2449_vm9, %v2442_v29 }
 0x2d7   : > { %v2456_v31 = vld [vmem:[#allocation5 + $0x10] sm:$0xff] }
 0x2d8   : > { %3019 = vmatprep.mubr.msk.bf16.mxu1 %vm2494_vm10, %v2456_v31 }
 0x2db   : > { %v2158_v32 = vpop.permute.xlu1 %2157 }
 0x2dc   : > { %2167 = vst.msk [vmem:[#allocation5 + $0x18] sm:$0xff] %vm2163_vm6, %v2158_v32 }
 0x2df   : > { %v2199_v33 = vpop.permute.xlu1 %2198 }
 0x2e0   : > { %2208 = vst.msk [vmem:[#allocation5 + $0x18] sm:$0xff] %vm2204_vm11, %v2199_v33 }
 0x2fa   : > { %v2362_v35 = vpop.permute.xlu1 %2361 }
 0x2fe   : > { %v2403_v37 = vpop.permute.xlu1 %2402 }
 0x302   : > { %v2239_v38 = vpop.permute.xlu1 %2238 }
 0x303   : > { %2248 = vst.msk [vmem:[#allocation5 + $0x18] sm:$0xff] %vm2244_vm2, %v2239_v38 }
 0x306   : > { %v2280_v19 = vpop.permute.xlu1 %2279 }
 0x307   : > { %2289 = vst.msk [vmem:[#allocation5 + $0x18] sm:$0xff] %vm2285_vm4, %v2280_v19 }
 0x30a   : > { %v2321_v40 = vpop.permute.xlu1 %2320 }
 0x30b   : > { %2330 = vst.msk [vmem:[#allocation5 + $0x18] sm:$0xff] %vm2326_vm5, %v2321_v40 }
 0x30c   : > { %2371 = vst.msk [vmem:[#allocation5 + $0x18] sm:$0xff] %vm2367_vm7, %v2362_v35 }
 0x30d   : > { %2412 = vst.msk [vmem:[#allocation5 + $0x18] sm:$0xff] %vm2408_vm8, %v2403_v37 }
 0x30e   : > { %v2444_v41 = vpop.permute.xlu1 %2443 }
 0x30f   : > { %2453 = vst.msk [vmem:[#allocation5 + $0x18] sm:$0xff] %vm2449_vm9, %v2444_v41 }
 0x316   : > { %v2457_v45 = vld [vmem:[#allocation5 + $0x18] sm:$0xff] }
 0x317   : > { %3020 = vmatmul.mubr.msk.bf16.gmra.mrb[4].mxu1 %vm2494_vm10, %v2457_v45 }
 0x318   : > { %3025 = vmatprep.mubr.msk.bf16.mxu1 %vm386_vm0, %v2621_v44 }
 0x31f   : > { %3026 = vmatmul.mubr.msk.bf16.vlgmr.msra.gmra.mrb[8].mxu1 %vm386_vm0, %v2622_v52 }
 0x320   : > { %3029 = vmatprep.mubr.msk.bf16.mxu1 %vm386_vm0, %v2623_v53 }
 0x327   : > { %3030 = vmatmul.mubr.msk.bf16.gmra.mrb[12].mxu1 %vm386_vm0, %v2624_v57 }
 0x36b   : > { %v3017_v58 = vpop.f32.mrb[0].mxu1 }
 0x36c   : > { %v2545_v59 = vpop.f32.mrb[1].mxu1  ;;  %v2585_v4 = vmul.f32 %v3017_v58, %v2912_v63 }
 0x36d   : > { %v3018_v48 = vpop.f32.mrb[2].mxu1  ;;  %v2583_v7 = vmul.f32 %v2912_v63, %v2545_v59 }
 0x36e   : > { %v2548_v34 = vpop.f32.mrb[3].mxu1  ;;  %v2586_v54 = vmul.f32 %v3018_v48, %v2912_v63  ;;  %v2600_v39 = vadd.f32 %v2913_v5, %v2585_v4 }
 0x36f   : > { %v2584_v10 = vmul.f32 %v2912_v63, %v2548_v34  ;;  %v2598_v17 = vadd.f32 %v2913_v5, %v2583_v7 }
 0x370   : > { %v2601_v20 = vadd.f32 %v2913_v5, %v2586_v54 }
 0x371   : > { %v2599_v22 = vadd.f32 %v2913_v5, %v2584_v10 }
 0x3ea   : > { %v3021_v60 = vpop.f32.mrb[4].mxu1 }
 0x3eb   : > { %v2561_v61 = vpop.f32.mrb[5].mxu1  ;;  %v2589_v25 = vmul.f32 %v3021_v60, %v2912_v63 }
 0x3ec   : > { %v3022_v62 = vpop.f32.mrb[6].mxu1  ;;  %v2587_v13 = vmul.f32 %v2912_v63, %v2561_v61 }
 0x3ed   : > { %v2564_v36 = vpop.f32.mrb[7].mxu1  ;;  %v2590_v6 = vmul.f32 %v3022_v62, %v2912_v63  ;;  %v2604_v35 = vadd.f32 %v2913_v5, %v2589_v25 }
 0x3ee   : > { %v2588_v31 = vmul.f32 %v2912_v63, %v2564_v36  ;;  %v2602_v40 = vadd.f32 %v2913_v5, %v2587_v13 }
 0x3ef   : > { %v2605_v0 = vadd.f32 %v2913_v5, %v2590_v6 }
 0x3f0   : > { %v2603_v46 = vadd.f32 %v2913_v5, %v2588_v31 }
 0x3f2   : > { %v3027_v8 = vpop.f32.mrb[8].mxu1 }
 0x3f3   : > { %v2715_v51 = vmul.f32 %v3027_v8, %v2925_v3  ;;  %v2675_v9 = vpop.f32.mrb[9].mxu1 }
 0x3f4   : > { %v2713_v11 = vmul.f32 %v2925_v3, %v2675_v9  ;;  %v3028_v12 = vpop.f32.mrb[10].mxu1 }
 0x3f5   : > { %v2730_v14 = vadd.f32 %v2926_v30, %v2715_v51  ;;  %v2716_v15 = vmul.f32 %v3028_v12, %v2925_v3  ;;  %v2678_v16 = vpop.f32.mrb[11].mxu1 }
 0x3f6   : > { %v2728_v18 = vadd.f32 %v2926_v30, %v2713_v11  ;;  %v2714_v1 = vmul.f32 %v2925_v3, %v2678_v16 }
 0x3f7   : > { %v2738_v21 = vadd.f32 %v2730_v14, %v2600_v39  ;;  %v2731_v2 = vadd.f32 %v2926_v30, %v2716_v15 }
 0x3f8   : > { %v2736_v23 = vadd.f32 %v2728_v18, %v2598_v17  ;;  %v2729_v24 = vadd.f32 %v2926_v30, %v2714_v1 }
 0x3f9   : > { %2746 = vst.msk [vmem:[%s4112_s22 + $0x10] sm:$0xff] %vm432_vm13, %v2738_v21  ;;  %v2739_v26 = vadd.f32 %v2731_v2, %v2601_v20 }
 0x3fa   : > { %2744 = vst.msk [vmem:[%s4112_s22] sm:$0xff] %vm432_vm13, %v2736_v23  ;;  %v2737_v28 = vadd.f32 %v2729_v24, %v2599_v22  ;;  %v3031_v27 = vpop.f32.mrb[12].mxu1 }
 0x3fb   : > { %2747 = vst.msk [vmem:[%s4112_s22 + $0x18] sm:$0xff] %vm432_vm13, %v2739_v26  ;;  %v2719_v43 = vmul.f32 %v3031_v27, %v2925_v3  ;;  %v2691_v29 = vpop.f32.mrb[13].mxu1 }
 0x3fc   : > { %2745 = vst.msk [vmem:[%s4112_s22 + $0x8] sm:$0xff] %vm432_vm13, %v2737_v28  ;;  %v2717_v32 = vmul.f32 %v2925_v3, %v2691_v29  ;;  %v3032_v33 = vpop.f32.mrb[14].mxu1 }
 0x3fd   : > { %v2734_v37 = vadd.f32 %v2926_v30, %v2719_v43  ;;  %v2720_v38 = vmul.f32 %v3032_v33, %v2925_v3  ;;  %v2694_v19 = vpop.f32.mrb[15].mxu1 }
 0x3fe   : > { %v2732_v41 = vadd.f32 %v2926_v30, %v2717_v32  ;;  %v2718_v42 = vmul.f32 %v2925_v3, %v2694_v19 }
 0x3ff   : > { %v2742_v44 = vadd.f32 %v2734_v37, %v2604_v35  ;;  %v2735_v45 = vadd.f32 %v2926_v30, %v2720_v38 }
 0x400   : > { %v2740_v47 = vadd.f32 %v2732_v41, %v2602_v40  ;;  %v2733_v49 = vadd.f32 %v2926_v30, %v2718_v42 }
 0x401   : > { %2750 = vst.msk [vmem:[%s4112_s22 + $0x30] sm:$0xff] %vm432_vm13, %v2742_v44  ;;  %v2743_v50 = vadd.f32 %v2735_v45, %v2605_v0 }
 0x402   : > { %2748 = vst.msk [vmem:[%s4112_s22 + $0x20] sm:$0xff] %vm432_vm13, %v2740_v47  ;;  %v2741_v52 = vadd.f32 %v2733_v49, %v2603_v46 }
 0x403   : > { %2751 = vst.msk [vmem:[%s4112_s22 + $0x38] sm:$0xff] %vm432_vm13, %v2743_v50 }
 0x404   : > { %2749 = vst.msk [vmem:[%s4112_s22 + $0x28] sm:$0xff] %vm432_vm13, %v2741_v52 }
 0x405   : > { %3110 = shalt.err (!%p3107_p3)
}
 0x406   : > { %s3111_s15 = scalar_lea.hbm %s4129_s30, 1024  ;;  %s3115_s14 = scalar_lea.hbm %s4194_s11, 2048 }
 0x407   : > { %p3112_p4 = scmp.ne.s32.totalorder %s4129_s30, %s3111_s15  ;;  %p3116_p9 = scmp.lt.u32.totalorder %s4129_s30, %s4194_s11 }
 0x408   : > { %p3117_p10 = scmp.lt.u32.totalorder %s3115_s14, %s3111_s15  ;;  %p3119_p12 = scmp.lt.u32.totalorder %s3111_s15, %s4129_s30 }
 0x409   : > { %p3113_p7 = pnand %p3112_p4, %p3274_p5 }
 0x40a   : > { %p3118_p11 = por %p3117_p10, %p3116_p9 }
 0x40b   : > { %p3114_p8 = pneg %p3113_p7 }
 0x40c   : > { %p3120_p13 = por %p3119_p12, %p3118_p11 }
 0x40e   : > { %p3121_p0 = pnand %p3120_p13, %p3114_p8 }
 0x410   : > { %3124 = shalt.err (!%p3121_p0)
}
 0x411   : > { %s3175_s25 = smov 128  }
 0x412   : > { %3036 = dma.vmem_to_hbm [thread:$0]  (%p3274_p5), %s4133_s13, 1024, %s4129_s30, %s4141_s21, %s3175_s25, %s3175_s25, %s4210_s29  }
 0x413 PF: > { %p3042_p1 = scmp.ge.s32.totalorder %s3159_s20, 2  ;;  %s2781_s0 = sand.u32 1, %s3147_s17  }
 0x414   : > { %s2782_s24 = scalar_lea.sflag [#allocation7], %s2781_s0 }
 0x415   : > { %p3039_p2 = pnand %p3042_p1, %p3278_p6 }
 0x417   : > { %3142 = dma.done.wait (!%p3039_p2), %s2782_s24, 1024  }
 0x418   : > { %3144 = vsyncadd (!%p3039_p2), %s2782_s24, 4294966272  ;;  %p21_p3 = scmp.ge.s32.totalorder %s3261_s23, 4   ;;  %s4211_s17 = smov %s3151_s18 }
 0x419   : > { %s4212_s18 = smov %s3155_s19  ;;  %s4213_s19 = smov %s3272_s26 }
 0x41a   : > { %s4214_s20 = smov %s3261_s23  ;;  %23 = sbr.rel (!%p21_p3) target bundleno = 5 (0x5), region = 181 }
 0x421   :  { %2787 = vsyncpa [#allocation7], 1 }
 0x422   :  { %2789 = vsyncpa [#allocation7 + $0x1], 1 }

</bundles_post_ra>
